<compile_context>
chip_gen: v5e
topology: v5e:2x2
jax: 0.10.0
libtpu: 0.0.40
codegen_flags: <defaults>
</compile_context>

<pallas_src>
import numpy as np
import jax
import jax.numpy as jnp
from jax.experimental import pallas as pl
from jax.experimental.pallas import tpu as pltpu

HIDDEN = 512  # fixed by the PyTorch module


# --------------------------------------------------------------------------- kernel
def _mlp_kernel(x_ref,
                w1_ref, b1_ref, w2_ref, b2_ref, w3_ref, b3_ref, w4_ref, b4_ref,
                o_ref):
    """One (tm, in_pad) bf16 row-tile -> (tm, out_pad) f32 output tile.

    All intermediates (tm x 512) stay in vregs/VMEM; every dot is bf16 x bf16 on
    the MXU with f32 accumulation; biases/ReLU are applied in f32.
    """
    dot = lambda a, b: jnp.dot(a, b, preferred_element_type=jnp.float32)

    h = jnp.maximum(dot(x_ref[...], w1_ref[...]) + b1_ref[...], 0.0)
    h = jnp.maximum(dot(h.astype(jnp.bfloat16), w2_ref[...]) + b2_ref[...], 0.0)
    h = jnp.maximum(dot(h.astype(jnp.bfloat16), w3_ref[...]) + b3_ref[...], 0.0)
    o_ref[...] = (dot(h.astype(jnp.bfloat16), w4_ref[...]) + b4_ref[...]).astype(o_ref.dtype)


# --------------------------------------------------------------------------- helpers
def _round_up(n, m):
    return ((n + m - 1) // m) * m


def _choose_row_tile(rows):
    """Pick (tm, padded_rows).

    Small batches (weight-DMA-bound): one tile covering the whole batch,
    sublane-rounded -- no pointless grid splitting.
    Large batches: 256-row tiles (full 2x256 MXU occupancy on v6e/v7x; multiple
    of 128 for v5e), 512 for very large batches to amortize per-step overhead.
    Rows are padded UP to a tile multiple, never down to skinny tiles.
    """
    if rows <= 256:
        tm = max(8, _round_up(rows, 8))
        return tm, tm
    tm = 512 if rows >= 2048 else 256
    return tm, _round_up(rows, tm)


def _build_pallas_call(padded_rows, in_pad, out_pad, tm, grid_steps,
                       single_buffer_consts):
    def const_spec(shape):
        kwargs = {"pipeline_mode": pl.Buffered(1)} if single_buffer_consts else {}
        return pl.BlockSpec(shape, lambda i: (0,) * len(shape), **kwargs)

    # Only shard across v7x's two TensorCores when each core gets >=2 tiles;
    # otherwise the duplicated weight DMA outweighs the parallel compute.
    sem = "parallel" if grid_steps >= 4 else "arbitrary"

    return pl.pallas_call(
        _mlp_kernel,
        out_shape=jax.ShapeDtypeStruct((padded_rows, out_pad), jnp.float32),
        grid_spec=pltpu.PrefetchScalarGridSpec(
            num_scalar_prefetch=0,
            grid=(grid_steps,),
            in_specs=[
                pl.BlockSpec((tm, in_pad), lambda i: (i, 0)),            # activations
                const_spec((in_pad, HIDDEN)), const_spec((1, HIDDEN)),   # layer 1
                const_spec((HIDDEN, HIDDEN)), const_spec((1, HIDDEN)),   # layer 2
                const_spec((HIDDEN, HIDDEN)), const_spec((1, HIDDEN)),   # layer 3
                const_spec((HIDDEN, out_pad)), const_spec((1, out_pad)), # layer 4
            ],
            out_specs=pl.BlockSpec((tm, out_pad), lambda i: (i, 0)),
        ),
        compiler_params=pltpu.CompilerParams(
            dimension_semantics=(sem,),
            vmem_limit_bytes=32 * 1024 * 1024,
        ),
    )


# --------------------------------------------------------------------------- wrapper
def object_encoder(x, params):
    """x: (..., input_dim) -> (..., output_dim) float32.

    params holds w1..w4 in (in_features, out_features) layout and b1..b4.
    """
    orig_shape = x.shape
    in_dim = orig_shape[-1]
    rows = int(np.prod(orig_shape[:-1])) if len(orig_shape) > 1 else 1

    x2 = jnp.asarray(x, jnp.float32).reshape(rows, in_dim)

    w1 = jnp.asarray(params["w1"], jnp.float32)
    w2 = jnp.asarray(params["w2"], jnp.float32)
    w3 = jnp.asarray(params["w3"], jnp.float32)
    w4 = jnp.asarray(params["w4"], jnp.float32)
    b1 = jnp.asarray(params["b1"], jnp.float32).reshape(1, -1)
    b2 = jnp.asarray(params["b2"], jnp.float32).reshape(1, -1)
    b3 = jnp.asarray(params["b3"], jnp.float32).reshape(1, -1)
    b4 = jnp.asarray(params["b4"], jnp.float32).reshape(1, -1)
    out_dim = w4.shape[-1]

    # Lane-dense input: zero-pad feature dim (and w1's rows) to a multiple of 128.
    in_pad = _round_up(in_dim, 128)
    if in_pad != in_dim:
        x2 = jnp.pad(x2, ((0, 0), (0, in_pad - in_dim)))
        w1 = jnp.pad(w1, ((0, in_pad - in_dim), (0, 0)))

    # Lane-dense output: pad w4/b4 columns to a multiple of 128, slice after.
    out_pad = _round_up(out_dim, 128)
    if out_pad != out_dim:
        w4 = jnp.pad(w4, ((0, 0), (0, out_pad - out_dim)))
        b4 = jnp.pad(b4, ((0, 0), (0, out_pad - out_dim)))

    # Row tiling (rows padded up to a tile multiple; padded rows sliced off below).
    tm, padded_rows = _choose_row_tile(rows)
    if padded_rows != rows:
        x2 = jnp.pad(x2, ((0, padded_rows - rows), (0, 0)))
    grid_steps = padded_rows // tm

    # bf16 MXU inputs; f32 accumulation happens inside the kernel.
    x2b = x2.astype(jnp.bfloat16)
    w1b, w2b, w3b, w4b = (w.astype(jnp.bfloat16) for w in (w1, w2, w3, w4))

    args = (x2b, w1b, b1, w2b, b2, w3b, b3, w4b, b4)
    try:
        call = _build_pallas_call(padded_rows, in_pad, out_pad, tm, grid_steps,
                                  single_buffer_consts=True)
        out = call(*args)
    except Exception:
        # Fallback: default (double) buffering of the constant blocks.
        call = _build_pallas_call(padded_rows, in_pad, out_pad, tm, grid_steps,
                                  single_buffer_consts=False)
        out = call(*args)

    out = out[:rows, :out_dim]          # drop padded rows / padded output lanes
    return out.reshape(*orig_shape[:-1], out_dim)


# --------------------------------------------------------------------------- reference
def _reference(x, params):
    """Pure-numpy f32 reference mirroring the torch module's math (x @ W + b)."""
    x = np.asarray(x, np.float32)
    lead = x.shape[:-1]
    h = x.reshape(-1, x.shape[-1])
    h = np.maximum(h @ np.asarray(params["w1"]) + np.asarray(params["b1"]), 0.0)
    h = np.maximum(h @ np.asarray(params["w2"]) + np.asarray(params["b2"]), 0.0)
    h = np.maximum(h @ np.asarray(params["w3"]) + np.asarray(params["b3"]), 0.0)
    h = h @ np.asarray(params["w4"]) + np.asarray(params["b4"])
    return h.reshape(*lead, h.shape[-1]).astype(np.float32)


# --------------------------------------------------------------------------- demo
if __name__ == "__main__":
    # TODO(synk): the torch forward's debug `print(x.shape)` is intentionally omitted.
    key = jax.random.PRNGKey(0)

    def make_params(key, in_dim, out_dim):
        ks = jax.random.split(key, 8)

        def dense(kw, kb, fan_in, fan_out):
            w = jax.random.normal(kw, (fan_in, fan_out), jnp.float32) * np.float32(
                np.sqrt(2.0 / fan_in))
            b = jax.random.normal(kb, (fan_out,), jnp.float32) * np.float32(0.1)
            return w, b

        w1, b1 = dense(ks[0], ks[1], in_dim, HIDDEN)
        w2, b2 = dense(ks[2], ks[3], HIDDEN, HIDDEN)
        w3, b3 = dense(ks[4], ks[5], HIDDEN, HIDDEN)
        w4, b4 = dense(ks[6], ks[7], HIDDEN, out_dim)
        return dict(w1=w1, b1=b1, w2=w2, b2=b2, w3=w3, b3=b3, w4=w4, b4=b4)

    k1, k2, k3, k4 = jax.random.split(key, 4)

    # Test 1: small-batch path (single tile, grid=(1,)); IN_DIM padded 32->128.
    B, S = 2, 8
    IN_DIM, OUT_DIM = 32, 128
    params1 = make_params(k1, IN_DIM, OUT_DIM)
    x1 = jax.random.normal(k2, (B, S, IN_DIM), dtype=jnp.float32)
    out1 = jax.block_until_ready(object_encoder(x1, params1))
    np.testing.assert_allclose(np.asarray(out1), _reference(x1, params1),
                               rtol=5e-2, atol=5e-2)
    assert out1.shape == (B, S, OUT_DIM)

    # Test 2: multi-tile path + non-multiple-of-128 output (row & lane padding).
    ROWS2, IN2, OUT2 = 300, 32, 100
    params2 = make_params(k3, IN2, OUT2)
    x2 = jax.random.normal(k4, (ROWS2, IN2), dtype=jnp.float32)
    out2 = jax.block_until_ready(object_encoder(x2, params2))
    np.testing.assert_allclose(np.asarray(out2), _reference(x2, params2),
                               rtol=5e-2, atol=5e-2)
    assert out2.shape == (ROWS2, OUT2)

    print("KERNEL_OK")
</pallas_src>

<mosaic_0001>
module attributes {stable_mosaic.version = 11 : i64} {
  func.func @_mlp_kernel(%arg0: i32, %arg1: memref<16x128xbf16, #tpu.memory_space<vmem>>, %arg2: memref<128x512xbf16, #tpu.memory_space<vmem>>, %arg3: memref<1x512xf32, #tpu.memory_space<vmem>>, %arg4: memref<512x512xbf16, #tpu.memory_space<vmem>>, %arg5: memref<1x512xf32, #tpu.memory_space<vmem>>, %arg6: memref<512x512xbf16, #tpu.memory_space<vmem>>, %arg7: memref<1x512xf32, #tpu.memory_space<vmem>>, %arg8: memref<512x128xbf16, #tpu.memory_space<vmem>>, %arg9: memref<1x128xf32, #tpu.memory_space<vmem>>, %arg10: memref<16x128xf32, #tpu.memory_space<vmem>>) attributes {dimension_semantics = [#tpu.dimension_semantics<arbitrary>], iteration_bounds = array<i64: 1>, scalar_prefetch = 0 : i64, scratch_operands = 0 : i64, tpu.core_type = #tpu.core_type<tc>, window_params = [{transform_indices = @transform_0, window_bounds = array<i64: 16, 128>}, {pipeline_mode = #tpu.pipeline_mode<synchronous>, transform_indices = @transform_1, window_bounds = array<i64: 128, 512>}, {pipeline_mode = #tpu.pipeline_mode<synchronous>, transform_indices = @transform_2, window_bounds = array<i64: 1, 512>}, {pipeline_mode = #tpu.pipeline_mode<synchronous>, transform_indices = @transform_3, window_bounds = array<i64: 512, 512>}, {pipeline_mode = #tpu.pipeline_mode<synchronous>, transform_indices = @transform_4, window_bounds = array<i64: 1, 512>}, {pipeline_mode = #tpu.pipeline_mode<synchronous>, transform_indices = @transform_5, window_bounds = array<i64: 512, 512>}, {pipeline_mode = #tpu.pipeline_mode<synchronous>, transform_indices = @transform_6, window_bounds = array<i64: 1, 512>}, {pipeline_mode = #tpu.pipeline_mode<synchronous>, transform_indices = @transform_7, window_bounds = array<i64: 512, 128>}, {pipeline_mode = #tpu.pipeline_mode<synchronous>, transform_indices = @transform_8, window_bounds = array<i64: 1, 128>}, {transform_indices = @transform_9, window_bounds = array<i64: 16, 128>}]} {
    %c0 = arith.constant 0 : index
    %c0_0 = arith.constant 0 : index
    %0 = vector.load %arg1[%c0, %c0_0] : memref<16x128xbf16, #tpu.memory_space<vmem>>, vector<16x128xbf16>
    %c0_1 = arith.constant 0 : index
    %c0_2 = arith.constant 0 : index
    %1 = vector.load %arg2[%c0_1, %c0_2] : memref<128x512xbf16, #tpu.memory_space<vmem>>, vector<128x512xbf16>
    %cst = arith.constant dense<0.000000e+00> : vector<16x512xf32>
    %2 = tpu.matmul %0, %1, %cst {dimension_numbers = #tpu.dot_dimension_numbers<[1], [0], [0], [1], [0, 0, 1, 1], [], []>} : vector<16x128xbf16>, vector<128x512xbf16>, vector<16x512xf32> -> vector<16x512xf32>
    %c0_3 = arith.constant 0 : index
    %c0_4 = arith.constant 0 : index
    %3 = vector.load %arg3[%c0_3, %c0_4] : memref<1x512xf32, #tpu.memory_space<vmem>>, vector<1x512xf32>
    %4 = vector.broadcast %3 : vector<1x512xf32> to vector<16x512xf32>
    %5 = arith.addf %2, %4 : vector<16x512xf32>
    %cst_5 = arith.constant 0.000000e+00 : f32
    %6 = vector.broadcast %cst_5 : f32 to vector<16x512xf32>
    %7 = arith.maximumf %5, %6 : vector<16x512xf32>
    %8 = arith.truncf %7 : vector<16x512xf32> to vector<16x512xbf16>
    %c0_6 = arith.constant 0 : index
    %c0_7 = arith.constant 0 : index
    %9 = vector.load %arg4[%c0_6, %c0_7] : memref<512x512xbf16, #tpu.memory_space<vmem>>, vector<512x512xbf16>
    %cst_8 = arith.constant dense<0.000000e+00> : vector<16x512xf32>
    %10 = tpu.matmul %8, %9, %cst_8 {dimension_numbers = #tpu.dot_dimension_numbers<[1], [0], [0], [1], [0, 0, 1, 1], [], []>} : vector<16x512xbf16>, vector<512x512xbf16>, vector<16x512xf32> -> vector<16x512xf32>
    %c0_9 = arith.constant 0 : index
    %c0_10 = arith.constant 0 : index
    %11 = vector.load %arg5[%c0_9, %c0_10] : memref<1x512xf32, #tpu.memory_space<vmem>>, vector<1x512xf32>
    %12 = vector.broadcast %11 : vector<1x512xf32> to vector<16x512xf32>
    %13 = arith.addf %10, %12 : vector<16x512xf32>
    %cst_11 = arith.constant 0.000000e+00 : f32
    %14 = vector.broadcast %cst_11 : f32 to vector<16x512xf32>
    %15 = arith.maximumf %13, %14 : vector<16x512xf32>
    %16 = arith.truncf %15 : vector<16x512xf32> to vector<16x512xbf16>
    %c0_12 = arith.constant 0 : index
    %c0_13 = arith.constant 0 : index
    %17 = vector.load %arg6[%c0_12, %c0_13] : memref<512x512xbf16, #tpu.memory_space<vmem>>, vector<512x512xbf16>
    %cst_14 = arith.constant dense<0.000000e+00> : vector<16x512xf32>
    %18 = tpu.matmul %16, %17, %cst_14 {dimension_numbers = #tpu.dot_dimension_numbers<[1], [0], [0], [1], [0, 0, 1, 1], [], []>} : vector<16x512xbf16>, vector<512x512xbf16>, vector<16x512xf32> -> vector<16x512xf32>
    %c0_15 = arith.constant 0 : index
    %c0_16 = arith.constant 0 : index
    %19 = vector.load %arg7[%c0_15, %c0_16] : memref<1x512xf32, #tpu.memory_space<vmem>>, vector<1x512xf32>
    %20 = vector.broadcast %19 : vector<1x512xf32> to vector<16x512xf32>
    %21 = arith.addf %18, %20 : vector<16x512xf32>
    %cst_17 = arith.constant 0.000000e+00 : f32
    %22 = vector.broadcast %cst_17 : f32 to vector<16x512xf32>
    %23 = arith.maximumf %21, %22 : vector<16x512xf32>
    %24 = arith.truncf %23 : vector<16x512xf32> to vector<16x512xbf16>
    %c0_18 = arith.constant 0 : index
    %c0_19 = arith.constant 0 : index
    %25 = vector.load %arg8[%c0_18, %c0_19] : memref<512x128xbf16, #tpu.memory_space<vmem>>, vector<512x128xbf16>
    %cst_20 = arith.constant dense<0.000000e+00> : vector<16x128xf32>
    %26 = tpu.matmul %24, %25, %cst_20 {dimension_numbers = #tpu.dot_dimension_numbers<[1], [0], [0], [1], [0, 0, 1, 1], [], []>} : vector<16x512xbf16>, vector<512x128xbf16>, vector<16x128xf32> -> vector<16x128xf32>
    %c0_21 = arith.constant 0 : index
    %c0_22 = arith.constant 0 : index
    %27 = vector.load %arg9[%c0_21, %c0_22] : memref<1x128xf32, #tpu.memory_space<vmem>>, vector<1x128xf32>
    %28 = vector.broadcast %27 : vector<1x128xf32> to vector<16x128xf32>
    %29 = arith.addf %26, %28 : vector<16x128xf32>
    %c0_23 = arith.constant 0 : index
    %c0_24 = arith.constant 0 : index
    %30 = vector.load %arg10[%c0_23, %c0_24] : memref<16x128xf32, #tpu.memory_space<vmem>>, vector<16x128xf32>
    tpu.vector_store %arg10[%c0_23, %c0_24], %29 {strides = array<i32>} : memref<16x128xf32, #tpu.memory_space<vmem>>, vector<16x128xf32>,
    return
  }
  func.func @transform_0(%arg0: i32) -> (i32, i32) {
    %c0_i32 = arith.constant 0 : i32
    %c0_i32_0 = arith.constant 0 : i32
    return %arg0, %c0_i32 : i32, i32
  }
  func.func @transform_1(%arg0: i32) -> (i32, i32) {
    %c0_i32 = arith.constant 0 : i32
    %c0_i32_0 = arith.constant 0 : i32
    %c0_i32_1 = arith.constant 0 : i32
    return %c0_i32, %c0_i32_0 : i32, i32
  }
  func.func @transform_2(%arg0: i32) -> (i32, i32) {
    %c0_i32 = arith.constant 0 : i32
    %c0_i32_0 = arith.constant 0 : i32
    %c0_i32_1 = arith.constant 0 : i32
    return %c0_i32, %c0_i32_0 : i32, i32
  }
  func.func @transform_3(%arg0: i32) -> (i32, i32) {
    %c0_i32 = arith.constant 0 : i32
    %c0_i32_0 = arith.constant 0 : i32
    %c0_i32_1 = arith.constant 0 : i32
    return %c0_i32, %c0_i32_0 : i32, i32
  }
  func.func @transform_4(%arg0: i32) -> (i32, i32) {
    %c0_i32 = arith.constant 0 : i32
    %c0_i32_0 = arith.constant 0 : i32
    %c0_i32_1 = arith.constant 0 : i32
    return %c0_i32, %c0_i32_0 : i32, i32
  }
  func.func @transform_5(%arg0: i32) -> (i32, i32) {
    %c0_i32 = arith.constant 0 : i32
    %c0_i32_0 = arith.constant 0 : i32
    %c0_i32_1 = arith.constant 0 : i32
    return %c0_i32, %c0_i32_0 : i32, i32
  }
  func.func @transform_6(%arg0: i32) -> (i32, i32) {
    %c0_i32 = arith.constant 0 : i32
    %c0_i32_0 = arith.constant 0 : i32
    %c0_i32_1 = arith.constant 0 : i32
    return %c0_i32, %c0_i32_0 : i32, i32
  }
  func.func @transform_7(%arg0: i32) -> (i32, i32) {
    %c0_i32 = arith.constant 0 : i32
    %c0_i32_0 = arith.constant 0 : i32
    %c0_i32_1 = arith.constant 0 : i32
    return %c0_i32, %c0_i32_0 : i32, i32
  }
  func.func @transform_8(%arg0: i32) -> (i32, i32) {
    %c0_i32 = arith.constant 0 : i32
    %c0_i32_0 = arith.constant 0 : i32
    %c0_i32_1 = arith.constant 0 : i32
    return %c0_i32, %c0_i32_0 : i32, i32
  }
  func.func @transform_9(%arg0: i32) -> (i32, i32) {
    %c0_i32 = arith.constant 0 : i32
    %c0_i32_0 = arith.constant 0 : i32
    return %arg0, %c0_i32 : i32, i32
  }
}

module attributes {stable_mosaic.version = 11 : i64} {
  func.func @_mlp_kernel(%arg0: i32, %arg1: memref<16x128xbf16, #tpu.memory_space<vmem>>, %arg2: memref<128x512xbf16, #tpu.memory_space<vmem>>, %arg3: memref<1x512xf32, #tpu.memory_space<vmem>>, %arg4: memref<512x512xbf16, #tpu.memory_space<vmem>>, %arg5: memref<1x512xf32, #tpu.memory_space<vmem>>, %arg6: memref<512x512xbf16, #tpu.memory_space<vmem>>, %arg7: memref<1x512xf32, #tpu.memory_space<vmem>>, %arg8: memref<512x128xbf16, #tpu.memory_space<vmem>>, %arg9: memref<1x128xf32, #tpu.memory_space<vmem>>, %arg10: memref<16x128xf32, #tpu.memory_space<vmem>>) attributes {dimension_semantics = [#tpu.dimension_semantics<arbitrary>], iteration_bounds = array<i64: 1>, scalar_prefetch = 0 : i64, scratch_operands = 0 : i64, tpu.core_type = #tpu.core_type<tc>, window_params = [{transform_indices = @transform_0, window_bounds = array<i64: 16, 128>}, {pipeline_mode = #tpu.pipeline_mode<synchronous>, transform_indices = @transform_1, window_bounds = array<i64: 128, 512>}, {pipeline_mode = #tpu.pipeline_mode<synchronous>, transform_indices = @transform_2, window_bounds = array<i64: 1, 512>}, {pipeline_mode = #tpu.pipeline_mode<synchronous>, transform_indices = @transform_3, window_bounds = array<i64: 512, 512>}, {pipeline_mode = #tpu.pipeline_mode<synchronous>, transform_indices = @transform_4, window_bounds = array<i64: 1, 512>}, {pipeline_mode = #tpu.pipeline_mode<synchronous>, transform_indices = @transform_5, window_bounds = array<i64: 512, 512>}, {pipeline_mode = #tpu.pipeline_mode<synchronous>, transform_indices = @transform_6, window_bounds = array<i64: 1, 512>}, {pipeline_mode = #tpu.pipeline_mode<synchronous>, transform_indices = @transform_7, window_bounds = array<i64: 512, 128>}, {pipeline_mode = #tpu.pipeline_mode<synchronous>, transform_indices = @transform_8, window_bounds = array<i64: 1, 128>}, {transform_indices = @transform_9, window_bounds = array<i64: 16, 128>}]} {
    %c0 = arith.constant 0 : index
    %c0_0 = arith.constant 0 : index
    %0 = vector.load %arg1[%c0, %c0_0] : memref<16x128xbf16, #tpu.memory_space<vmem>>, vector<16x128xbf16>
    %c0_1 = arith.constant 0 : index
    %c0_2 = arith.constant 0 : index
    %1 = vector.load %arg2[%c0_1, %c0_2] : memref<128x512xbf16, #tpu.memory_space<vmem>>, vector<128x512xbf16>
    %cst = arith.constant dense<0.000000e+00> : vector<16x512xf32>
    %2 = tpu.matmul %0, %1, %cst {dimension_numbers = #tpu.dot_dimension_numbers<[1], [0], [0], [1], [0, 0, 1, 1], [], []>} : vector<16x128xbf16>, vector<128x512xbf16>, vector<16x512xf32> -> vector<16x512xf32>
    %c0_3 = arith.constant 0 : index
    %c0_4 = arith.constant 0 : index
    %3 = vector.load %arg3[%c0_3, %c0_4] : memref<1x512xf32, #tpu.memory_space<vmem>>, vector<1x512xf32>
    %4 = vector.broadcast %3 : vector<1x512xf32> to vector<16x512xf32>
    %5 = arith.addf %2, %4 : vector<16x512xf32>
    %cst_5 = arith.constant 0.000000e+00 : f32
    %6 = vector.broadcast %cst_5 : f32 to vector<16x512xf32>
    %7 = arith.maximumf %5, %6 : vector<16x512xf32>
    %8 = arith.truncf %7 : vector<16x512xf32> to vector<16x512xbf16>
    %c0_6 = arith.constant 0 : index
    %c0_7 = arith.constant 0 : index
    %9 = vector.load %arg4[%c0_6, %c0_7] : memref<512x512xbf16, #tpu.memory_space<vmem>>, vector<512x512xbf16>
    %cst_8 = arith.constant dense<0.000000e+00> : vector<16x512xf32>
    %10 = tpu.matmul %8, %9, %cst_8 {dimension_numbers = #tpu.dot_dimension_numbers<[1], [0], [0], [1], [0, 0, 1, 1], [], []>} : vector<16x512xbf16>, vector<512x512xbf16>, vector<16x512xf32> -> vector<16x512xf32>
    %c0_9 = arith.constant 0 : index
    %c0_10 = arith.constant 0 : index
    %11 = vector.load %arg5[%c0_9, %c0_10] : memref<1x512xf32, #tpu.memory_space<vmem>>, vector<1x512xf32>
    %12 = vector.broadcast %11 : vector<1x512xf32> to vector<16x512xf32>
    %13 = arith.addf %10, %12 : vector<16x512xf32>
    %cst_11 = arith.constant 0.000000e+00 : f32
    %14 = vector.broadcast %cst_11 : f32 to vector<16x512xf32>
    %15 = arith.maximumf %13, %14 : vector<16x512xf32>
    %16 = arith.truncf %15 : vector<16x512xf32> to vector<16x512xbf16>
    %c0_12 = arith.constant 0 : index
    %c0_13 = arith.constant 0 : index
    %17 = vector.load %arg6[%c0_12, %c0_13] : memref<512x512xbf16, #tpu.memory_space<vmem>>, vector<512x512xbf16>
    %cst_14 = arith.constant dense<0.000000e+00> : vector<16x512xf32>
    %18 = tpu.matmul %16, %17, %cst_14 {dimension_numbers = #tpu.dot_dimension_numbers<[1], [0], [0], [1], [0, 0, 1, 1], [], []>} : vector<16x512xbf16>, vector<512x512xbf16>, vector<16x512xf32> -> vector<16x512xf32>
    %c0_15 = arith.constant 0 : index
    %c0_16 = arith.constant 0 : index
    %19 = vector.load %arg7[%c0_15, %c0_16] : memref<1x512xf32, #tpu.memory_space<vmem>>, vector<1x512xf32>
    %20 = vector.broadcast %19 : vector<1x512xf32> to vector<16x512xf32>
    %21 = arith.addf %18, %20 : vector<16x512xf32>
    %cst_17 = arith.constant 0.000000e+00 : f32
    %22 = vector.broadcast %cst_17 : f32 to vector<16x512xf32>
    %23 = arith.maximumf %21, %22 : vector<16x512xf32>
    %24 = arith.truncf %23 : vector<16x512xf32> to vector<16x512xbf16>
    %c0_18 = arith.constant 0 : index
    %c0_19 = arith.constant 0 : index
    %25 = vector.load %arg8[%c0_18, %c0_19] : memref<512x128xbf16, #tpu.memory_space<vmem>>, vector<512x128xbf16>
    %cst_20 = arith.constant dense<0.000000e+00> : vector<16x128xf32>
    %26 = tpu.matmul %24, %25, %cst_20 {dimension_numbers = #tpu.dot_dimension_numbers<[1], [0], [0], [1], [0, 0, 1, 1], [], []>} : vector<16x512xbf16>, vector<512x128xbf16>, vector<16x128xf32> -> vector<16x128xf32>
    %c0_21 = arith.constant 0 : index
    %c0_22 = arith.constant 0 : index
    %27 = vector.load %arg9[%c0_21, %c0_22] : memref<1x128xf32, #tpu.memory_space<vmem>>, vector<1x128xf32>
    %28 = vector.broadcast %27 : vector<1x128xf32> to vector<16x128xf32>
    %29 = arith.addf %26, %28 : vector<16x128xf32>
    %c0_23 = arith.constant 0 : index
    %c0_24 = arith.constant 0 : index
    %30 = vector.load %arg10[%c0_23, %c0_24] : memref<16x128xf32, #tpu.memory_space<vmem>>, vector<16x128xf32>
    tpu.vector_store %arg10[%c0_23, %c0_24], %29 {strides = array<i32>} : memref<16x128xf32, #tpu.memory_space<vmem>>, vector<16x128xf32>,
    return
  }
  func.func @transform_0(%arg0: i32) -> (i32, i32) {
    %c0_i32 = arith.constant 0 : i32
    %c0_i32_0 = arith.constant 0 : i32
    return %arg0, %c0_i32 : i32, i32
  }
  func.func @transform_1(%arg0: i32) -> (i32, i32) {
    %c0_i32 = arith.constant 0 : i32
    %c0_i32_0 = arith.constant 0 : i32
    %c0_i32_1 = arith.constant 0 : i32
    return %c0_i32, %c0_i32_0 : i32, i32
  }
  func.func @transform_2(%arg0: i32) -> (i32, i32) {
    %c0_i32 = arith.constant 0 : i32
    %c0_i32_0 = arith.constant 0 : i32
    %c0_i32_1 = arith.constant 0 : i32
    return %c0_i32, %c0_i32_0 : i32, i32
  }
  func.func @transform_3(%arg0: i32) -> (i32, i32) {
    %c0_i32 = arith.constant 0 : i32
    %c0_i32_0 = arith.constant 0 : i32
    %c0_i32_1 = arith.constant 0 : i32
    return %c0_i32, %c0_i32_0 : i32, i32
  }
  func.func @transform_4(%arg0: i32) -> (i32, i32) {
    %c0_i32 = arith.constant 0 : i32
    %c0_i32_0 = arith.constant 0 : i32
    %c0_i32_1 = arith.constant 0 : i32
    return %c0_i32, %c0_i32_0 : i32, i32
  }
  func.func @transform_5(%arg0: i32) -> (i32, i32) {
    %c0_i32 = arith.constant 0 : i32
    %c0_i32_0 = arith.constant 0 : i32
    %c0_i32_1 = arith.constant 0 : i32
    return %c0_i32, %c0_i32_0 : i32, i32
  }
  func.func @transform_6(%arg0: i32) -> (i32, i32) {
    %c0_i32 = arith.constant 0 : i32
    %c0_i32_0 = arith.constant 0 : i32
    %c0_i32_1 = arith.constant 0 : i32
    return %c0_i32, %c0_i32_0 : i32, i32
  }
  func.func @transform_7(%arg0: i32) -> (i32, i32) {
    %c0_i32 = arith.constant 0 : i32
    %c0_i32_0 = arith.constant 0 : i32
    %c0_i32_1 = arith.constant 0 : i32
    return %c0_i32, %c0_i32_0 : i32, i32
  }
  func.func @transform_8(%arg0: i32) -> (i32, i32) {
    %c0_i32 = arith.constant 0 : i32
    %c0_i32_0 = arith.constant 0 : i32
    %c0_i32_1 = arith.constant 0 : i32
    return %c0_i32, %c0_i32_0 : i32, i32
  }
  func.func @transform_9(%arg0: i32) -> (i32, i32) {
    %c0_i32 = arith.constant 0 : i32
    %c0_i32_0 = arith.constant 0 : i32
    return %arg0, %c0_i32 : i32, i32
  }
}

</mosaic_0001>

<bundles_post_ra>
// kernel: tpu_custom_call.1
= control target key start
LH: loop header
LB: loop body
LE: loop exit
PB: predicated region body
PF: predicated region fallthrough
CT: control target
= control target key end

     0   :  { %14 = vsyncpa [#allocation3], 0  ;;  %s4760_s0 = inlined_call_operand.hbm [shape: bf16[16,128], index: 0, kind: input, shape index: {}]   ;;  %s4761_s1 = inlined_call_operand.hbm [shape: bf16[128,512], index: 1, kind: input, shape index: {}]   ;;  %s4762_s2 = inlined_call_operand.hbm [shape: f32[1,512], index: 2, kind: input, shape index: {}]   ;;  %s4763_s3 = inlined_call_operand.hbm [shape: bf16[512,512], index: 3, kind: input, shape index: {}]   ;;  %s4764_s4 = inlined_call_operand.hbm [shape: f32[1,512], index: 4, kind: input, shape index: {}]   ;;  %s4765_s5 = inlined_call_operand.hbm [shape: bf16[512,512], index: 5, kind: input, shape index: {}]   ;;  %s4766_s6 = inlined_call_operand.vmem [shape: f32[1,512], index: 6, kind: input, shape index: {}]   ;;  %s4767_s7 = inlined_call_operand.hbm [shape: bf16[512,128], index: 7, kind: input, shape index: {}]   ;;  %s4768_s8 = inlined_call_operand.vmem [shape: f32[1,128], index: 8, kind: input, shape index: {}]   ;;  %s4769_s9 = inlined_call_operand.hbm [shape: f32[16,128], index: 9, kind: output, shape index: {}]  }
   0x1   :  { %15 = vsyncpa [#allocation6], 0 }
   0x2   :  { %16 = vsyncpa [#allocation9], 0 }
   0x3   :  { %17 = vsyncpa [#allocation12], 0  ;;  %s36_s11 = sshll.u32 %s4761_s1, 4  ;;  %s37_s11 = int_to_ptr.hbm [resolvable:$true] %s36_s11 }
   0x4   :  { %18 = vsyncpa [#allocation4], 0  ;;  %s4606_s12 = smov [#allocation5]   ;;  %s60_s16 = sshll.u32 %s4763_s3, 4  ;;  %s61_s16 = int_to_ptr.hbm [resolvable:$true] %s60_s16 }
   0x5   :  { %s38_s13 = sshll.u32 %s4606_s12, 4  ;;  %s4607_s17 = smov 256   ;;  %s39_s13 = int_to_ptr.vmem [resolvable:$true] %s38_s13 }
   0x6   :  { %s4608_s18 = smov 16   ;;  %s4609_s19 = smov [#allocation8]  }
   0x7   :  { %44 = dma.hbm_to_vmem [thread:$0]  %s37_s11, 4096, %s39_s13, [#allocation6], %s4607_s17, %s4607_s17, %s4608_s18  }
   0x8   :  { %s62_s20 = sshll.u32 %s4609_s19, 4  ;;  %s84_s23 = sshll.u32 %s4765_s5, 4  ;;  %s63_s20 = int_to_ptr.vmem [resolvable:$true] %s62_s20  ;;  %s85_s23 = int_to_ptr.hbm [resolvable:$true] %s84_s23 }
   0x9   :  { %68 = dma.hbm_to_vmem [thread:$0]  %s61_s16, 16384, %s63_s20, [#allocation9], %s4607_s17, %s4607_s17, %s4608_s18  }
   0xa   :  { %s23_s25 = sshll.u32 %s4760_s0, 4  ;;  %s4610_s26 = smov [#allocation11]   ;;  %s24_s25 = int_to_ptr.hbm [resolvable:$true] %s23_s25 }
   0xb   :  { %s86_s27 = sshll.u32 %s4610_s26, 4  ;;  %s4611_s3 = smov [#allocation2]   ;;  %s87_s27 = int_to_ptr.vmem [resolvable:$true] %s86_s27 }
   0xc   :  { %92 = dma.hbm_to_vmem [thread:$0]  %s85_s23, 16384, %s87_s27, [#allocation12], %s4607_s17, %s4607_s17, %s4608_s18  }
   0xd   :  { %s25_s28 = sshll.u32 %s4611_s3, 4  ;;  %s4612_s29 = smov 64   ;;  %s26_s28 = int_to_ptr.vmem [resolvable:$true] %s25_s28 }
   0xe   :  { %s4613_s30 = smov 4   ;;  %s50_s11 = sshll.u32 %s4762_s2, 4  ;;  %s51_s11 = int_to_ptr.hbm [resolvable:$true] %s50_s11 }
   0xf   :  { %31 = dma.hbm_to_vmem [thread:$0]  %s24_s25, 128, %s26_s28, [#allocation3], %s4612_s29, %s4612_s29, %s4613_s30  }
  0x10   :  { %s4614_s12 = smov [#allocation7]   ;;  %s74_s15 = sshll.u32 %s4764_s4, 4  ;;  %s75_s15 = int_to_ptr.hbm [resolvable:$true] %s74_s15 }
  0x11   :  { %s52_s13 = sshll.u32 %s4614_s12, 4  ;;  %s4615_s16 = smov [#allocation10]   ;;  %s53_s13 = int_to_ptr.vmem [resolvable:$true] %s52_s13 }
  0x12   :  { %55 = dma.hbm_to_vmem [thread:$0]  %s51_s11, 64, %s53_s13, [#allocation6]  }
  0x13   :  { %s76_s17 = sshll.u32 %s4615_s16, 4  ;;  %s99_s20 = sshll.u32 %s4767_s7, 4  ;;  %s77_s17 = int_to_ptr.vmem [resolvable:$true] %s76_s17  ;;  %s100_s20 = int_to_ptr.hbm [resolvable:$true] %s99_s20 }
  0x14   :  { %79 = dma.hbm_to_vmem [thread:$0]  %s75_s15, 64, %s77_s17, [#allocation9]  }
  0x15   :  { %s4616_s2 = smov [#allocation13]  }
  0x16   :  { %s101_s21 = sshll.u32 %s4616_s2, 4  ;;  %s102_s21 = int_to_ptr.vmem [resolvable:$true] %s101_s21 }
  0x17   :  { %107 = dma.hbm_to_vmem [thread:$0]  %s100_s20, 4096, %s102_s21, [#allocation12], %s4612_s29, %s4612_s29, %s4613_s30  }
  0x18   :  { %4596 = dma.done.wait [#allocation3], 128  }
  0x19   :  { %4597 = vsyncadd [#allocation3], 4294967168 }
  0x1a   :  { %4598 = dma.done.wait [#allocation6], 4160  }
  0x1b   :  { %4599 = vsyncadd [#allocation6], 4294963136 }
  0x1c   :  { %4600 = dma.done.wait [#allocation9], 16448  }
  0x1d   :  { %4601 = vsyncadd [#allocation9], 4294950848 }
  0x1e   :  { %4602 = dma.done.wait [#allocation12], 20480  }
  0x1f   :  { %4603 = vsyncadd [#allocation12], 4294946816  ;;  %v2902_v0 = vld [vmem:[#allocation5 + $0xe0] sm:$0xf]  ;;  %v4099_v1 = vld [vmem:[#allocation5 + $0xec] sm:$0xf0] }
  0x20   :  { %v4097_v2 = vld [vmem:[#allocation5 + $0xe4] sm:$0xf]  ;;  %v2903_v3 = vor.u32 %v4099_v1, %v2902_v0  ;;  %v2904_v4 = vld [vmem:[#allocation5 + $0xf0] sm:$0xf0]  ;;  %v2910_v5 = vld [vmem:[#allocation5 + $0xe8] sm:$0xf] }
  0x21   :  { %v4100_v6 = vld [vmem:[#allocation5 + $0xf4] sm:$0xf0]  ;;  %v2907_v7 = vor.u32 %v4097_v2, %v2904_v4  ;;  %v4098_v9 = vld [vmem:[#allocation5 + $0xec] sm:$0xf]  ;;  %v2912_v10 = vld [vmem:[#allocation5 + $0xf8] sm:$0xf0] }
  0x22   :  { %v2911_v8 = vor.u32 %v4100_v6, %v2910_v5  ;;  %v2886_v11 = vld [vmem:[#allocation5 + $0xc0] sm:$0xf]  ;;  %348 = vmatpush.bf16.msra.mxu0 %v2903_v3  ;;  %v2915_v12 = vor.u32 %v4098_v9, %v2912_v10  ;;  %v4095_v13 = vld [vmem:[#allocation5 + $0xcc] sm:$0xf0]  ;;  %v4093_v14 = vld [vmem:[#allocation5 + $0xc4] sm:$0xf] }
  0x23   :  { %v2888_v15 = vld [vmem:[#allocation5 + $0xd0] sm:$0xf0]  ;;  %362 = vmatpush.bf16.msra.mxu1 %v2907_v7  ;;  %v2887_v16 = vor.u32 %v4095_v13, %v2886_v11  ;;  %v2894_v18 = vld [vmem:[#allocation5 + $0xc8] sm:$0xf]  ;;  %v4096_v19 = vld [vmem:[#allocation5 + $0xd4] sm:$0xf0] }
  0x24   :  { %376 = vmatpush.bf16.msra.mxu2 %v2911_v8  ;;  %v2891_v17 = vor.u32 %v4093_v14, %v2888_v15  ;;  %v4094_v20 = vld [vmem:[#allocation5 + $0xcc] sm:$0xf]  ;;  %390 = vmatpush.bf16.msra.mxu3 %v2915_v12  ;;  %v2895_v21 = vor.u32 %v4096_v19, %v2894_v18  ;;  %v2896_v22 = vld [vmem:[#allocation5 + $0xd8] sm:$0xf0]  ;;  %v2870_v23 = vld [vmem:[#allocation5 + $0xa0] sm:$0xf] }
  0x25   :  { %v4091_v24 = vld [vmem:[#allocation5 + $0xac] sm:$0xf0]  ;;  %v2899_v25 = vor.u32 %v4094_v20, %v2896_v22  ;;  %v4089_v26 = vld [vmem:[#allocation5 + $0xa4] sm:$0xf]  ;;  %v2872_v27 = vld [vmem:[#allocation5 + $0xb0] sm:$0xf0] }
  0x26   :  { %v2878_v28 = vld [vmem:[#allocation5 + $0xa8] sm:$0xf]  ;;  %349 = vmatpush.bf16.msra.mxu0 %v2887_v16  ;;  %v2871_v29 = vor.u32 %v4091_v24, %v2870_v23  ;;  %v4092_v30 = vld [vmem:[#allocation5 + $0xb4] sm:$0xf0]  ;;  %v4090_v31 = vld [vmem:[#allocation5 + $0xac] sm:$0xf]  ;;  %v2875_v33 = vor.u32 %v4089_v26, %v2872_v27 }
  0x27   :  { %v2880_v32 = vld [vmem:[#allocation5 + $0xb8] sm:$0xf0]  ;;  %363 = vmatpush.bf16.msra.mxu1 %v2891_v17  ;;  %v2879_v34 = vor.u32 %v4092_v30, %v2878_v28  ;;  %v2854_v35 = vld [vmem:[#allocation5 + $0x80] sm:$0xf]  ;;  %v4087_v36 = vld [vmem:[#allocation5 + $0x8c] sm:$0xf0] }
  0x28   :  { %377 = vmatpush.bf16.msra.mxu2 %v2895_v21  ;;  %v4085_v37 = vld [vmem:[#allocation5 + $0x84] sm:$0xf]  ;;  %391 = vmatpush.bf16.msra.mxu3 %v2899_v25  ;;  %v2883_v38 = vor.u32 %v4090_v31, %v2880_v32  ;;  %v2856_v39 = vld [vmem:[#allocation5 + $0x90] sm:$0xf0]  ;;  %v2862_v40 = vld [vmem:[#allocation5 + $0x88] sm:$0xf]  ;;  %v2855_v44 = vor.u32 %v4087_v36, %v2854_v35 }
  0x29   :  { %v4088_v41 = vld [vmem:[#allocation5 + $0x94] sm:$0xf0]  ;;  %v4086_v42 = vld [vmem:[#allocation5 + $0x8c] sm:$0xf]  ;;  %v2864_v43 = vld [vmem:[#allocation5 + $0x98] sm:$0xf0]  ;;  %v2859_v45 = vor.u32 %v4085_v37, %v2856_v39 }
  0x2a   :  { %350 = vmatpush.bf16.msra.mxu0 %v2871_v29  ;;  %v2863_v46 = vor.u32 %v4088_v41, %v2862_v40  ;;  %v2838_v47 = vld [vmem:[#allocation5 + $0x60] sm:$0xf]  ;;  %v4083_v48 = vld [vmem:[#allocation5 + $0x6c] sm:$0xf0]  ;;  %v4081_v49 = vld [vmem:[#allocation5 + $0x64] sm:$0xf]  ;;  %v2867_v50 = vor.u32 %v4086_v42, %v2864_v43 }
  0x2b   :  { %364 = vmatpush.bf16.msra.mxu1 %v2875_v33  ;;  %v2840_v51 = vld [vmem:[#allocation5 + $0x70] sm:$0xf0]  ;;  %v2846_v52 = vld [vmem:[#allocation5 + $0x68] sm:$0xf]  ;;  %v4084_v53 = vld [vmem:[#allocation5 + $0x74] sm:$0xf0]  ;;  %v2839_v56 = vor.u32 %v4083_v48, %v2838_v47 }
  0x2c   :  { %378 = vmatpush.bf16.msra.mxu2 %v2879_v34  ;;  %392 = vmatpush.bf16.msra.mxu3 %v2883_v38  ;;  %v4082_v54 = vld [vmem:[#allocation5 + $0x6c] sm:$0xf]  ;;  %v2848_v55 = vld [vmem:[#allocation5 + $0x78] sm:$0xf0]  ;;  %v2843_v57 = vor.u32 %v4081_v49, %v2840_v51  ;;  %v2847_v58 = vor.u32 %v4084_v53, %v2846_v52  ;;  %v2822_v59 = vld [vmem:[#allocation5 + $0x40] sm:$0xf] }
  0x2d   :  { %v4079_v60 = vld [vmem:[#allocation5 + $0x4c] sm:$0xf0]  ;;  %v4077_v61 = vld [vmem:[#allocation5 + $0x44] sm:$0xf]  ;;  %v2851_v62 = vor.u32 %v4082_v54, %v2848_v55  ;;  %v2824_v63 = vld [vmem:[#allocation5 + $0x50] sm:$0xf0] }
  0x2e   :  { %351 = vmatpush.bf16.msra.mxu0 %v2855_v44  ;;  %v2830_v0 = vld [vmem:[#allocation5 + $0x48] sm:$0xf]  ;;  %v4080_v1 = vld [vmem:[#allocation5 + $0x54] sm:$0xf0]  ;;  %v4078_v2 = vld [vmem:[#allocation5 + $0x4c] sm:$0xf]  ;;  %v2823_v4 = vor.u32 %v4079_v60, %v2822_v59  ;;  %v2827_v5 = vor.u32 %v4077_v61, %v2824_v63 }
  0x2f   :  { %365 = vmatpush.bf16.msra.mxu1 %v2859_v45  ;;  %v2832_v3 = vld [vmem:[#allocation5 + $0x58] sm:$0xf0]  ;;  %v2831_v6 = vor.u32 %v4080_v1, %v2830_v0  ;;  %v2806_v7 = vld [vmem:[#allocation5 + $0x20] sm:$0xf]  ;;  %v4075_v8 = vld [vmem:[#allocation5 + $0x2c] sm:$0xf0] }
  0x30   :  { %379 = vmatpush.bf16.msra.mxu2 %v2863_v46  ;;  %393 = vmatpush.bf16.msra.mxu3 %v2867_v50  ;;  %v4073_v9 = vld [vmem:[#allocation5 + $0x24] sm:$0xf]  ;;  %v2835_v10 = vor.u32 %v4078_v2, %v2832_v3  ;;  %v2808_v11 = vld [vmem:[#allocation5 + $0x30] sm:$0xf0]  ;;  %v2814_v12 = vld [vmem:[#allocation5 + $0x28] sm:$0xf]  ;;  %v2807_v16 = vor.u32 %v4075_v8, %v2806_v7 }
  0x31   :  { %v4076_v13 = vld [vmem:[#allocation5 + $0x34] sm:$0xf0]  ;;  %v4074_v14 = vld [vmem:[#allocation5 + $0x2c] sm:$0xf]  ;;  %v2816_v15 = vld [vmem:[#allocation5 + $0x38] sm:$0xf0]  ;;  %v2811_v18 = vor.u32 %v4073_v9, %v2808_v11 }
  0x32   :  { %352 = vmatpush.bf16.msra.mxu0 %v2839_v56  ;;  %v2790_v17 = vld [vmem:[#allocation5] sm:$0xf]  ;;  %v2815_v19 = vor.u32 %v4076_v13, %v2814_v12  ;;  %v4071_v20 = vld [vmem:[#allocation5 + $0xc] sm:$0xf0]  ;;  %v4069_v21 = vld [vmem:[#allocation5 + $0x4] sm:$0xf]  ;;  %v2819_v23 = vor.u32 %v4074_v14, %v2816_v15 }
  0x33   :  { %366 = vmatpush.bf16.msra.mxu1 %v2843_v57  ;;  %v2792_v22 = vld [vmem:[#allocation5 + $0x10] sm:$0xf0]  ;;  %v2798_v24 = vld [vmem:[#allocation5 + $0x8] sm:$0xf]  ;;  %v4072_v25 = vld [vmem:[#allocation5 + $0x14] sm:$0xf0]  ;;  %v2791_v30 = vor.u32 %v4071_v20, %v2790_v17 }
  0x34   :  { %380 = vmatpush.bf16.msra.mxu2 %v2847_v58  ;;  %394 = vmatpush.bf16.msra.mxu3 %v2851_v62  ;;  %v4070_v26 = vld [vmem:[#allocation5 + $0xc] sm:$0xf]  ;;  %v2800_v27 = vld [vmem:[#allocation5 + $0x18] sm:$0xf0]  ;;  %v3030_v28 = vld [vmem:[#allocation8 + $0xe0] sm:$0xf]  ;;  %v2795_v33 = vor.u32 %v4069_v21, %v2792_v22  ;;  %v2799_v34 = vor.u32 %v4072_v25, %v2798_v24 }
  0x35   :  { %v4131_v29 = vld [vmem:[#allocation8 + $0xec] sm:$0xf0]  ;;  %v3158_v31 = vld [vmem:[#allocation8 + $0x1e0] sm:$0xf]  ;;  %v4068_v35 = vld [vmem:[#allocation2] sm:$0xff]  ;;  %v2803_v36 = vor.u32 %v4070_v26, %v2800_v27  ;;  %s4617_s23 = smov [#allocation14]  }
  0x36   :  { %353 = vmatpush.bf16.msra.mxu0 %v2823_v4  ;;  %v4163_v32 = vld [vmem:[#allocation8 + $0x1ec] sm:$0xf0]  ;;  %v3031_v37 = vor.u32 %v4131_v29, %v3030_v28  ;;  %v3014_v38 = vld [vmem:[#allocation8 + $0xc0] sm:$0xf]  ;;  %s2766_s1 = sshll.u32 %s4617_s23, 4  ;;  %s2768_s26 = sshll.u32 %s4769_s9, 4  ;;  %s2767_s1 = int_to_ptr.vmem [resolvable:$true] %s2766_s1  ;;  %s2769_s26 = int_to_ptr.hbm [resolvable:$true] %s2768_s26 }
  0x37   :  { %367 = vmatpush.bf16.msra.mxu1 %v2827_v5  ;;  %v3286_v39 = vld [vmem:[#allocation8 + $0x2e0] sm:$0xf]  ;;  %v4195_v40 = vld [vmem:[#allocation8 + $0x2ec] sm:$0xf0]  ;;  %v3159_v41 = vor.u32 %v4163_v32, %v3158_v31  ;;  %s4619_s27 = smov 8  }
  0x38   :  { %381 = vmatpush.bf16.msra.mxu2 %v2831_v6  ;;  %395 = vmatpush.bf16.msra.mxu3 %v2835_v10  ;;  %v4127_v42 = vld [vmem:[#allocation8 + $0xcc] sm:$0xf0]  ;;  %v3414_v43 = vld [vmem:[#allocation8 + $0x3e0] sm:$0xf]  ;;  %v3287_v47 = vor.u32 %v4195_v40, %v3286_v39 }
  0x39   :  { %v4227_v44 = vld [vmem:[#allocation8 + $0x3ec] sm:$0xf0]  ;;  %v3142_v45 = vld [vmem:[#allocation8 + $0x1c0] sm:$0xf]  ;;  %v3015_v48 = vor.u32 %v4127_v42, %v3014_v38 }
  0x3a   :  { %354 = vmatpush.bf16.msra.mxu0 %v2807_v16  ;;  %v4159_v46 = vld [vmem:[#allocation8 + $0x1cc] sm:$0xf0]  ;;  %v3415_v49 = vor.u32 %v4227_v44, %v3414_v43  ;;  %v2998_v50 = vld [vmem:[#allocation8 + $0xa0] sm:$0xf] }
  0x3b   :  { %368 = vmatpush.bf16.msra.mxu1 %v2811_v18  ;;  %v3270_v51 = vld [vmem:[#allocation8 + $0x2c0] sm:$0xf]  ;;  %v4191_v52 = vld [vmem:[#allocation8 + $0x2cc] sm:$0xf0]  ;;  %v3143_v53 = vor.u32 %v4159_v46, %v3142_v45 }
  0x3c   :  { %382 = vmatpush.bf16.msra.mxu2 %v2815_v19  ;;  %396 = vmatpush.bf16.msra.mxu3 %v2819_v23  ;;  %v4123_v54 = vld [vmem:[#allocation8 + $0xac] sm:$0xf0]  ;;  %v3398_v55 = vld [vmem:[#allocation8 + $0x3c0] sm:$0xf]  ;;  %v3271_v59 = vor.u32 %v4191_v52, %v3270_v51 }
  0x3d   :  { %v4223_v56 = vld [vmem:[#allocation8 + $0x3cc] sm:$0xf0]  ;;  %v3126_v57 = vld [vmem:[#allocation8 + $0x1a0] sm:$0xf]  ;;  %v2999_v60 = vor.u32 %v4123_v54, %v2998_v50 }
  0x3e   :  { %355 = vmatpush.bf16.msra.mxu0 %v2791_v30  ;;  %v4155_v58 = vld [vmem:[#allocation8 + $0x1ac] sm:$0xf0]  ;;  %v3399_v61 = vor.u32 %v4223_v56, %v3398_v55  ;;  %v2982_v62 = vld [vmem:[#allocation8 + $0x80] sm:$0xf]  ;;  %v4129_v55 = vld [vmem:[#allocation8 + $0xe4] sm:$0xf] }
  0x3f   :  { %369 = vmatpush.bf16.msra.mxu1 %v2795_v33  ;;  %v3254_v63 = vld [vmem:[#allocation8 + $0x2a0] sm:$0xf]  ;;  %v4187_v0 = vld [vmem:[#allocation8 + $0x2ac] sm:$0xf0]  ;;  %v3127_v1 = vor.u32 %v4155_v58, %v3126_v57  ;;  %v3032_v56 = vld [vmem:[#allocation8 + $0xf0] sm:$0xf0] }
  0x40   :  { %383 = vmatpush.bf16.msra.mxu2 %v2799_v34  ;;  %397 = vmatpush.bf16.msra.mxu3 %v2803_v36  ;;  %v4119_v2 = vld [vmem:[#allocation8 + $0x8c] sm:$0xf0]  ;;  %v3382_v3 = vld [vmem:[#allocation8 + $0x3a0] sm:$0xf]  ;;  %v3255_v7 = vor.u32 %v4187_v0, %v3254_v63  ;;  %v4161_v57 = vld [vmem:[#allocation8 + $0x1e4] sm:$0xf] }
  0x41   :  { %356 = vmatmul.bf16.vlgmr.msra.gmra.mxu0 %v4068_v35  ;;  %v4219_v4 = vld [vmem:[#allocation8 + $0x3ac] sm:$0xf0]  ;;  %v3110_v5 = vld [vmem:[#allocation8 + $0x180] sm:$0xf]  ;;  %v2983_v8 = vor.u32 %v4119_v2, %v2982_v62  ;;  %v3160_v58 = vld [vmem:[#allocation8 + $0x1f0] sm:$0xf0] }
  0x42   :  { %1194 = vmatpush.bf16.msrb.mxu0 %v3031_v37  ;;  %370 = vmatmul.bf16.vlgmr.msra.gmra.mxu1 %v4068_v35  ;;  %v4151_v6 = vld [vmem:[#allocation8 + $0x18c] sm:$0xf0]  ;;  %v3383_v9 = vor.u32 %v4219_v4, %v3382_v3  ;;  %v2966_v10 = vld [vmem:[#allocation8 + $0x60] sm:$0xf]  ;;  %v4125_v62 = vld [vmem:[#allocation8 + $0xc4] sm:$0xf]  ;;  %v3035_v3 = vor.u32 %v4129_v55, %v3032_v56 }
  0x43   :  { %1208 = vmatpush.bf16.msrb.mxu1 %v3159_v41  ;;  %384 = vmatmul.bf16.vlgmr.msra.gmra.mxu2 %v4068_v35  ;;  %v3238_v11 = vld [vmem:[#allocation8 + $0x280] sm:$0xf]  ;;  %v4183_v12 = vld [vmem:[#allocation8 + $0x28c] sm:$0xf0]  ;;  %v3111_v13 = vor.u32 %v4151_v6, %v3110_v5  ;;  %v4193_v5 = vld [vmem:[#allocation8 + $0x2e4] sm:$0xf] }
  0x44   :  { %398 = vmatmul.bf16.vlgmr.msra.gmra.mxu3 %v4068_v35  ;;  %1222 = vmatpush.bf16.msrb.mxu2 %v3287_v47  ;;  %v4115_v14 = vld [vmem:[#allocation8 + $0x6c] sm:$0xf0]  ;;  %v3366_v15 = vld [vmem:[#allocation8 + $0x380] sm:$0xf]  ;;  %v3239_v19 = vor.u32 %v4183_v12, %v3238_v11  ;;  %v3288_v6 = vld [vmem:[#allocation8 + $0x2f0] sm:$0xf0] }
  0x45   :  { %1236 = vmatpush.bf16.msrb.mxu3 %v3415_v49  ;;  %v4215_v16 = vld [vmem:[#allocation8 + $0x38c] sm:$0xf0]  ;;  %v3094_v17 = vld [vmem:[#allocation8 + $0x160] sm:$0xf]  ;;  %v2967_v20 = vor.u32 %v4115_v14, %v2966_v10  ;;  %v3416_v10 = vld [vmem:[#allocation8 + $0x3f0] sm:$0xf0] }
  0x46   :  { %1195 = vmatpush.bf16.msrb.mxu0 %v3015_v48  ;;  %v4147_v18 = vld [vmem:[#allocation8 + $0x16c] sm:$0xf0]  ;;  %v3367_v21 = vor.u32 %v4215_v16, %v3366_v15  ;;  %v2950_v22 = vld [vmem:[#allocation8 + $0x40] sm:$0xf]  ;;  %v4157_v11 = vld [vmem:[#allocation8 + $0x1c4] sm:$0xf]  ;;  %v3291_v15 = vor.u32 %v4193_v5, %v3288_v6 }
  0x47   :  { %1209 = vmatpush.bf16.msrb.mxu1 %v3143_v53  ;;  %v3222_v23 = vld [vmem:[#allocation8 + $0x260] sm:$0xf]  ;;  %v4179_v24 = vld [vmem:[#allocation8 + $0x26c] sm:$0xf0]  ;;  %v3095_v25 = vor.u32 %v4147_v18, %v3094_v17  ;;  %v3144_v12 = vld [vmem:[#allocation8 + $0x1d0] sm:$0xf0] }
  0x48   :  { %1223 = vmatpush.bf16.msrb.mxu2 %v3271_v59  ;;  %v4111_v26 = vld [vmem:[#allocation8 + $0x4c] sm:$0xf0]  ;;  %v3350_v27 = vld [vmem:[#allocation8 + $0x360] sm:$0xf]  ;;  %v3223_v31 = vor.u32 %v4179_v24, %v3222_v23  ;;  %v4121_v18 = vld [vmem:[#allocation8 + $0xa4] sm:$0xf] }
  0x49   :  { %1237 = vmatpush.bf16.msrb.mxu3 %v3399_v61  ;;  %v4211_v28 = vld [vmem:[#allocation8 + $0x36c] sm:$0xf0]  ;;  %v3078_v29 = vld [vmem:[#allocation8 + $0x140] sm:$0xf]  ;;  %v2951_v32 = vor.u32 %v4111_v26, %v2950_v22  ;;  %v3000_v22 = vld [vmem:[#allocation8 + $0xb0] sm:$0xf0] }
  0x4a   :  { %1196 = vmatpush.bf16.msrb.mxu0 %v2999_v60  ;;  %v4143_v30 = vld [vmem:[#allocation8 + $0x14c] sm:$0xf0]  ;;  %v3351_v33 = vor.u32 %v4211_v28, %v3350_v27  ;;  %v2934_v34 = vld [vmem:[#allocation8 + $0x20] sm:$0xf]  ;;  %v4221_v23 = vld [vmem:[#allocation8 + $0x3c4] sm:$0xf]  ;;  %v3003_v28 = vor.u32 %v4121_v18, %v3000_v22 }
  0x4b   :  { %1210 = vmatpush.bf16.msrb.mxu1 %v3127_v1  ;;  %v3206_v35 = vld [vmem:[#allocation8 + $0x240] sm:$0xf]  ;;  %v4175_v36 = vld [vmem:[#allocation8 + $0x24c] sm:$0xf0]  ;;  %v3079_v37 = vor.u32 %v4143_v30, %v3078_v29  ;;  %v3400_v24 = vld [vmem:[#allocation8 + $0x3d0] sm:$0xf0] }
  0x4c   :  { %1224 = vmatpush.bf16.msrb.mxu2 %v3255_v7  ;;  %v4107_v38 = vld [vmem:[#allocation8 + $0x2c] sm:$0xf0]  ;;  %v3334_v39 = vld [vmem:[#allocation8 + $0x340] sm:$0xf]  ;;  %v3207_v43 = vor.u32 %v4175_v36, %v3206_v35  ;;  %v3163_v7 = vor.u32 %v4161_v57, %v3160_v58  ;;  %v3128_v26 = vld [vmem:[#allocation8 + $0x1b0] sm:$0xf0]  ;;  %v3403_v29 = vor.u32 %v4221_v23, %v3400_v24 }
  0x4d   :  { %1238 = vmatpush.bf16.msrb.mxu3 %v3383_v9  ;;  %v4207_v40 = vld [vmem:[#allocation8 + $0x34c] sm:$0xf0]  ;;  %v3062_v41 = vld [vmem:[#allocation8 + $0x120] sm:$0xf]  ;;  %v2935_v45 = vor.u32 %v4107_v38, %v2934_v34  ;;  %v4225_v9 = vld [vmem:[#allocation8 + $0x3e4] sm:$0xf] }
  0x4e   :  { %1197 = vmatpush.bf16.msrb.mxu0 %v2983_v8  ;;  %v4139_v42 = vld [vmem:[#allocation8 + $0x12c] sm:$0xf0]  ;;  %v2918_v44 = vld [vmem:[#allocation8] sm:$0xf]  ;;  %v3335_v46 = vor.u32 %v4207_v40, %v3334_v39  ;;  %v3016_v8 = vld [vmem:[#allocation8 + $0xd0] sm:$0xf0]  ;;  %v3419_v17 = vor.u32 %v4225_v9, %v3416_v10 }
  0x4f   :  { %1211 = vmatpush.bf16.msrb.mxu1 %v3111_v13  ;;  %v4103_v47 = vld [vmem:[#allocation8 + $0xc] sm:$0xf0]  ;;  %v3190_v48 = vld [vmem:[#allocation8 + $0x220] sm:$0xf]  ;;  %v3063_v50 = vor.u32 %v4139_v42, %v3062_v41  ;;  %v3019_v16 = vor.u32 %v4125_v62, %v3016_v8  ;;  %v3112_v34 = vld [vmem:[#allocation8 + $0x190] sm:$0xf0] }
  0x50   :  { %1225 = vmatpush.bf16.msrb.mxu2 %v3239_v19  ;;  %v4171_v49 = vld [vmem:[#allocation8 + $0x22c] sm:$0xf0]  ;;  %v3046_v51 = vld [vmem:[#allocation8 + $0x100] sm:$0xf]  ;;  %v2919_v60 = vor.u32 %v4103_v47, %v2918_v44  ;;  %v4189_v19 = vld [vmem:[#allocation8 + $0x2c4] sm:$0xf] }
  0x51   :  { %1239 = vmatpush.bf16.msrb.mxu3 %v3367_v21  ;;  %v3318_v52 = vld [vmem:[#allocation8 + $0x320] sm:$0xf]  ;;  %v4203_v53 = vld [vmem:[#allocation8 + $0x32c] sm:$0xf0]  ;;  %v3191_v59 = vor.u32 %v4171_v49, %v3190_v48  ;;  %v3147_v21 = vor.u32 %v4157_v11, %v3144_v12  ;;  %v3256_v38 = vld [vmem:[#allocation8 + $0x2b0] sm:$0xf0] }
  0x52   :  { %1198 = vmatpush.bf16.msrb.mxu0 %v2967_v20  ;;  %v4135_v54 = vld [vmem:[#allocation8 + $0x10c] sm:$0xf0]  ;;  %v3319_v61 = vor.u32 %v4203_v53, %v3318_v52  ;;  %v3174_v63 = vld [vmem:[#allocation8 + $0x200] sm:$0xf]  ;;  %v3272_v20 = vld [vmem:[#allocation8 + $0x2d0] sm:$0xf0] }
  0x53   :  { %1212 = vmatpush.bf16.msrb.mxu1 %v3095_v25  ;;  %v4167_v0 = vld [vmem:[#allocation8 + $0x20c] sm:$0xf0]  ;;  %v3302_v1 = vld [vmem:[#allocation8 + $0x300] sm:$0xf]  ;;  %v3047_v2 = vor.u32 %v4135_v54, %v3046_v51  ;;  %v4153_v25 = vld [vmem:[#allocation8 + $0x1a4] sm:$0xf]  ;;  %v3275_v27 = vor.u32 %v4189_v19, %v3272_v20 }
  0x54   :  { %1226 = vmatpush.bf16.msrb.mxu2 %v3223_v31  ;;  %v4199_v4 = vld [vmem:[#allocation8 + $0x30c] sm:$0xf0]  ;;  %v3175_v13 = vor.u32 %v4167_v0, %v3174_v63  ;;  %v3131_v30 = vor.u32 %v4153_v25, %v3128_v26  ;;  %v4117_v31 = vld [vmem:[#allocation8 + $0x84] sm:$0xf]  ;;  %v3384_v41 = vld [vmem:[#allocation8 + $0x3b0] sm:$0xf0] }
  0x55   :  { %1240 = vmatpush.bf16.msrb.mxu3 %v3351_v33  ;;  %v3303_v14 = vor.u32 %v4199_v4, %v3302_v1  ;;  %v4149_v33 = vld [vmem:[#allocation8 + $0x184] sm:$0xf]  ;;  %v2968_v44 = vld [vmem:[#allocation8 + $0x70] sm:$0xf0] }
  0x56   :  { %1199 = vmatpush.bf16.msrb.mxu0 %v2951_v32  ;;  %v2984_v32 = vld [vmem:[#allocation8 + $0x90] sm:$0xf0]  ;;  %v3115_v36 = vor.u32 %v4149_v33, %v3112_v34  ;;  %v4217_v39 = vld [vmem:[#allocation8 + $0x3a4] sm:$0xf]  ;;  %v172_v33 = vld [vmem:[#allocation7] sm:$0xf] }
  0x57   :  { %1213 = vmatpush.bf16.msrb.mxu1 %v3079_v37  ;;  %v2987_v35 = vor.u32 %v4117_v31, %v2984_v32  ;;  %v4185_v37 = vld [vmem:[#allocation8 + $0x2a4] sm:$0xf]  ;;  %v3387_v42 = vor.u32 %v4217_v39, %v3384_v41  ;;  %v3096_v47 = vld [vmem:[#allocation8 + $0x170] sm:$0xf0] }
  0x58   :  { %1227 = vmatpush.bf16.msrb.mxu2 %v3207_v43  ;;  %v3259_v40 = vor.u32 %v4185_v37, %v3256_v38  ;;  %v4113_v43 = vld [vmem:[#allocation8 + $0x64] sm:$0xf]  ;;  %v3368_v53 = vld [vmem:[#allocation8 + $0x390] sm:$0xf0]  ;;  %v175_v37 = vperm.slane %v172_v33, 1 }
  0x59   :  { %1241 = vmatpush.bf16.msrb.mxu3 %v3335_v46  ;;  %v2971_v46 = vor.u32 %v4113_v43, %v2968_v44  ;;  %v4181_v49 = vld [vmem:[#allocation8 + $0x284] sm:$0xf]  ;;  %v2952_v56 = vld [vmem:[#allocation8 + $0x50] sm:$0xf0] }
  0x5a   :  { %1200 = vmatpush.bf16.msrb.mxu0 %v2935_v45  ;;  %v4145_v45 = vld [vmem:[#allocation8 + $0x164] sm:$0xf]  ;;  %v3224_v62 = vld [vmem:[#allocation8 + $0x270] sm:$0xf0] }
  0x5b   :  { %1214 = vmatpush.bf16.msrb.mxu1 %v3063_v50  ;;  %v3099_v48 = vor.u32 %v4145_v45, %v3096_v47  ;;  %v3240_v50 = vld [vmem:[#allocation8 + $0x290] sm:$0xf0]  ;;  %v4213_v52 = vld [vmem:[#allocation8 + $0x384] sm:$0xf]  ;;  %v4132_v47 = vld [vmem:[#allocation8 + $0xf4] sm:$0xf0] }
  0x5c   :  { %1228 = vmatpush.bf16.msrb.mxu2 %v3191_v59  ;;  %v3243_v51 = vor.u32 %v4181_v49, %v3240_v50  ;;  %v3371_v54 = vor.u32 %v4213_v52, %v3368_v53  ;;  %v4109_v55 = vld [vmem:[#allocation8 + $0x44] sm:$0xf]  ;;  %v3080_v59 = vld [vmem:[#allocation8 + $0x150] sm:$0xf0]  ;;  %v176_v49 = vperm.slane %v172_v33, 2  ;;  %v177_v53 = vperm.slane %v172_v33, 3 }
  0x5d   :  { %1242 = vmatpush.bf16.msrb.mxu3 %v3319_v61  ;;  %v4141_v57 = vld [vmem:[#allocation8 + $0x144] sm:$0xf]  ;;  %v2955_v58 = vor.u32 %v4109_v55, %v2952_v56  ;;  %v3352_v1 = vld [vmem:[#allocation8 + $0x370] sm:$0xf0]  ;;  %v4164_v52 = vld [vmem:[#allocation8 + $0x1f4] sm:$0xf0] }
  0x5e   :  { %1201 = vmatpush.bf16.msrb.mxu0 %v2919_v60  ;;  %v3083_v60 = vor.u32 %v4141_v57, %v3080_v59  ;;  %v4177_v61 = vld [vmem:[#allocation8 + $0x264] sm:$0xf]  ;;  %v2936_v4 = vld [vmem:[#allocation8 + $0x30] sm:$0xf0]  ;;  %v3022_v59 = vld [vmem:[#allocation8 + $0xc8] sm:$0xf] }
  0x5f   :  { %1215 = vmatpush.bf16.msrb.mxu1 %v3047_v2  ;;  %v4209_v63 = vld [vmem:[#allocation8 + $0x364] sm:$0xf]  ;;  %v3227_v0 = vor.u32 %v4177_v61, %v3224_v62  ;;  %v3208_v10 = vld [vmem:[#allocation8 + $0x250] sm:$0xf0] }
  0x60   :  { %1229 = vmatpush.bf16.msrb.mxu2 %v3175_v13  ;;  %v3355_v2 = vor.u32 %v4209_v63, %v3352_v1  ;;  %v4137_v6 = vld [vmem:[#allocation8 + $0x124] sm:$0xf]  ;;  %v3336_v13 = vld [vmem:[#allocation8 + $0x350] sm:$0xf0]  ;;  %v3150_v63 = vld [vmem:[#allocation8 + $0x1c8] sm:$0xf] }
  0x61   :  { %1243 = vmatpush.bf16.msrb.mxu3 %v3303_v14  ;;  %v4173_v9 = vld [vmem:[#allocation8 + $0x244] sm:$0xf]  ;;  %v3048_v19 = vld [vmem:[#allocation8 + $0x110] sm:$0xf0] }
  0x62   :  { %1250 = vmatpush.bf16.msra.mxu0 %v3035_v3  ;;  %v4105_v3 = vld [vmem:[#allocation8 + $0x24] sm:$0xf]  ;;  %v3211_v12 = vor.u32 %v4173_v9, %v3208_v10  ;;  %v3192_v22 = vld [vmem:[#allocation8 + $0x230] sm:$0xf0] }
  0x63   :  { %1264 = vmatpush.bf16.msra.mxu1 %v3163_v7  ;;  %v2939_v5 = vor.u32 %v4105_v3, %v2936_v4  ;;  %v3064_v7 = vld [vmem:[#allocation8 + $0x130] sm:$0xf0]  ;;  %v4205_v11 = vld [vmem:[#allocation8 + $0x344] sm:$0xf] }
  0x64   :  { %1278 = vmatpush.bf16.msra.mxu2 %v3291_v15  ;;  %v3067_v8 = vor.u32 %v4137_v6, %v3064_v7  ;;  %v3339_v14 = vor.u32 %v4205_v11, %v3336_v13  ;;  %v4101_v15 = vld [vmem:[#allocation8 + $0x4] sm:$0xf]  ;;  %v3320_v24 = vld [vmem:[#allocation8 + $0x330] sm:$0xf0]  ;;  %v3294_v6 = vld [vmem:[#allocation8 + $0x2e8] sm:$0xf] }
  0x65   :  { %1292 = vmatpush.bf16.msra.mxu3 %v3419_v17  ;;  %v4133_v17 = vld [vmem:[#allocation8 + $0x104] sm:$0xf]  ;;  %v3304_v31 = vld [vmem:[#allocation8 + $0x310] sm:$0xf0]  ;;  %v4196_v7 = vld [vmem:[#allocation8 + $0x2f4] sm:$0xf0] }
  0x66   :  { %1251 = vmatpush.bf16.msra.mxu0 %v3019_v16  ;;  %v2920_v16 = vld [vmem:[#allocation8 + $0x10] sm:$0xf0]  ;;  %v3051_v20 = vor.u32 %v4133_v17, %v3048_v19  ;;  %v4201_v23 = vld [vmem:[#allocation8 + $0x324] sm:$0xf]  ;;  %v4228_v11 = vld [vmem:[#allocation8 + $0x3f4] sm:$0xf0] }
  0x67   :  { %1265 = vmatpush.bf16.msra.mxu1 %v3147_v21  ;;  %v2923_v18 = vor.u32 %v4101_v15, %v2920_v16  ;;  %v4169_v21 = vld [vmem:[#allocation8 + $0x224] sm:$0xf]  ;;  %v3323_v26 = vor.u32 %v4201_v23, %v3320_v24  ;;  %v4124_v13 = vld [vmem:[#allocation8 + $0xb4] sm:$0xf0]  ;;  %v3134_v16 = vld [vmem:[#allocation8 + $0x1a8] sm:$0xf] }
  0x68   :  { %1279 = vmatpush.bf16.msra.mxu2 %v3275_v27  ;;  %v3195_v25 = vor.u32 %v4169_v21, %v3192_v22  ;;  %v4165_v27 = vld [vmem:[#allocation8 + $0x204] sm:$0xf]  ;;  %v4156_v17 = vld [vmem:[#allocation8 + $0x1b4] sm:$0xf0]  ;;  %v3278_v24 = vld [vmem:[#allocation8 + $0x2c8] sm:$0xf] }
  0x69   :  { %1293 = vmatpush.bf16.msra.mxu3 %v3403_v29 }
  0x6a   :  { %1252 = vmatpush.bf16.msra.mxu0 %v3003_v28  ;;  %v3176_v28 = vld [vmem:[#allocation8 + $0x210] sm:$0xf0] }
  0x6b   :  { %1266 = vmatpush.bf16.msra.mxu1 %v3131_v30  ;;  %v3179_v29 = vor.u32 %v4165_v27, %v3176_v28  ;;  %v4197_v30 = vld [vmem:[#allocation8 + $0x304] sm:$0xf]  ;;  %v3135_v28 = vor.u32 %v4156_v17, %v3134_v16  ;;  %v2926_v16 = vld [vmem:[#allocation8 + $0x8] sm:$0xf]  ;;  %v4104_v17 = vld [vmem:[#allocation8 + $0x14] sm:$0xf0] }
  0x6c   :  { %1280 = vmatpush.bf16.msra.mxu2 %v3259_v40  ;;  %v3307_v32 = vor.u32 %v4197_v30, %v3304_v31  ;;  %v2990_v30 = vld [vmem:[#allocation8 + $0x88] sm:$0xf]  ;;  %v4120_v31 = vld [vmem:[#allocation8 + $0x94] sm:$0xf0] }
  0x6d   :  { %1294 = vmatpush.bf16.msra.mxu3 %v3387_v42 }
  0x6e   :  { %1253 = vmatpush.bf16.msra.mxu0 %v2987_v35  ;;  %v174_v35 = vperm.slane %v172_v33, 0  ;;  %v4152_v33 = vld [vmem:[#allocation8 + $0x194] sm:$0xf0] }
  0x6f   :  { %1267 = vmatpush.bf16.msra.mxu1 %v3115_v36 }
  0x70   :  { %1281 = vmatpush.bf16.msra.mxu2 %v3243_v51  ;;  %v3166_v51 = vld [vmem:[#allocation8 + $0x1e8] sm:$0xf] }
  0x71   :  { %1295 = vmatpush.bf16.msra.mxu3 %v3371_v54 }
  0x72   :  { %1254 = vmatpush.bf16.msra.mxu0 %v2971_v46  ;;  %v3038_v46 = vld [vmem:[#allocation8 + $0xe8] sm:$0xf] }
  0x73   :  { %1268 = vmatpush.bf16.msra.mxu1 %v3099_v48  ;;  %v3039_v56 = vor.u32 %v4132_v47, %v3038_v46 }
  0x74   :  { %1282 = vmatpush.bf16.msra.mxu2 %v3227_v0  ;;  %v4160_v0 = vld [vmem:[#allocation8 + $0x1d4] sm:$0xf0] }
  0x75   :  { %1296 = vmatpush.bf16.msra.mxu3 %v3355_v2  ;;  %v3151_v10 = vor.u32 %v4160_v0, %v3150_v63  ;;  %v4180_v63 = vld [vmem:[#allocation8 + $0x274] sm:$0xf0] }
  0x76   :  { %1255 = vmatpush.bf16.msra.mxu0 %v2955_v58  ;;  %v3167_v58 = vor.u32 %v4164_v52, %v3166_v51  ;;  %v3374_v52 = vld [vmem:[#allocation8 + $0x388] sm:$0xf] }
  0x77   :  { %1269 = vmatpush.bf16.msra.mxu1 %v3083_v60  ;;  %v4128_v60 = vld [vmem:[#allocation8 + $0xd4] sm:$0xf0] }
  0x78   :  { %1283 = vmatpush.bf16.msra.mxu2 %v3211_v12  ;;  %v3006_v12 = vld [vmem:[#allocation8 + $0xa8] sm:$0xf] }
  0x79   :  { %1297 = vmatpush.bf16.msra.mxu3 %v3339_v14  ;;  %v3007_v23 = vor.u32 %v4124_v13, %v3006_v12  ;;  %v3342_v12 = vld [vmem:[#allocation8 + $0x348] sm:$0xf] }
  0x7a   :  { %1256 = vmatpush.bf16.msra.mxu0 %v2939_v5  ;;  %v3023_v5 = vor.u32 %v4128_v60, %v3022_v59 }
  0x7b   :  { %1270 = vmatpush.bf16.msra.mxu1 %v3067_v8  ;;  %v3422_v8 = vld [vmem:[#allocation8 + $0x3e8] sm:$0xf] }
  0x7c   :  { %1284 = vmatpush.bf16.msra.mxu2 %v3195_v25  ;;  %v3423_v22 = vor.u32 %v4228_v11, %v3422_v8  ;;  %v4192_v25 = vld [vmem:[#allocation8 + $0x2d4] sm:$0xf0] }
  0x7d   :  { %1298 = vmatpush.bf16.msra.mxu3 %v3323_v26  ;;  %v3406_v26 = vld [vmem:[#allocation8 + $0x3c8] sm:$0xf]  ;;  %v4176_v11 = vld [vmem:[#allocation8 + $0x254] sm:$0xf0] }
  0x7e   :  { %1257 = vmatpush.bf16.msra.mxu0 %v2923_v18 }
  0x7f   :  { %1271 = vmatpush.bf16.msra.mxu1 %v3051_v20  ;;  %v3295_v20 = vor.u32 %v4196_v7, %v3294_v6  ;;  %v3070_v6 = vld [vmem:[#allocation8 + $0x128] sm:$0xf]  ;;  %v4140_v7 = vld [vmem:[#allocation8 + $0x134] sm:$0xf0] }
  0x80   :  { %1285 = vmatpush.bf16.msra.mxu2 %v3179_v29  ;;  %v4224_v29 = vld [vmem:[#allocation8 + $0x3d4] sm:$0xf0] }
  0x81   :  { %1299 = vmatpush.bf16.msra.mxu3 %v3307_v32  ;;  %v3118_v32 = vld [vmem:[#allocation8 + $0x188] sm:$0xf] }
  0xbe   :  { %v357_v34 = vpop.f32.mrf.mxu0 }
  0xbf   :  { %v371_v36 = vpop.f32.mrf.mxu1  ;;  %v358_v38 = vadd.f32 %v357_v34, %v174_v35  ;;  %v3279_v34 = vor.u32 %v4192_v25, %v3278_v24  ;;  %v4162_v24 = vld [vmem:[#allocation8 + $0x1ec] sm:$0xf]  ;;  %v3168_v25 = vld [vmem:[#allocation8 + $0x1f8] sm:$0xf0] }
  0xc0   :  { %v372_v39 = vadd.f32 %v371_v36, %v175_v37  ;;  %v2991_v36 = vor.u32 %v4120_v31, %v2990_v30  ;;  %v2927_v30 = vor.u32 %v4104_v17, %v2926_v16  ;;  %v4114_v16 = vld [vmem:[#allocation8 + $0x6c] sm:$0xf]  ;;  %v2976_v17 = vld [vmem:[#allocation8 + $0x78] sm:$0xf0] }
  0xc1   :  { %v404_v43 = vmax.f32 %v358_v38, 0.0  ;;  %v4188_v38 = vld [vmem:[#allocation8 + $0x2b4] sm:$0xf0] }
  0xc2   :  { %v405_v48 = vmax.f32 %v372_v39, 0.0  ;;  %v3119_v39 = vor.u32 %v4152_v33, %v3118_v32  ;;  %v3326_v32 = vld [vmem:[#allocation8 + $0x328] sm:$0xf]  ;;  %v4204_v33 = vld [vmem:[#allocation8 + $0x334] sm:$0xf0] }
  0xc6   :  { %v385_v40 = vpop.f32.mrf.mxu2  ;;  %v359_v42 = vpop.f32.mrf.mxu0 }
  0xc7   :  { %v399_v41 = vpop.f32.mrf.mxu3  ;;  %v360_v44 = vadd.f32 %v359_v42, %v174_v35  ;;  %v373_v45 = vpop.f32.mrf.mxu1  ;;  %v386_v61 = vadd.f32 %v385_v40, %v176_v49  ;;  %v3407_v35 = vor.u32 %v4224_v29, %v3406_v26  ;;  %v3390_v40 = vld [vmem:[#allocation8 + $0x3a8] sm:$0xf]  ;;  %v4172_v29 = vld [vmem:[#allocation8 + $0x234] sm:$0xf0] }
  0xc8   :  { %v374_v50 = vadd.f32 %v373_v45, %v175_v37  ;;  %v400_v1 = vadd.f32 %v399_v41, %v177_v53  ;;  %v3262_v37 = vld [vmem:[#allocation8 + $0x2a8] sm:$0xf]  ;;  %v4220_v41 = vld [vmem:[#allocation8 + $0x3b4] sm:$0xf0] }
  0xc9   :  { %v408_v54 = vmax.f32 %v360_v44, 0.0  ;;  %v406_v14 = vmax.f32 %v386_v61, 0.0  ;;  %v2974_v42 = vld [vmem:[#allocation8 + $0x68] sm:$0xf]  ;;  %v4148_v45 = vld [vmem:[#allocation8 + $0x174] sm:$0xf0]  ;;  %v3263_v46 = vor.u32 %v4188_v38, %v3262_v37  ;;  %v3391_v47 = vor.u32 %v4220_v41, %v3390_v40 }
  0xca   :  { %v409_v55 = vmax.f32 %v374_v50, 0.0  ;;  %v407_v18 = vmax.f32 %v400_v1, 0.0  ;;  %v3102_v44 = vld [vmem:[#allocation8 + $0x168] sm:$0xf]  ;;  %v3024_v38 = vld [vmem:[#allocation8 + $0xd8] sm:$0xf0]  ;;  %v3327_v41 = vor.u32 %v4204_v33, %v3326_v32 }
  0xcb   :  { %v4691_v57 = vpack.c.bf16 %v408_v54, %v404_v43  ;;  %v4116_v43 = vld [vmem:[#allocation8 + $0x74] sm:$0xf0]  ;;  %v3103_v51 = vor.u32 %v4148_v45, %v3102_v44  ;;  %v2958_v54 = vld [vmem:[#allocation8 + $0x48] sm:$0xf]  ;;  %v3152_v40 = vld [vmem:[#allocation8 + $0x1d8] sm:$0xf0] }
  0xcc   :  { %v4693_v62 = vpack.c.bf16 %v409_v55, %v405_v48  ;;  %v3246_v48 = vld [vmem:[#allocation8 + $0x288] sm:$0xf]  ;;  %v2975_v50 = vor.u32 %v4116_v43, %v2974_v42  ;;  %v4112_v55 = vld [vmem:[#allocation8 + $0x54] sm:$0xf0]  ;;  %v4142_v32 = vld [vmem:[#allocation8 + $0x14c] sm:$0xf] }
  0xcd   :  { %1202 = vmatmul.bf16.vlgmr.msrb.gmra.mxu0 %v4691_v57  ;;  %v3230_v61 = vld [vmem:[#allocation8 + $0x268] sm:$0xf]  ;;  %v2959_v0 = vor.u32 %v4112_v55, %v2958_v54  ;;  %v4168_v43 = vld [vmem:[#allocation8 + $0x214] sm:$0xf0]  ;;  %v3008_v54 = vld [vmem:[#allocation8 + $0xb8] sm:$0xf0] }
  0xce   :  { %v387_v2 = vpop.f32.mrf.mxu2  ;;  %1216 = vmatmul.bf16.vlgmr.msrb.gmra.mxu1 %v4693_v62  ;;  %1306 = vmatpush.bf16.msrb.mxu0 %v3039_v56  ;;  %v3086_v56 = vld [vmem:[#allocation8 + $0x148] sm:$0xf]  ;;  %v3231_v8 = vor.u32 %v4180_v63, %v3230_v61  ;;  %v4200_v45 = vld [vmem:[#allocation8 + $0x314] sm:$0xf0]  ;;  %v4154_v55 = vld [vmem:[#allocation8 + $0x1ac] sm:$0xf] }
  0xcf   :  { %v388_v3 = vadd.f32 %v387_v2, %v176_v49  ;;  %v401_v4 = vpop.f32.mrf.mxu3  ;;  %1320 = vmatpush.bf16.msrb.mxu1 %v3167_v58  ;;  %v4184_v49 = vld [vmem:[#allocation8 + $0x294] sm:$0xf0]  ;;  %v3358_v2 = vld [vmem:[#allocation8 + $0x368] sm:$0xf]  ;;  %v4190_v61 = vld [vmem:[#allocation8 + $0x2cc] sm:$0xf] }
  0xd0   :  { %v402_v9 = vadd.f32 %v401_v4, %v177_v53  ;;  %v4216_v53 = vld [vmem:[#allocation8 + $0x394] sm:$0xf0]  ;;  %v3247_v59 = vor.u32 %v4184_v49, %v3246_v48  ;;  %v2942_v4 = vld [vmem:[#allocation8 + $0x28] sm:$0xf]  ;;  %v3280_v63 = vld [vmem:[#allocation8 + $0x2d8] sm:$0xf0] }
  0xd1   :  { %v410_v15 = vmax.f32 %v388_v3, 0.0  ;;  %v4144_v58 = vld [vmem:[#allocation8 + $0x154] sm:$0xf0]  ;;  %v3375_v60 = vor.u32 %v4216_v53, %v3374_v52  ;;  %v3182_v42 = vld [vmem:[#allocation8 + $0x208] sm:$0xf] }
  0xd2   :  { %v411_v19 = vmax.f32 %v402_v9, 0.0  ;;  %1307 = vmatpush.bf16.msrb.mxu0 %v3023_v5  ;;  %v3087_v1 = vor.u32 %v4144_v58, %v3086_v56  ;;  %v4212_v3 = vld [vmem:[#allocation8 + $0x374] sm:$0xf0]  ;;  %v3310_v44 = vld [vmem:[#allocation8 + $0x308] sm:$0xf]  ;;  %v3183_v53 = vor.u32 %v4168_v43, %v3182_v42 }
  0xd3   :  { %v4697_v21 = vpack.c.bf16 %v410_v15, %v406_v14  ;;  %1321 = vmatpush.bf16.msrb.mxu1 %v3151_v10  ;;  %v4108_v5 = vld [vmem:[#allocation8 + $0x34] sm:$0xf0]  ;;  %v3359_v9 = vor.u32 %v4212_v3, %v3358_v2  ;;  %v3214_v10 = vld [vmem:[#allocation8 + $0x248] sm:$0xf]  ;;  %v3071_v14 = vor.u32 %v4140_v7, %v3070_v6  ;;  %v4122_v52 = vld [vmem:[#allocation8 + $0xac] sm:$0xf]  ;;  %v3311_v58 = vor.u32 %v4200_v45, %v3310_v44 }
  0xd4   :  { %v4699_v27 = vpack.c.bf16 %v411_v19, %v407_v18  ;;  %v2943_v13 = vor.u32 %v4108_v5, %v2942_v4  ;;  %v4208_v15 = vld [vmem:[#allocation8 + $0x354] sm:$0xf0]  ;;  %v3054_v18 = vld [vmem:[#allocation8 + $0x108] sm:$0xf]  ;;  %v3136_v56 = vld [vmem:[#allocation8 + $0x1b8] sm:$0xf0] }
  0xd5   :  { %1230 = vmatmul.bf16.vlgmr.msrb.gmra.mxu2 %v4697_v21  ;;  %v4136_v19 = vld [vmem:[#allocation8 + $0x114] sm:$0xf0]  ;;  %v3343_v26 = vor.u32 %v4208_v15, %v3342_v12  ;;  %v4222_v2 = vld [vmem:[#allocation8 + $0x3cc] sm:$0xf]  ;;  %v3408_v3 = vld [vmem:[#allocation8 + $0x3d8] sm:$0xf0] }
  0xd6   :  { %1244 = vmatmul.bf16.vlgmr.msrb.gmra.mxu3 %v4699_v27  ;;  %1334 = vmatpush.bf16.msrb.mxu2 %v3295_v20  ;;  %v4130_v20 = vld [vmem:[#allocation8 + $0xec] sm:$0xf]  ;;  %v3055_v31 = vor.u32 %v4136_v19, %v3054_v18  ;;  %v2992_v5 = vld [vmem:[#allocation8 + $0x98] sm:$0xf0] }
  0xd7   :  { %1348 = vmatpush.bf16.msrb.mxu3 %v3423_v22  ;;  %1308 = vmatpush.bf16.msrb.mxu0 %v3007_v23  ;;  %v3215_v22 = vor.u32 %v4176_v11, %v3214_v10  ;;  %v3040_v23 = vld [vmem:[#allocation8 + $0xf8] sm:$0xf0]  ;;  %v4118_v4 = vld [vmem:[#allocation8 + $0x8c] sm:$0xf] }
  0xd8   :  { %1322 = vmatpush.bf16.msrb.mxu1 %v3135_v28  ;;  %v3198_v28 = vld [vmem:[#allocation8 + $0x228] sm:$0xf]  ;;  %v4150_v6 = vld [vmem:[#allocation8 + $0x18c] sm:$0xf]  ;;  %v3120_v7 = vld [vmem:[#allocation8 + $0x198] sm:$0xf0]  ;;  %v2995_v12 = vor.u32 %v4118_v4, %v2992_v5 }
  0xd9   :  { %v3199_v37 = vor.u32 %v4172_v29, %v3198_v28  ;;  %v4186_v10 = vld [vmem:[#allocation8 + $0x2ac] sm:$0xf]  ;;  %v3264_v11 = vld [vmem:[#allocation8 + $0x2b8] sm:$0xf0] }
  0xda   :  { %1335 = vmatpush.bf16.msrb.mxu2 %v3279_v34  ;;  %v3043_v34 = vor.u32 %v4130_v20, %v3040_v23  ;;  %v3392_v15 = vld [vmem:[#allocation8 + $0x3b8] sm:$0xf0]  ;;  %v4146_v18 = vld [vmem:[#allocation8 + $0x16c] sm:$0xf]  ;;  %v3267_v20 = vor.u32 %v4186_v10, %v3264_v11 }
  0xdb   :  { %1349 = vmatpush.bf16.msrb.mxu3 %v3407_v35  ;;  %1309 = vmatpush.bf16.msrb.mxu0 %v2991_v36  ;;  %v3171_v35 = vor.u32 %v4162_v24, %v3168_v25  ;;  %v4126_v36 = vld [vmem:[#allocation8 + $0xcc] sm:$0xf]  ;;  %v3104_v19 = vld [vmem:[#allocation8 + $0x178] sm:$0xf0]  ;;  %v2979_v25 = vor.u32 %v4114_v16, %v2976_v17 }
  0xdc   :  { %1323 = vmatpush.bf16.msrb.mxu1 %v3119_v39  ;;  %v4158_v39 = vld [vmem:[#allocation8 + $0x1cc] sm:$0xf]  ;;  %v3027_v48 = vor.u32 %v4126_v36, %v3024_v38  ;;  %v3248_v24 = vld [vmem:[#allocation8 + $0x298] sm:$0xf0] }
  0xdd   :  { %1258 = vmatmul.bf16.vlgmr.msra.gmra.mxu0 %v4691_v57  ;;  %v3155_v49 = vor.u32 %v4158_v39, %v3152_v40  ;;  %v4182_v23 = vld [vmem:[#allocation8 + $0x28c] sm:$0xf]  ;;  %v3376_v29 = vld [vmem:[#allocation8 + $0x398] sm:$0xf0] }
  0xde   :  { %1336 = vmatpush.bf16.msrb.mxu2 %v3263_v46  ;;  %1272 = vmatmul.bf16.vlgmr.msra.gmra.mxu1 %v4693_v62  ;;  %v4194_v46 = vld [vmem:[#allocation8 + $0x2ec] sm:$0xf]  ;;  %v3088_v33 = vld [vmem:[#allocation8 + $0x158] sm:$0xf0] }
  0xdf   :  { %1350 = vmatpush.bf16.msrb.mxu3 %v3391_v47  ;;  %1310 = vmatpush.bf16.msrb.mxu0 %v2975_v50  ;;  %v3296_v47 = vld [vmem:[#allocation8 + $0x2f8] sm:$0xf0]  ;;  %v4226_v50 = vld [vmem:[#allocation8 + $0x3ec] sm:$0xf]  ;;  %v3091_v39 = vor.u32 %v4142_v32, %v3088_v33  ;;  %v4247_v32 = vld [vmem:[#allocation11 + $0x8c] sm:$0xf0] }
  0xe0   :  { %1324 = vmatpush.bf16.msrb.mxu1 %v3103_v51  ;;  %v3424_v51 = vld [vmem:[#allocation8 + $0x3f8] sm:$0xf0]  ;;  %v4214_v28 = vld [vmem:[#allocation8 + $0x38c] sm:$0xf] }
  0xe1   :  { %v4178_v36 = vld [vmem:[#allocation8 + $0x26c] sm:$0xf]  ;;  %v2944_v43 = vld [vmem:[#allocation8 + $0x38] sm:$0xf0] }
  0xe2   :  { %1337 = vmatpush.bf16.msrb.mxu2 %v3247_v59  ;;  %v3299_v59 = vor.u32 %v4194_v46, %v3296_v47  ;;  %v4210_v40 = vld [vmem:[#allocation8 + $0x36c] sm:$0xf]  ;;  %v3072_v45 = vld [vmem:[#allocation8 + $0x138] sm:$0xf0] }
  0xe3   :  { %1351 = vmatpush.bf16.msrb.mxu3 %v3375_v60  ;;  %1311 = vmatpush.bf16.msrb.mxu0 %v2959_v0  ;;  %v3427_v60 = vor.u32 %v4226_v50, %v3424_v51  ;;  %v3011_v0 = vor.u32 %v4122_v52, %v3008_v54  ;;  %v4106_v42 = vld [vmem:[#allocation8 + $0x2c] sm:$0xf]  ;;  %v3184_v17 = vld [vmem:[#allocation8 + $0x218] sm:$0xf0] }
  0xe4   :  { %1325 = vmatpush.bf16.msrb.mxu1 %v3087_v1  ;;  %v3139_v1 = vor.u32 %v4154_v55, %v3136_v56  ;;  %v4138_v44 = vld [vmem:[#allocation8 + $0x12c] sm:$0xf]  ;;  %v2947_v51 = vor.u32 %v4106_v42, %v2944_v43  ;;  %v2928_v55 = vld [vmem:[#allocation8 + $0x18] sm:$0xf0]  ;;  %v3446_v42 = vld [vmem:[#allocation11 + $0x20] sm:$0xf] }
  0xe5   :  { %1286 = vmatmul.bf16.vlgmr.msra.gmra.mxu2 %v4697_v21  ;;  %v4206_v50 = vld [vmem:[#allocation8 + $0x34c] sm:$0xf]  ;;  %v3075_v52 = vor.u32 %v4138_v44, %v3072_v45  ;;  %v4235_v43 = vld [vmem:[#allocation11 + $0x2c] sm:$0xf0] }
  0xe6   :  { %1300 = vmatmul.bf16.vlgmr.msra.gmra.mxu3 %v4699_v27  ;;  %1338 = vmatpush.bf16.msrb.mxu2 %v3231_v8  ;;  %v3283_v8 = vor.u32 %v4190_v61, %v3280_v63  ;;  %v4102_v54 = vld [vmem:[#allocation8 + $0xc] sm:$0xf]  ;;  %v4259_v61 = vld [vmem:[#allocation11 + $0xec] sm:$0xf0]  ;;  %v3670_v63 = vld [vmem:[#allocation11 + $0x1e0] sm:$0xf]  ;;  %v3447_v44 = vor.u32 %v4235_v43, %v3446_v42 }
  0xe7   :  { %1352 = vmatpush.bf16.msrb.mxu3 %v3359_v9  ;;  %1312 = vmatpush.bf16.msrb.mxu0 %v2943_v13  ;;  %v3411_v9 = vor.u32 %v4222_v2, %v3408_v3  ;;  %v3123_v13 = vor.u32 %v4150_v6, %v3120_v7  ;;  %v4134_v56 = vld [vmem:[#allocation8 + $0x10c] sm:$0xf]  ;;  %v3200_v3 = vld [vmem:[#allocation8 + $0x238] sm:$0xf0]  ;;  %v2931_v4 = vor.u32 %v4102_v54, %v2928_v55  ;;  %v4231_v45 = vld [vmem:[#allocation11 + $0xc] sm:$0xf0] }
  0xe8   :  { %1326 = vmatpush.bf16.msrb.mxu1 %v3071_v14  ;;  %v4218_v14 = vld [vmem:[#allocation8 + $0x3ac] sm:$0xf]  ;;  %v3328_v7 = vld [vmem:[#allocation8 + $0x338] sm:$0xf0]  ;;  %v4253_v54 = vld [vmem:[#allocation11 + $0xc4] sm:$0xf] }
  0xe9   :  { %v4170_v2 = vld [vmem:[#allocation8 + $0x22c] sm:$0xf]  ;;  %v3528_v55 = vld [vmem:[#allocation11 + $0xd0] sm:$0xf0] }
  0xea   :  { %1339 = vmatpush.bf16.msrb.mxu2 %v3215_v22  ;;  %v3395_v22 = vor.u32 %v4218_v14, %v3392_v15  ;;  %v4202_v6 = vld [vmem:[#allocation8 + $0x32c] sm:$0xf]  ;;  %v3203_v11 = vor.u32 %v4170_v2, %v3200_v3  ;;  %v4287_v14 = vld [vmem:[#allocation11 + $0x1cc] sm:$0xf0]  ;;  %v4249_v2 = vld [vmem:[#allocation11 + $0xa4] sm:$0xf] }
  0xeb   :  { %1353 = vmatpush.bf16.msrb.mxu3 %v3343_v26  ;;  %1313 = vmatpush.bf16.msrb.mxu0 %v2927_v30  ;;  %v3107_v26 = vor.u32 %v4146_v18, %v3104_v19  ;;  %v4110_v30 = vld [vmem:[#allocation8 + $0x4c] sm:$0xf]  ;;  %v3331_v15 = vor.u32 %v4202_v6, %v3328_v7  ;;  %v3312_v19 = vld [vmem:[#allocation8 + $0x318] sm:$0xf0]  ;;  %v3512_v3 = vld [vmem:[#allocation11 + $0xb0] sm:$0xf0] }
  0xec   :  { %1327 = vmatpush.bf16.msrb.mxu1 %v3055_v31  ;;  %v2960_v31 = vld [vmem:[#allocation8 + $0x58] sm:$0xf0]  ;;  %v4166_v16 = vld [vmem:[#allocation8 + $0x20c] sm:$0xf]  ;;  %v4267_v6 = vld [vmem:[#allocation11 + $0x12c] sm:$0xf0] }
  0xed   :  { %v2963_v38 = vor.u32 %v4110_v30, %v2960_v31  ;;  %v4198_v18 = vld [vmem:[#allocation8 + $0x30c] sm:$0xf]  ;;  %v3494_v31 = vld [vmem:[#allocation11 + $0x80] sm:$0xf]  ;;  %v3640_v42 = vld [vmem:[#allocation11 + $0x1b0] sm:$0xf0] }
  0xee   :  { %1340 = vmatpush.bf16.msrb.mxu2 %v3199_v37  ;;  %1314 = vmatmul.bf16.vlgmr.msrb.gmra.mxu0 %v4691_v57  ;;  %v3232_v37 = vld [vmem:[#allocation8 + $0x278] sm:$0xf0]  ;;  %v3766_v7 = vld [vmem:[#allocation11 + $0x2a0] sm:$0xf] }
  0xef   :  { %1362 = vmatpush.bf16.msra.mxu0 %v3043_v34  ;;  %1354 = vmatpush.bf16.msrb.mxu3 %v3327_v41  ;;  %v3251_v34 = vor.u32 %v4182_v23, %v3248_v24  ;;  %v3360_v41 = vld [vmem:[#allocation8 + $0x378] sm:$0xf0]  ;;  %v3235_v46 = vor.u32 %v4178_v36, %v3232_v37  ;;  %v3187_v23 = vor.u32 %v4166_v16, %v3184_v17  ;;  %v3510_v24 = vld [vmem:[#allocation11 + $0xa0] sm:$0xf]  ;;  %v4243_v37 = vld [vmem:[#allocation11 + $0x6c] sm:$0xf0] }
  0xf0   :  { %1376 = vmatpush.bf16.msra.mxu1 %v3171_v35  ;;  %v3379_v35 = vor.u32 %v4214_v28, %v3376_v29  ;;  %v3363_v47 = vor.u32 %v4210_v40, %v3360_v41  ;;  %v3638_v28 = vld [vmem:[#allocation11 + $0x1a0] sm:$0xf]  ;;  %v4283_v29 = vld [vmem:[#allocation11 + $0x1ac] sm:$0xf0]  ;;  %v3495_v36 = vor.u32 %v4247_v32, %v3494_v31  ;;  %v4237_v31 = vld [vmem:[#allocation11 + $0x44] sm:$0xf] }
  0xf1   :  { %1328 = vmatmul.bf16.vlgmr.msrb.gmra.mxu1 %v4693_v62  ;;  %v3639_v33 = vor.u32 %v4283_v29, %v3638_v28  ;;  %v4239_v40 = vld [vmem:[#allocation11 + $0x4c] sm:$0xf0]  ;;  %v3750_v16 = vld [vmem:[#allocation11 + $0x280] sm:$0xf]  ;;  %v3464_v32 = vld [vmem:[#allocation11 + $0x50] sm:$0xf0] }
  0xf2   :  { %1341 = vmatpush.bf16.msrb.mxu2 %v3183_v53  ;;  %v3344_v53 = vld [vmem:[#allocation8 + $0x358] sm:$0xf0]  ;;  %v3734_v28 = vld [vmem:[#allocation11 + $0x260] sm:$0xf]  ;;  %v4307_v29 = vld [vmem:[#allocation11 + $0x26c] sm:$0xf0] }
  0xf3   :  { %1363 = vmatpush.bf16.msra.mxu0 %v3027_v48  ;;  %1355 = vmatpush.bf16.msrb.mxu3 %v3311_v58  ;;  %v4174_v48 = vld [vmem:[#allocation8 + $0x24c] sm:$0xf]  ;;  %v3056_v58 = vld [vmem:[#allocation8 + $0x118] sm:$0xf0] }
  0xf4   :  { %1377 = vmatpush.bf16.msra.mxu1 %v3155_v49  ;;  %v3216_v49 = vld [vmem:[#allocation8 + $0x258] sm:$0xf0]  ;;  %v3059_v5 = vor.u32 %v4134_v56, %v3056_v58  ;;  %v3531_v58 = vor.u32 %v4253_v54, %v3528_v55 }
  0xf5   :  { %1342 = vmatmul.bf16.vlgmr.msrb.gmra.mxu2 %v4697_v21 }
  0xf6   :  { %1390 = vmatpush.bf16.msra.mxu2 %v3299_v59  ;;  %1356 = vmatmul.bf16.vlgmr.msrb.gmra.mxu3 %v4699_v27  ;;  %v3542_v59 = vld [vmem:[#allocation11 + $0xe0] sm:$0xf] }
  0xf7   :  { %1404 = vmatpush.bf16.msra.mxu3 %v3427_v60  ;;  %1364 = vmatpush.bf16.msra.mxu0 %v3011_v0  ;;  %v3219_v60 = vor.u32 %v4174_v48, %v3216_v49  ;;  %v4291_v0 = vld [vmem:[#allocation11 + $0x1ec] sm:$0xf0]  ;;  %v3606_v49 = vld [vmem:[#allocation11 + $0x160] sm:$0xf] }
  0xf8   :  { %1378 = vmatpush.bf16.msra.mxu1 %v3139_v1  ;;  %v3347_v1 = vor.u32 %v4206_v50, %v3344_v53  ;;  %v3671_v10 = vor.u32 %v4291_v0, %v3670_v63  ;;  %v4275_v50 = vld [vmem:[#allocation11 + $0x16c] sm:$0xf0] }
  0xf9   :  { %v4323_v53 = vld [vmem:[#allocation11 + $0x2ec] sm:$0xf0] }
  0xfa   :  { %1391 = vmatpush.bf16.msra.mxu2 %v3283_v8  ;;  %v3543_v8 = vor.u32 %v4259_v61, %v3542_v59  ;;  %v3590_v59 = vld [vmem:[#allocation11 + $0x140] sm:$0xf]  ;;  %v4319_v0 = vld [vmem:[#allocation11 + $0x2cc] sm:$0xf0] }
  0xfb   :  { %1405 = vmatpush.bf16.msra.mxu3 %v3411_v9  ;;  %1365 = vmatpush.bf16.msra.mxu0 %v2995_v12  ;;  %v3526_v9 = vld [vmem:[#allocation11 + $0xc0] sm:$0xf]  ;;  %v4255_v12 = vld [vmem:[#allocation11 + $0xcc] sm:$0xf0] }
  0xfc   :  { %1379 = vmatpush.bf16.msra.mxu1 %v3123_v13  ;;  %v3654_v13 = vld [vmem:[#allocation11 + $0x1c0] sm:$0xf] }
  0xfd   :  { %v3782_v61 = vld [vmem:[#allocation11 + $0x2c0] sm:$0xf] }
  0xfe   :  { %1392 = vmatpush.bf16.msra.mxu2 %v3267_v20  ;;  %v3527_v20 = vor.u32 %v4255_v12, %v3526_v9  ;;  %v4315_v9 = vld [vmem:[#allocation11 + $0x2ac] sm:$0xf0] }
  0xff   :  { %1406 = vmatpush.bf16.msra.mxu3 %v3395_v22  ;;  %1366 = vmatpush.bf16.msra.mxu0 %v2979_v25  ;;  %v3655_v22 = vor.u32 %v4287_v14, %v3654_v13  ;;  %v4251_v25 = vld [vmem:[#allocation11 + $0xac] sm:$0xf0]  ;;  %v3767_v12 = vor.u32 %v4315_v9, %v3766_v7  ;;  %v3558_v14 = vld [vmem:[#allocation11 + $0x100] sm:$0xf]  ;;  %v4269_v7 = vld [vmem:[#allocation11 + $0x144] sm:$0xf] }
 0x100   :  { %1380 = vmatpush.bf16.msra.mxu1 %v3107_v26  ;;  %v3315_v26 = vor.u32 %v4198_v18, %v3312_v19  ;;  %v3511_v30 = vor.u32 %v4251_v25, %v3510_v24  ;;  %v4311_v18 = vld [vmem:[#allocation11 + $0x28c] sm:$0xf0]  ;;  %v4241_v19 = vld [vmem:[#allocation11 + $0x64] sm:$0xf]  ;;  %v3672_v25 = vld [vmem:[#allocation11 + $0x1f0] sm:$0xf0] }
 0x101   :  { %v4289_v24 = vld [vmem:[#allocation11 + $0x1e4] sm:$0xf] }
 0x102   :  { %1393 = vmatpush.bf16.msra.mxu2 %v3251_v34  ;;  %v3622_v34 = vld [vmem:[#allocation11 + $0x180] sm:$0xf]  ;;  %v4317_v9 = vld [vmem:[#allocation11 + $0x2c4] sm:$0xf] }
 0x103   :  { %1407 = vmatpush.bf16.msra.mxu3 %v3379_v35  ;;  %1367 = vmatpush.bf16.msra.mxu0 %v2963_v38  ;;  %v4279_v35 = vld [vmem:[#allocation11 + $0x18c] sm:$0xf0] }
 0x104   :  { %1381 = vmatpush.bf16.msra.mxu1 %v3091_v39  ;;  %v3462_v39 = vld [vmem:[#allocation11 + $0x40] sm:$0xf] }
 0x105   :  { %v3463_v41 = vor.u32 %v4239_v40, %v3462_v39  ;;  %v3448_v39 = vld [vmem:[#allocation11 + $0x30] sm:$0xf0]  ;;  %v4281_v40 = vld [vmem:[#allocation11 + $0x1a4] sm:$0xf] }
 0x106   :  { %1394 = vmatpush.bf16.msra.mxu2 %v3235_v46  ;;  %v3643_v43 = vor.u32 %v4281_v40, %v3640_v42 }
 0x107   :  { %1408 = vmatpush.bf16.msra.mxu3 %v3363_v47  ;;  %1368 = vmatpush.bf16.msra.mxu0 %v2947_v51  ;;  %v3544_v47 = vld [vmem:[#allocation11 + $0xf0] sm:$0xf0]  ;;  %v3798_v51 = vld [vmem:[#allocation11 + $0x2e0] sm:$0xf] }
 0x108   :  { %1382 = vmatpush.bf16.msra.mxu1 %v3075_v52  ;;  %v3607_v52 = vor.u32 %v4275_v50, %v3606_v49  ;;  %v3799_v56 = vor.u32 %v4323_v53, %v3798_v51  ;;  %v3624_v49 = vld [vmem:[#allocation11 + $0x190] sm:$0xf0]  ;;  %v3686_v51 = vld [vmem:[#allocation11 + $0x200] sm:$0xf] }
 0x109   :  { %v3926_v53 = vld [vmem:[#allocation11 + $0x3e0] sm:$0xf] }
 0x10a   :  { %1395 = vmatpush.bf16.msra.mxu2 %v3219_v60  ;;  %v4271_v60 = vld [vmem:[#allocation11 + $0x14c] sm:$0xf0] }
 0x10b   :  { %1409 = vmatpush.bf16.msra.mxu3 %v3347_v1  ;;  %1369 = vmatpush.bf16.msra.mxu0 %v2931_v4  ;;  %v3591_v63 = vor.u32 %v4271_v60, %v3590_v59  ;;  %v3783_v1 = vor.u32 %v4319_v0, %v3782_v61  ;;  %v3515_v4 = vor.u32 %v4249_v2, %v3512_v3  ;;  %v3608_v59 = vld [vmem:[#allocation11 + $0x170] sm:$0xf0]  ;;  %v4715_v3 = vld [vmem:[#allocation10] sm:$0xf] }
 0x10c   :  { %1383 = vmatpush.bf16.msra.mxu1 %v3059_v5  ;;  %v3574_v5 = vld [vmem:[#allocation11 + $0x120] sm:$0xf]  ;;  %v3800_v0 = vld [vmem:[#allocation11 + $0x2f0] sm:$0xf0] }
 0x10e   :  { %1396 = vmatpush.bf16.msra.mxu2 %v3203_v11  ;;  %1370 = vmatmul.bf16.vlgmr.msra.gmra.mxu0 %v4691_v57  ;;  %v3478_v57 = vld [vmem:[#allocation11 + $0x60] sm:$0xf]  ;;  %v3496_v11 = vld [vmem:[#allocation11 + $0x90] sm:$0xf0] }
 0x10f   :  { %2208 = vmatpush.bf16.msrb.mxu0 %v3543_v8  ;;  %1410 = vmatpush.bf16.msra.mxu3 %v3331_v15  ;;  %v3479_v38 = vor.u32 %v4243_v37, %v3478_v57  ;;  %v3575_v8 = vor.u32 %v4267_v6, %v3574_v5  ;;  %v4263_v15 = vld [vmem:[#allocation11 + $0x10c] sm:$0xf0]  ;;  %v3718_v57 = vld [vmem:[#allocation11 + $0x240] sm:$0xf] }
 0x110   :  { %2222 = vmatpush.bf16.msrb.mxu1 %v3671_v10  ;;  %v4245_v10 = vld [vmem:[#allocation11 + $0x84] sm:$0xf]  ;;  %v3559_v17 = vor.u32 %v4263_v15, %v3558_v14  ;;  %v4303_v37 = vld [vmem:[#allocation11 + $0x24c] sm:$0xf0]  ;;  %v3894_v14 = vld [vmem:[#allocation11 + $0x3a0] sm:$0xf] }
 0x111   :  { %1384 = vmatmul.bf16.vlgmr.msra.gmra.mxu1 %v4693_v62  ;;  %v3623_v62 = vor.u32 %v4279_v35, %v3622_v34  ;;  %v3499_v13 = vor.u32 %v4245_v10, %v3496_v11  ;;  %v3467_v34 = vor.u32 %v4237_v31, %v3464_v32  ;;  %v3656_v35 = vld [vmem:[#allocation11 + $0x1d0] sm:$0xf0]  ;;  %v4351_v5 = vld [vmem:[#allocation11 + $0x3cc] sm:$0xf0]  ;;  %v4261_v31 = vld [vmem:[#allocation11 + $0x104] sm:$0xf] }
 0x112   :  { %1397 = vmatpush.bf16.msra.mxu2 %v3187_v23  ;;  %v3784_v11 = vld [vmem:[#allocation11 + $0x2d0] sm:$0xf0]  ;;  %v4347_v15 = vld [vmem:[#allocation11 + $0x3ac] sm:$0xf0] }
 0x113   :  { %2209 = vmatpush.bf16.msrb.mxu0 %v3527_v20  ;;  %1411 = vmatpush.bf16.msra.mxu3 %v3315_v26  ;;  %v3480_v20 = vld [vmem:[#allocation11 + $0x70] sm:$0xf0]  ;;  %v3675_v26 = vor.u32 %v4289_v24, %v3672_v25  ;;  %v3878_v25 = vld [vmem:[#allocation11 + $0x380] sm:$0xf] }
 0x114   :  { %2223 = vmatpush.bf16.msrb.mxu1 %v3655_v22  ;;  %v3751_v22 = vor.u32 %v4311_v18, %v3750_v16  ;;  %v3483_v23 = vor.u32 %v4241_v19, %v3480_v20  ;;  %v4265_v18 = vld [vmem:[#allocation11 + $0x124] sm:$0xf]  ;;  %v3576_v19 = vld [vmem:[#allocation11 + $0x130] sm:$0xf0] }
 0x115   :  { %1398 = vmatmul.bf16.vlgmr.msra.gmra.mxu2 %v4697_v21  ;;  %v3430_v21 = vld [vmem:[#allocation11] sm:$0xf]  ;;  %v4313_v20 = vld [vmem:[#allocation11 + $0x2a4] sm:$0xf]  ;;  %v3560_v32 = vld [vmem:[#allocation11 + $0x110] sm:$0xf0] }
 0x116   :  { %1412 = vmatmul.bf16.vlgmr.msra.gmra.mxu3 %v4699_v27  ;;  %v3431_v46 = vor.u32 %v4231_v45, %v3430_v21  ;;  %v4257_v27 = vld [vmem:[#allocation11 + $0xe4] sm:$0xf]  ;;  %2236 = vmatpush.bf16.msrb.mxu2 %v3799_v56  ;;  %v4299_v21 = vld [vmem:[#allocation11 + $0x22c] sm:$0xf0] }
 0x117   :  { %2210 = vmatpush.bf16.msrb.mxu0 %v3511_v30  ;;  %v3547_v48 = vor.u32 %v4257_v27, %v3544_v47  ;;  %v3735_v30 = vor.u32 %v4307_v29, %v3734_v28  ;;  %v3432_v27 = vld [vmem:[#allocation11 + $0x10] sm:$0xf0]  ;;  %v4277_v47 = vld [vmem:[#allocation11 + $0x184] sm:$0xf]  ;;  %v4355_v56 = vld [vmem:[#allocation11 + $0x3ec] sm:$0xf0] }
 0x118   :  { %2224 = vmatpush.bf16.msrb.mxu1 %v3639_v33  ;;  %v4285_v33 = vld [vmem:[#allocation11 + $0x1c4] sm:$0xf]  ;;  %v3627_v50 = vor.u32 %v4277_v47, %v3624_v49  ;;  %v3927_v60 = vor.u32 %v4355_v56, %v3926_v53 }
 0x119   :  { %v4301_v49 = vld [vmem:[#allocation11 + $0x244] sm:$0xf] }
 0x11a   :  { %2237 = vmatpush.bf16.msrb.mxu2 %v3783_v1  ;;  %2250 = vmatpush.bf16.msrb.mxu3 %v3927_v60  ;;  %v3830_v60 = vld [vmem:[#allocation11 + $0x320] sm:$0xf] }
 0x11b   :  { %2211 = vmatpush.bf16.msrb.mxu0 %v3495_v36  ;;  %v3659_v36 = vor.u32 %v4285_v33, %v3656_v35  ;;  %v4309_v33 = vld [vmem:[#allocation11 + $0x284] sm:$0xf]  ;;  %v3563_v35 = vor.u32 %v4261_v31, %v3560_v32  ;;  %v4252_v32 = vld [vmem:[#allocation11 + $0xb4] sm:$0xf0] }
 0x11c   :  { %2225 = vmatpush.bf16.msrb.mxu1 %v3623_v62  ;;  %v3719_v62 = vor.u32 %v4303_v37, %v3718_v57 }
 0x11e   :  { %2238 = vmatpush.bf16.msrb.mxu2 %v3767_v12  ;;  %v3787_v12 = vor.u32 %v4317_v9, %v3784_v11  ;;  %v3534_v9 = vld [vmem:[#allocation11 + $0xc8] sm:$0xf]  ;;  %v4256_v11 = vld [vmem:[#allocation11 + $0xd4] sm:$0xf0] }
 0x11f   :  { %2212 = vmatpush.bf16.msrb.mxu0 %v3479_v38  ;;  %v4233_v38 = vld [vmem:[#allocation11 + $0x24] sm:$0xf] }
 0x120   :  { %2226 = vmatpush.bf16.msrb.mxu1 %v3607_v52  ;;  %v4295_v52 = vld [vmem:[#allocation11 + $0x20c] sm:$0xf0] }
 0x121   :  { %v3687_v55 = vor.u32 %v4295_v52, %v3686_v51 }
 0x122   :  { %2239 = vmatpush.bf16.msrb.mxu2 %v3751_v22  ;;  %v3579_v22 = vor.u32 %v4265_v18, %v3576_v19  ;;  %v3688_v18 = vld [vmem:[#allocation11 + $0x210] sm:$0xf0]  ;;  %v4353_v19 = vld [vmem:[#allocation11 + $0x3e4] sm:$0xf] }
 0x123   :  { %2213 = vmatpush.bf16.msrb.mxu0 %v3463_v41  ;;  %v3451_v41 = vor.u32 %v4233_v38, %v3448_v39  ;;  %v4339_v38 = vld [vmem:[#allocation11 + $0x36c] sm:$0xf0] }
 0x124   :  { %2227 = vmatpush.bf16.msrb.mxu1 %v3591_v63  ;;  %v4321_v63 = vld [vmem:[#allocation11 + $0x2e4] sm:$0xf] }
 0x125   :  { %v3803_v2 = vor.u32 %v4321_v63, %v3800_v0  ;;  %v4260_v0 = vld [vmem:[#allocation11 + $0xf4] sm:$0xf0] }
 0x126   :  { %2240 = vmatpush.bf16.msrb.mxu2 %v3735_v30 }
 0x127   :  { %2214 = vmatpush.bf16.msrb.mxu0 %v3447_v44  ;;  %v3702_v44 = vld [vmem:[#allocation11 + $0x220] sm:$0xf] }
 0x128   :  { %2228 = vmatpush.bf16.msrb.mxu1 %v3575_v8  ;;  %v3703_v45 = vor.u32 %v4299_v21, %v3702_v44  ;;  %v3592_v8 = vld [vmem:[#allocation11 + $0x150] sm:$0xf0] }
 0x129   :  { %v3595_v10 = vor.u32 %v4269_v7, %v3592_v8  ;;  %v3736_v44 = vld [vmem:[#allocation11 + $0x270] sm:$0xf0] }
 0x12a   :  { %2241 = vmatpush.bf16.msrb.mxu2 %v3719_v62  ;;  %v3862_v62 = vld [vmem:[#allocation11 + $0x360] sm:$0xf] }
 0x12b   :  { %2215 = vmatpush.bf16.msrb.mxu0 %v3431_v46  ;;  %v4229_v46 = vld [vmem:[#allocation11 + $0x4] sm:$0xf]  ;;  %v3863_v42 = vor.u32 %v4339_v38, %v3862_v62  ;;  %v3502_v62 = vld [vmem:[#allocation11 + $0x88] sm:$0xf] }
 0x12c   :  { %2229 = vmatpush.bf16.msrb.mxu1 %v3559_v17  ;;  %v3895_v17 = vor.u32 %v4347_v15, %v3894_v14 }
 0x12e   :  { %2242 = vmatpush.bf16.msrb.mxu2 %v3703_v45 }
 0x12f   :  { %2264 = vmatpush.bf16.msra.mxu0 %v3547_v48  ;;  %v3435_v48 = vor.u32 %v4229_v46, %v3432_v27  ;;  %v3846_v46 = vld [vmem:[#allocation11 + $0x340] sm:$0xf]  ;;  %v4335_v27 = vld [vmem:[#allocation11 + $0x34c] sm:$0xf0] }
 0x130   :  { %2278 = vmatpush.bf16.msra.mxu1 %v3675_v26  ;;  %v4343_v26 = vld [vmem:[#allocation11 + $0x38c] sm:$0xf0] }
 0x131   :  { %v3879_v30 = vor.u32 %v4343_v26, %v3878_v25  ;;  %v3535_v26 = vor.u32 %v4256_v11, %v3534_v9 }
 0x132   :  { %2243 = vmatpush.bf16.msrb.mxu2 %v3687_v55 }
 0x133   :  { %2265 = vmatpush.bf16.msra.mxu0 %v3531_v58  ;;  %v4273_v58 = vld [vmem:[#allocation11 + $0x164] sm:$0xf] }
 0x134   :  { %2279 = vmatpush.bf16.msra.mxu1 %v3659_v36  ;;  %v3611_v61 = vor.u32 %v4273_v58, %v3608_v59  ;;  %v3752_v36 = vld [vmem:[#allocation11 + $0x290] sm:$0xf0]  ;;  %v3550_v59 = vld [vmem:[#allocation11 + $0xe8] sm:$0xf] }
 0x135   :  { %v3755_v37 = vor.u32 %v4309_v33, %v3752_v36  ;;  %v4349_v33 = vld [vmem:[#allocation11 + $0x3c4] sm:$0xf] }
 0x136   :  { %2292 = vmatpush.bf16.msra.mxu2 %v3803_v2  ;;  %v4297_v2 = vld [vmem:[#allocation11 + $0x224] sm:$0xf] }
 0x137   :  { %2266 = vmatpush.bf16.msra.mxu0 %v3515_v4  ;;  %v3910_v4 = vld [vmem:[#allocation11 + $0x3c0] sm:$0xf] }
 0x138   :  { %2280 = vmatpush.bf16.msra.mxu1 %v3643_v43  ;;  %v3911_v6 = vor.u32 %v4351_v5, %v3910_v4  ;;  %v4305_v43 = vld [vmem:[#allocation11 + $0x264] sm:$0xf]  ;;  %v3704_v4 = vld [vmem:[#allocation11 + $0x230] sm:$0xf0] }
 0x139   :  { %v3739_v21 = vor.u32 %v4305_v43, %v3736_v44 }
 0x13a   :  { %2251 = vmatpush.bf16.msrb.mxu3 %v3911_v6  ;;  %2293 = vmatpush.bf16.msra.mxu2 %v3787_v12  ;;  %v3707_v6 = vor.u32 %v4297_v2, %v3704_v4  ;;  %v3814_v12 = vld [vmem:[#allocation11 + $0x300] sm:$0xf]  ;;  %v4288_v2 = vld [vmem:[#allocation11 + $0x1d4] sm:$0xf0]  ;;  %v4337_v4 = vld [vmem:[#allocation11 + $0x364] sm:$0xf] }
 0x13b   :  { %2267 = vmatpush.bf16.msra.mxu0 %v3499_v13  ;;  %v546_v13 = vperm.slane %v4715_v3, 0 }
 0x13c   :  { %2281 = vmatpush.bf16.msra.mxu1 %v3627_v50  ;;  %v3720_v50 = vld [vmem:[#allocation11 + $0x250] sm:$0xf0] }
 0x13d   :  { %v3723_v52 = vor.u32 %v4301_v49, %v3720_v50  ;;  %v4292_v50 = vld [vmem:[#allocation11 + $0x1f4] sm:$0xf0] }
 0x13e   :  { %2252 = vmatpush.bf16.msrb.mxu3 %v3895_v17  ;;  %v4293_v17 = vld [vmem:[#allocation11 + $0x204] sm:$0xf] }
 0x13f   :  { %2268 = vmatpush.bf16.msra.mxu0 %v3483_v23  ;;  %v3768_v23 = vld [vmem:[#allocation11 + $0x2b0] sm:$0xf0] }
 0x140   :  { %2282 = vmatpush.bf16.msra.mxu1 %v3611_v61  ;;  %v3771_v24 = vor.u32 %v4313_v20, %v3768_v23  ;;  %v4331_v61 = vld [vmem:[#allocation11 + $0x32c] sm:$0xf0]  ;;  %v3928_v23 = vld [vmem:[#allocation11 + $0x3f0] sm:$0xf0] }
 0x141   :  { %v3931_v25 = vor.u32 %v4353_v19, %v3928_v23  ;;  %v3848_v19 = vld [vmem:[#allocation11 + $0x350] sm:$0xf0] }
 0x142   :  { %2294 = vmatpush.bf16.msra.mxu2 %v3771_v24  ;;  %2253 = vmatpush.bf16.msrb.mxu3 %v3879_v30 }
 0x143   :  { %2269 = vmatpush.bf16.msra.mxu0 %v3467_v34 }
 0x144   :  { %2283 = vmatpush.bf16.msra.mxu1 %v3595_v10  ;;  %v3551_v10 = vor.u32 %v4260_v0, %v3550_v59  ;;  %v3662_v0 = vld [vmem:[#allocation11 + $0x1c8] sm:$0xf] }
 0x146   :  { %2295 = vmatpush.bf16.msra.mxu2 %v3755_v37  ;;  %2254 = vmatpush.bf16.msrb.mxu3 %v3863_v42 }
 0x147   :  { %2270 = vmatpush.bf16.msra.mxu0 %v3451_v41 }
 0x148   :  { %2284 = vmatpush.bf16.msra.mxu1 %v3579_v22  ;;  %v3691_v22 = vor.u32 %v4293_v17, %v3688_v18  ;;  %v4284_v17 = vld [vmem:[#allocation11 + $0x1b4] sm:$0xf0]  ;;  %v4333_v18 = vld [vmem:[#allocation11 + $0x344] sm:$0xf] }
 0x149   :  { %v3851_v23 = vor.u32 %v4333_v18, %v3848_v19  ;;  %v3566_v19 = vld [vmem:[#allocation11 + $0x108] sm:$0xf] }
 0x14a   :  { %v1203_v54 = vpop.f32.mrf.mxu0  ;;  %2296 = vmatpush.bf16.msra.mxu2 %v3739_v21 }
 0x14b   :  { %2271 = vmatpush.bf16.msra.mxu0 %v3435_v48  ;;  %v1217_v1 = vpop.f32.mrf.mxu1  ;;  %v1204_v28 = vadd.f32 %v1203_v54, %v546_v13  ;;  %v3847_v48 = vor.u32 %v4335_v27, %v3846_v46  ;;  %v547_v54 = vperm.slane %v4715_v3, 1  ;;  %v3486_v27 = vld [vmem:[#allocation11 + $0x68] sm:$0xf] }
 0x14c   :  { %2285 = vmatpush.bf16.msra.mxu1 %v3563_v35 }
 0x14d   :  { %v1218_v39 = vadd.f32 %v1217_v1, %v1204_v28  ;;  %2255 = vmatpush.bf16.msrb.mxu3 %v3847_v48  ;;  %v3831_v1 = vor.u32 %v4331_v61, %v3830_v60  ;;  %v3518_v28 = vld [vmem:[#allocation11 + $0xa8] sm:$0xf] }
 0x14e   :  { %2297 = vmatpush.bf16.msra.mxu2 %v3723_v52  ;;  %v3519_v37 = vor.u32 %v4252_v32, %v3518_v28  ;;  %v3678_v48 = vld [vmem:[#allocation11 + $0x1e8] sm:$0xf]  ;;  %v3880_v52 = vld [vmem:[#allocation11 + $0x390] sm:$0xf0]  ;;  %v4280_v32 = vld [vmem:[#allocation11 + $0x194] sm:$0xf0] }
 0x14f   :  { %v3679_v60 = vor.u32 %v4292_v50, %v3678_v48  ;;  %v3470_v61 = vld [vmem:[#allocation11 + $0x48] sm:$0xf]  ;;  %v4324_v48 = vld [vmem:[#allocation11 + $0x2f4] sm:$0xf0]  ;;  %v3536_v50 = vld [vmem:[#allocation11 + $0xd8] sm:$0xf0] }
 0x150   :  { %v3438_v28 = vld [vmem:[#allocation11 + $0x8] sm:$0xf] }
 0x151   :  { %2256 = vmatpush.bf16.msrb.mxu3 %v3831_v1 }
 0x152   :  { %v1205_v16 = vpop.f32.mrf.mxu0  ;;  %2298 = vmatpush.bf16.msra.mxu2 %v3707_v6 }
 0x153   :  { %v1219_v29 = vpop.f32.mrf.mxu1  ;;  %v1206_v40 = vadd.f32 %v1205_v16, %v546_v13  ;;  %v4327_v13 = vld [vmem:[#allocation11 + $0x30c] sm:$0xf0] }
 0x154   :  { %v3815_v16 = vor.u32 %v4327_v13, %v3814_v12  ;;  %v3663_v12 = vor.u32 %v4288_v2, %v3662_v0  ;;  %v3454_v13 = vld [vmem:[#allocation11 + $0x28] sm:$0xf]  ;;  %v4250_v0 = vld [vmem:[#allocation11 + $0xac] sm:$0xf]  ;;  %v3520_v2 = vld [vmem:[#allocation11 + $0xb8] sm:$0xf0] }
 0x155   :  { %v1220_v47 = vadd.f32 %v1219_v29, %v1206_v40  ;;  %v4345_v40 = vld [vmem:[#allocation11 + $0x3a4] sm:$0xf] }
 0x156   :  { %2257 = vmatpush.bf16.msrb.mxu3 %v3815_v16  ;;  %2299 = vmatpush.bf16.msra.mxu2 %v3691_v22  ;;  %v3646_v16 = vld [vmem:[#allocation11 + $0x1a8] sm:$0xf] }
 0x158   :  { %v1231_v34 = vpop.f32.mrf.mxu2 }
 0x159   :  { %v1245_v57 = vpop.f32.mrf.mxu3  ;;  %v1232_v45 = vadd.f32 %v1231_v34, %v1218_v39  ;;  %v3912_v34 = vld [vmem:[#allocation11 + $0x3d0] sm:$0xf0]  ;;  %v4248_v39 = vld [vmem:[#allocation11 + $0x94] sm:$0xf0] }
 0x15a   :  { %v1259_v41 = vpop.f32.mrf.mxu0  ;;  %2306 = vmatpush.bf16.msra.mxu3 %v3931_v25  ;;  %v3915_v35 = vor.u32 %v4349_v33, %v3912_v34  ;;  %v3503_v46 = vor.u32 %v4248_v39, %v3502_v62  ;;  %v4329_v33 = vld [vmem:[#allocation11 + $0x324] sm:$0xf]  ;;  %v3832_v34 = vld [vmem:[#allocation11 + $0x330] sm:$0xf0] }
 0x15b   :  { %v1246_v53 = vadd.f32 %v1245_v57, %v1232_v45  ;;  %v1273_v55 = vpop.f32.mrf.mxu1  ;;  %v1260_v14 = vadd.f32 %v1259_v41, %v547_v54  ;;  %v3896_v41 = vld [vmem:[#allocation11 + $0x3b0] sm:$0xf0] }
 0x15c   :  { %v3899_v43 = vor.u32 %v4345_v40, %v3896_v41 }
 0x15d   :  { %v1418_v7 = vmax.f32 %v1246_v53, 0.0  ;;  %v1274_v29 = vadd.f32 %v1273_v55, %v1260_v14  ;;  %v548_v53 = vperm.slane %v4715_v3, 2  ;;  %v4236_v14 = vld [vmem:[#allocation11 + $0x34] sm:$0xf0] }
 0x15e   :  { %2307 = vmatpush.bf16.msra.mxu3 %v3915_v35  ;;  %v3455_v25 = vor.u32 %v4236_v14, %v3454_v13  ;;  %v3504_v13 = vld [vmem:[#allocation11 + $0x98] sm:$0xf0]  ;;  %v549_v14 = vperm.slane %v4715_v3, 3 }
 0x160   :  { %v1233_v51 = vpop.f32.mrf.mxu2 }
 0x161   :  { %v1234_v56 = vadd.f32 %v1233_v51, %v1220_v47  ;;  %v1247_v58 = vpop.f32.mrf.mxu3  ;;  %v4244_v47 = vld [vmem:[#allocation11 + $0x74] sm:$0xf0]  ;;  %v4341_v51 = vld [vmem:[#allocation11 + $0x384] sm:$0xf] }
 0x162   :  { %v1261_v5 = vpop.f32.mrf.mxu0  ;;  %2308 = vmatpush.bf16.msra.mxu3 %v3899_v43  ;;  %v3487_v59 = vor.u32 %v4244_v47, %v3486_v27  ;;  %v4276_v43 = vld [vmem:[#allocation11 + $0x174] sm:$0xf0]  ;;  %v3816_v27 = vld [vmem:[#allocation11 + $0x310] sm:$0xf0] }
 0x163   :  { %v1248_v63 = vadd.f32 %v1247_v58, %v1234_v56  ;;  %v1262_v30 = vadd.f32 %v1261_v5, %v547_v54  ;;  %v1275_v31 = vpop.f32.mrf.mxu1  ;;  %v3883_v54 = vor.u32 %v4341_v51, %v3880_v52  ;;  %v3864_v5 = vld [vmem:[#allocation11 + $0x370] sm:$0xf0] }
 0x165   :  { %v1422_v8 = vmax.f32 %v1248_v63, 0.0  ;;  %v1276_v38 = vadd.f32 %v1275_v31, %v1262_v30  ;;  %v4240_v63 = vld [vmem:[#allocation11 + $0x54] sm:$0xf0]  ;;  %v3630_v30 = vld [vmem:[#allocation11 + $0x188] sm:$0xf] }
 0x166   :  { %2309 = vmatpush.bf16.msra.mxu3 %v3883_v54  ;;  %v3471_v11 = vor.u32 %v4240_v63, %v3470_v61  ;;  %v3631_v41 = vor.u32 %v4280_v32, %v3630_v30  ;;  %v4320_v63 = vld [vmem:[#allocation11 + $0x2d4] sm:$0xf0]  ;;  %v3742_v32 = vld [vmem:[#allocation11 + $0x268] sm:$0xf] }
 0x167   :  { %v4719_v15 = vpack.c.bf16 %v1422_v8, %v1418_v7  ;;  %v3867_v8 = vor.u32 %v4337_v4, %v3864_v5 }
 0x168   :  { %v1287_v20 = vpop.f32.mrf.mxu2 }
 0x169   :  { %v1301_v24 = vpop.f32.mrf.mxu3  ;;  %2216 = vmatmul.bf16.vlgmr.msrb.gmra.mxu0 %v4719_v15  ;;  %v1288_v36 = vadd.f32 %v1287_v20, %v1274_v29  ;;  %v4232_v29 = vld [vmem:[#allocation11 + $0x14] sm:$0xf0] }
 0x16a   :  { %2320 = vmatpush.bf16.msrb.mxu0 %v3551_v10  ;;  %2310 = vmatpush.bf16.msra.mxu3 %v3867_v8  ;;  %v3582_v8 = vld [vmem:[#allocation11 + $0x128] sm:$0xf] }
 0x16b   :  { %v1315_v57 = vpop.f32.mrf.mxu0  ;;  %v1302_v44 = vadd.f32 %v1301_v24, %v1288_v36  ;;  %v4258_v36 = vld [vmem:[#allocation11 + $0xec] sm:$0xf] }
 0x16c   :  { %v1316_v6 = vadd.f32 %v1315_v57, %v548_v53  ;;  %v3552_v57 = vld [vmem:[#allocation11 + $0xf8] sm:$0xf0] }
 0x16d   :  { %v1419_v55 = vmax.f32 %v1302_v44, 0.0 }
 0x16e   :  { %2321 = vmatpush.bf16.msrb.mxu0 %v3535_v26  ;;  %v1329_v56 = vpop.f32.mrf.mxu1  ;;  %v3647_v26 = vor.u32 %v4284_v17, %v3646_v16  ;;  %2311 = vmatpush.bf16.msra.mxu3 %v3851_v23  ;;  %v4312_v23 = vld [vmem:[#allocation11 + $0x294] sm:$0xf0] }
 0x16f   :  { %v1330_v20 = vadd.f32 %v1329_v56, %v1316_v6 }
 0x170   :  { %v1289_v42 = vpop.f32.mrf.mxu2 }
 0x171   :  { %v1290_v21 = vadd.f32 %v1289_v42, %v1276_v38  ;;  %v1303_v45 = vpop.f32.mrf.mxu3  ;;  %v3439_v38 = vor.u32 %v4232_v29, %v3438_v28  ;;  %v3614_v42 = vld [vmem:[#allocation11 + $0x168] sm:$0xf]  ;;  %v4290_v28 = vld [vmem:[#allocation11 + $0x1ec] sm:$0xf]  ;;  %v3680_v29 = vld [vmem:[#allocation11 + $0x1f8] sm:$0xf0] }
 0x172   :  { %2322 = vmatpush.bf16.msrb.mxu0 %v3519_v37  ;;  %v3835_v37 = vor.u32 %v4329_v33, %v3832_v34  ;;  %v3615_v54 = vor.u32 %v4276_v43, %v3614_v42  ;;  %v3683_v34 = vor.u32 %v4290_v28, %v3680_v29  ;;  %v3726_v43 = vld [vmem:[#allocation11 + $0x248] sm:$0xf] }
 0x173   :  { %v1304_v49 = vadd.f32 %v1303_v45, %v1290_v21  ;;  %v1317_v7 = vpop.f32.mrf.mxu0  ;;  %v3555_v21 = vor.u32 %v4258_v36, %v3552_v57  ;;  %v3806_v45 = vld [vmem:[#allocation11 + $0x2e8] sm:$0xf]  ;;  %v4238_v36 = vld [vmem:[#allocation11 + $0x4c] sm:$0xf]  ;;  %v3472_v57 = vld [vmem:[#allocation11 + $0x58] sm:$0xf0] }
 0x174   :  { %v1318_v22 = vadd.f32 %v1317_v7, %v548_v53  ;;  %2312 = vmatpush.bf16.msra.mxu3 %v3835_v37  ;;  %v3523_v7 = vor.u32 %v4250_v0, %v3520_v2  ;;  %v3475_v42 = vor.u32 %v4238_v36, %v3472_v57  ;;  %v4278_v0 = vld [vmem:[#allocation11 + $0x18c] sm:$0xf]  ;;  %v3632_v2 = vld [vmem:[#allocation11 + $0x198] sm:$0xf0]  ;;  %v3918_v29 = vld [vmem:[#allocation11 + $0x3c8] sm:$0xf] }
 0x175   :  { %v1423_v58 = vmax.f32 %v1304_v49, 0.0  ;;  %v4254_v49 = vld [vmem:[#allocation11 + $0xcc] sm:$0xf]  ;;  %v3902_v57 = vld [vmem:[#allocation11 + $0x3a8] sm:$0xf] }
 0x176   :  { %2323 = vmatpush.bf16.msrb.mxu0 %v3503_v46  ;;  %v1331_v31 = vpop.f32.mrf.mxu1  ;;  %v4325_v46 = vld [vmem:[#allocation11 + $0x304] sm:$0xf]  ;;  %v3539_v56 = vor.u32 %v4254_v49, %v3536_v50  ;;  %v3648_v49 = vld [vmem:[#allocation11 + $0x1b8] sm:$0xf0] }
 0x177   :  { %v4723_v1 = vpack.c.bf16 %v1423_v58, %v1419_v55  ;;  %v1332_v35 = vadd.f32 %v1331_v31, %v1318_v22  ;;  %v3819_v51 = vor.u32 %v4325_v46, %v3816_v27  ;;  %v3807_v55 = vor.u32 %v4324_v48, %v3806_v45  ;;  %v3598_v58 = vld [vmem:[#allocation11 + $0x148] sm:$0xf]  ;;  %v4304_v46 = vld [vmem:[#allocation11 + $0x254] sm:$0xf0]  ;;  %v4234_v27 = vld [vmem:[#allocation11 + $0x2c] sm:$0xf] }
 0x178   :  { %v1343_v9 = vpop.f32.mrf.mxu2  ;;  %v3758_v22 = vld [vmem:[#allocation11 + $0x288] sm:$0xf]  ;;  %v4282_v48 = vld [vmem:[#allocation11 + $0x1ac] sm:$0xf] }
 0x179   :  { %v1357_v10 = vpop.f32.mrf.mxu3  ;;  %2230 = vmatmul.bf16.vlgmr.msrb.gmra.mxu1 %v4723_v1  ;;  %2272 = vmatmul.bf16.vlgmr.msra.gmra.mxu0 %v4719_v15  ;;  %v1344_v24 = vadd.f32 %v1343_v9, %v1330_v20  ;;  %v4268_v9 = vld [vmem:[#allocation11 + $0x134] sm:$0xf0]  ;;  %v3759_v3 = vor.u32 %v4312_v23, %v3758_v22 }
 0x17a   :  { %2324 = vmatpush.bf16.msrb.mxu0 %v3487_v59  ;;  %2334 = vmatpush.bf16.msrb.mxu1 %v3679_v60  ;;  %v4272_v59 = vld [vmem:[#allocation11 + $0x154] sm:$0xf0]  ;;  %v3790_v60 = vld [vmem:[#allocation11 + $0x2c8] sm:$0xf]  ;;  %v3583_v16 = vor.u32 %v4268_v9, %v3582_v8 }
 0x17b   :  { %v1358_v39 = vadd.f32 %v1357_v10, %v1344_v24  ;;  %2313 = vmatpush.bf16.msra.mxu3 %v3819_v51  ;;  %v3599_v4 = vor.u32 %v4272_v59, %v3598_v58  ;;  %v3791_v6 = vor.u32 %v4320_v63, %v3790_v60  ;;  %v3774_v10 = vld [vmem:[#allocation11 + $0x2a8] sm:$0xf]  ;;  %v4264_v20 = vld [vmem:[#allocation11 + $0x114] sm:$0xf0]  ;;  %v4242_v24 = vld [vmem:[#allocation11 + $0x6c] sm:$0xf] }
 0x17c   :  { %v3567_v30 = vor.u32 %v4264_v20, %v3566_v19  ;;  %v4300_v58 = vld [vmem:[#allocation11 + $0x234] sm:$0xf0]  ;;  %v4230_v59 = vld [vmem:[#allocation11 + $0xc] sm:$0xf]  ;;  %v3440_v60 = vld [vmem:[#allocation11 + $0x18] sm:$0xf0] }
 0x17d   :  { %v1420_v52 = vmax.f32 %v1358_v39, 0.0  ;;  %v3664_v39 = vld [vmem:[#allocation11 + $0x1d8] sm:$0xf0]  ;;  %v3443_v8 = vor.u32 %v4230_v59, %v3440_v60  ;;  %v3694_v9 = vld [vmem:[#allocation11 + $0x208] sm:$0xf] }
 0x17e   :  { %2325 = vmatpush.bf16.msrb.mxu0 %v3471_v11  ;;  %2335 = vmatpush.bf16.msrb.mxu1 %v3663_v12  ;;  %v4316_v11 = vld [vmem:[#allocation11 + $0x2b4] sm:$0xf0]  ;;  %v4246_v12 = vld [vmem:[#allocation11 + $0x8c] sm:$0xf]  ;;  %v3808_v19 = vld [vmem:[#allocation11 + $0x2f8] sm:$0xf0] }
 0x17f   :  { %v3775_v17 = vor.u32 %v4316_v11, %v3774_v10  ;;  %v3507_v18 = vor.u32 %v4246_v12, %v3504_v13  ;;  %v4296_v10 = vld [vmem:[#allocation11 + $0x214] sm:$0xf0]  ;;  %v3635_v12 = vor.u32 %v4278_v0, %v3632_v2  ;;  %v3934_v13 = vld [vmem:[#allocation11 + $0x3e8] sm:$0xf]  ;;  %v4302_v59 = vld [vmem:[#allocation11 + $0x24c] sm:$0xf] }
 0x180   :  { %v1345_v62 = vpop.f32.mrf.mxu2  ;;  %v3695_v23 = vor.u32 %v4296_v10, %v3694_v9  ;;  %v3728_v60 = vld [vmem:[#allocation11 + $0x258] sm:$0xf0]  ;;  %v3838_v2 = vld [vmem:[#allocation11 + $0x328] sm:$0xf]  ;;  %v4328_v10 = vld [vmem:[#allocation11 + $0x314] sm:$0xf0] }
 0x181   :  { %v1346_v40 = vadd.f32 %v1345_v62, %v1332_v35  ;;  %v1359_v44 = vpop.f32.mrf.mxu3  ;;  %v4308_v35 = vld [vmem:[#allocation11 + $0x274] sm:$0xf0]  ;;  %v3731_v0 = vor.u32 %v4302_v59, %v3728_v60  ;;  %v3822_v9 = vld [vmem:[#allocation11 + $0x308] sm:$0xf]  ;;  %v4365_v59 = vld [vmem:[#allocation13 + $0x40] sm:$0xff] }
 0x182   :  { %2326 = vmatpush.bf16.msrb.mxu0 %v3455_v25  ;;  %2336 = vmatpush.bf16.msrb.mxu1 %v3647_v26  ;;  %v3488_v25 = vld [vmem:[#allocation11 + $0x78] sm:$0xf0]  ;;  %v4377_v60 = vld [vmem:[#allocation13 + $0xa0] sm:$0xff] }
 0x183   :  { %v1360_v47 = vadd.f32 %v1359_v44, %v1346_v40  ;;  %v3491_v31 = vor.u32 %v4242_v24, %v3488_v25 }
 0x185   :  { %v1424_v53 = vmax.f32 %v1360_v47, 0.0  ;;  %v3456_v47 = vld [vmem:[#allocation11 + $0x38] sm:$0xf0] }
 0x186   :  { %2327 = vmatpush.bf16.msrb.mxu0 %v3439_v38  ;;  %2337 = vmatpush.bf16.msrb.mxu1 %v3631_v41  ;;  %v4286_v38 = vld [vmem:[#allocation11 + $0x1cc] sm:$0xf]  ;;  %v3743_v41 = vor.u32 %v4308_v35, %v3742_v32 }
 0x187   :  { %v4727_v61 = vpack.c.bf16 %v1424_v53, %v1420_v52  ;;  %v3667_v45 = vor.u32 %v4286_v38, %v3664_v39  ;;  %v3727_v52 = vor.u32 %v4304_v46, %v3726_v43  ;;  %v3459_v53 = vor.u32 %v4234_v27, %v3456_v47  ;;  %v4318_v32 = vld [vmem:[#allocation11 + $0x2cc] sm:$0xf]  ;;  %v3584_v38 = vld [vmem:[#allocation11 + $0x138] sm:$0xf0]  ;;  %v3886_v43 = vld [vmem:[#allocation11 + $0x388] sm:$0xf] }
 0x188   :  { %v4314_v39 = vld [vmem:[#allocation11 + $0x2ac] sm:$0xf]  ;;  %v3760_v27 = vld [vmem:[#allocation11 + $0x298] sm:$0xf0] }
 0x189   :  { %2286 = vmatmul.bf16.vlgmr.msra.gmra.mxu1 %v4723_v1  ;;  %2328 = vmatmul.bf16.vlgmr.msrb.gmra.mxu0 %v4719_v15  ;;  %v4310_v46 = vld [vmem:[#allocation11 + $0x28c] sm:$0xf] }
 0x18a   :  { %2376 = vmatpush.bf16.msra.mxu0 %v3555_v21  ;;  %2244 = vmatmul.bf16.vlgmr.msrb.gmra.mxu2 %v4727_v61 }
 0x18b   :  { %2338 = vmatpush.bf16.msrb.mxu1 %v3615_v54  ;;  %v1371_v5 = vpop.f32.mrf.mxu0  ;;  %2348 = vmatpush.bf16.msrb.mxu2 %v3807_v55  ;;  %v3710_v54 = vld [vmem:[#allocation11 + $0x228] sm:$0xf] }
 0x18c   :  { %v1372_v33 = vadd.f32 %v1371_v5, %v549_v14 }
 0x18e   :  { %2377 = vmatpush.bf16.msra.mxu0 %v3539_v56  ;;  %v1385_v26 = vpop.f32.mrf.mxu1  ;;  %v3651_v56 = vor.u32 %v4282_v48, %v3648_v49  ;;  %v3763_v49 = vor.u32 %v4310_v46, %v3760_v27  ;;  %v4369_v46 = vld [vmem:[#allocation13 + $0x60] sm:$0xff] }
 0x18f   :  { %2339 = vmatpush.bf16.msrb.mxu1 %v3599_v4  ;;  %2349 = vmatpush.bf16.msrb.mxu2 %v3791_v6  ;;  %v1386_v44 = vadd.f32 %v1385_v26, %v1372_v33  ;;  %v3792_v33 = vld [vmem:[#allocation11 + $0x2d8] sm:$0xf0] }
 0x190   :  { %v3795_v36 = vor.u32 %v4318_v32, %v3792_v33  ;;  %v4334_v32 = vld [vmem:[#allocation11 + $0x34c] sm:$0xf]  ;;  %v3856_v33 = vld [vmem:[#allocation11 + $0x358] sm:$0xf0] }
 0x192   :  { %2378 = vmatpush.bf16.msra.mxu0 %v3523_v7  ;;  %v3711_v7 = vor.u32 %v4300_v58, %v3710_v54  ;;  %v4336_v58 = vld [vmem:[#allocation11 + $0x354] sm:$0xf0] }
 0x193   :  { %2340 = vmatpush.bf16.msrb.mxu1 %v3583_v16  ;;  %2350 = vmatpush.bf16.msrb.mxu2 %v3775_v17  ;;  %v1373_v37 = vpop.f32.mrf.mxu0  ;;  %v4274_v16 = vld [vmem:[#allocation11 + $0x16c] sm:$0xf]  ;;  %v3616_v17 = vld [vmem:[#allocation11 + $0x178] sm:$0xf0] }
 0x194   :  { %v1374_v21 = vadd.f32 %v1373_v37, %v549_v14  ;;  %v4356_v14 = vld [vmem:[#allocation11 + $0x3f4] sm:$0xf0]  ;;  %v3619_v26 = vor.u32 %v4274_v16, %v3616_v17  ;;  %v3823_v16 = vor.u32 %v4328_v10, %v3822_v9  ;;  %v4375_v9 = vld [vmem:[#allocation13 + $0x90] sm:$0xff] }
 0x195   :  { %v3935_v24 = vor.u32 %v4356_v14, %v3934_v13  ;;  %v4348_v37 = vld [vmem:[#allocation11 + $0x3b4] sm:$0xf0]  ;;  %v4354_v13 = vld [vmem:[#allocation11 + $0x3ec] sm:$0xf]  ;;  %v3936_v14 = vld [vmem:[#allocation11 + $0x3f8] sm:$0xf0] }
 0x196   :  { %2379 = vmatpush.bf16.msra.mxu0 %v3507_v18  ;;  %v1387_v51 = vpop.f32.mrf.mxu1  ;;  %v4322_v18 = vld [vmem:[#allocation11 + $0x2ec] sm:$0xf]  ;;  %v3939_v17 = vor.u32 %v4354_v13, %v3936_v14 }
 0x197   :  { %2341 = vmatpush.bf16.msrb.mxu1 %v3567_v30  ;;  %2351 = vmatpush.bf16.msrb.mxu2 %v3759_v3  ;;  %v1388_v55 = vadd.f32 %v1387_v51, %v1374_v21  ;;  %v3811_v28 = vor.u32 %v4322_v18, %v3808_v19  ;;  %v4352_v30 = vld [vmem:[#allocation11 + $0x3d4] sm:$0xf0]  ;;  %v4270_v3 = vld [vmem:[#allocation11 + $0x14c] sm:$0xf]  ;;  %v3920_v19 = vld [vmem:[#allocation11 + $0x3d8] sm:$0xf0] }
 0x198   :  { %v1399_v62 = vpop.f32.mrf.mxu2  ;;  %v4262_v21 = vld [vmem:[#allocation11 + $0x10c] sm:$0xf]  ;;  %v4340_v51 = vld [vmem:[#allocation11 + $0x374] sm:$0xf0] }
 0x199   :  { %v1413_v40 = vpop.f32.mrf.mxu3  ;;  %v1400_v50 = vadd.f32 %v1399_v62, %v1386_v44  ;;  %v4266_v62 = vld [vmem:[#allocation11 + $0x12c] sm:$0xf]  ;;  %v4344_v44 = vld [vmem:[#allocation11 + $0x394] sm:$0xf0] }
 0x19a   :  { %2380 = vmatpush.bf16.msra.mxu0 %v3491_v31  ;;  %2342 = vmatmul.bf16.vlgmr.msrb.gmra.mxu1 %v4723_v1  ;;  %v3600_v31 = vld [vmem:[#allocation11 + $0x158] sm:$0xf0]  ;;  %v3887_v47 = vor.u32 %v4344_v44, %v3886_v43  ;;  %v4350_v18 = vld [vmem:[#allocation11 + $0x3cc] sm:$0xf]  ;;  %v4359_v43 = vld [vmem:[#allocation13 + $0x10] sm:$0xff] }
 0x19b   :  { %2390 = vmatpush.bf16.msra.mxu1 %v3683_v34  ;;  %2300 = vmatmul.bf16.vlgmr.msra.gmra.mxu2 %v4727_v61  ;;  %v1414_v4 = vadd.f32 %v1413_v40, %v1400_v50  ;;  %v3919_v34 = vor.u32 %v4352_v30, %v3918_v29  ;;  %v3603_v35 = vor.u32 %v4270_v3, %v3600_v31  ;;  %v3776_v40 = vld [vmem:[#allocation11 + $0x2b8] sm:$0xf0]  ;;  %v3870_v50 = vld [vmem:[#allocation11 + $0x368] sm:$0xf]  ;;  %v4338_v30 = vld [vmem:[#allocation11 + $0x36c] sm:$0xf] }
 0x19c   :  { %2352 = vmatpush.bf16.msrb.mxu2 %v3743_v41  ;;  %v3903_v41 = vor.u32 %v4348_v37, %v3902_v57  ;;  %v3871_v54 = vor.u32 %v4340_v51, %v3870_v50  ;;  %v3872_v3 = vld [vmem:[#allocation11 + $0x378] sm:$0xf0]  ;;  %v4326_v37 = vld [vmem:[#allocation11 + $0x30c] sm:$0xf]  ;;  %v4371_v44 = vld [vmem:[#allocation13 + $0x70] sm:$0xff] }
 0x19d   :  { %v1421_v20 = vmax.f32 %v1414_v4, 0.0  ;;  %v4332_v4 = vld [vmem:[#allocation11 + $0x334] sm:$0xf0]  ;;  %v3875_v31 = vor.u32 %v4338_v30, %v3872_v3  ;;  %v4367_v51 = vld [vmem:[#allocation13 + $0x50] sm:$0xff] }
 0x19e   :  { %2381 = vmatpush.bf16.msra.mxu0 %v3475_v42  ;;  %v3779_v42 = vor.u32 %v4314_v39, %v3776_v40  ;;  %v4363_v39 = vld [vmem:[#allocation13 + $0x30] sm:$0xff]  ;;  %v4362_v40 = vld [vmem:[#allocation13 + $0x28] sm:$0xff] }
 0x19f   :  { %2391 = vmatpush.bf16.msra.mxu1 %v3667_v45  ;;  %v3568_v45 = vld [vmem:[#allocation11 + $0x118] sm:$0xf0]  ;;  %v4387_v30 = vld [vmem:[#allocation13 + $0xf0] sm:$0xff] }
 0x1a0   :  { %v1401_v63 = vpop.f32.mrf.mxu2  ;;  %2353 = vmatpush.bf16.msrb.mxu2 %v3727_v52  ;;  %v3571_v48 = vor.u32 %v4262_v21, %v3568_v45  ;;  %v4306_v52 = vld [vmem:[#allocation11 + $0x26c] sm:$0xf] }
 0x1a1   :  { %v1402_v5 = vadd.f32 %v1401_v63, %v1388_v55  ;;  %v1415_v6 = vpop.f32.mrf.mxu3  ;;  %v4358_v21 = vld [vmem:[#allocation13 + $0x8] sm:$0xff] }
 0x1a2   :  { %2382 = vmatpush.bf16.msra.mxu0 %v3459_v53  ;;  %v3744_v53 = vld [vmem:[#allocation11 + $0x278] sm:$0xf0]  ;;  %v4370_v45 = vld [vmem:[#allocation13 + $0x68] sm:$0xff] }
 0x1a3   :  { %v1416_v11 = vadd.f32 %v1415_v6, %v1402_v5  ;;  %2392 = vmatpush.bf16.msra.mxu1 %v3651_v56  ;;  %v3747_v55 = vor.u32 %v4306_v52, %v3744_v53  ;;  %v3854_v56 = vld [vmem:[#allocation11 + $0x348] sm:$0xf]  ;;  %v4298_v5 = vld [vmem:[#allocation11 + $0x22c] sm:$0xf]  ;;  %v3712_v6 = vld [vmem:[#allocation11 + $0x238] sm:$0xf0] }
 0x1a4   :  { %2354 = vmatpush.bf16.msrb.mxu2 %v3711_v7  ;;  %v3855_v63 = vor.u32 %v4336_v58, %v3854_v56  ;;  %v3839_v7 = vor.u32 %v4332_v4, %v3838_v2  ;;  %v4379_v52 = vld [vmem:[#allocation13 + $0xb0] sm:$0xff]  ;;  %v4366_v53 = vld [vmem:[#allocation13 + $0x48] sm:$0xff]  ;;  %v4376_v2 = vld [vmem:[#allocation13 + $0x98] sm:$0xff] }
 0x1a5   :  { %v1425_v22 = vmax.f32 %v1416_v11, 0.0  ;;  %v4294_v11 = vld [vmem:[#allocation11 + $0x20c] sm:$0xf]  ;;  %v4748_v56 = vld [vmem:[%s4766_s6] sm:$0xf] }
 0x1a6   :  { %2383 = vmatpush.bf16.msra.mxu0 %v3443_v8  ;;  %v3715_v8 = vor.u32 %v4298_v5, %v3712_v6 }
 0x1a7   :  { %v4735_v25 = vpack.c.bf16 %v1425_v22, %v1421_v20  ;;  %2393 = vmatpush.bf16.msra.mxu1 %v3635_v12  ;;  %v3696_v12 = vld [vmem:[#allocation11 + $0x218] sm:$0xf0]  ;;  %v3923_v20 = vor.u32 %v4350_v18, %v3920_v19  ;;  %v4346_v22 = vld [vmem:[#allocation11 + $0x3ac] sm:$0xf] }
 0x1a8   :  { %2355 = vmatpush.bf16.msrb.mxu2 %v3695_v23  ;;  %v3904_v23 = vld [vmem:[#allocation11 + $0x3b8] sm:$0xf0] }
 0x1a9   :  { %2258 = vmatmul.bf16.vlgmr.msrb.gmra.mxu3 %v4735_v25  ;;  %2384 = vmatmul.bf16.vlgmr.msra.gmra.mxu0 %v4719_v15  ;;  %v3587_v15 = vor.u32 %v4266_v62, %v3584_v38  ;;  %v4364_v38 = vld [vmem:[#allocation13 + $0x38] sm:$0xff] }
 0x1aa   :  { %2362 = vmatpush.bf16.msrb.mxu3 %v3935_v24  ;;  %v3907_v24 = vor.u32 %v4346_v22, %v3904_v23  ;;  %2704 = vmatpush.bf16.msrb.mxu0 %v4364_v38  ;;  %v4373_v22 = vld [vmem:[#allocation13 + $0x80] sm:$0xff]  ;;  %v4388_v23 = vld [vmem:[#allocation13 + $0xf8] sm:$0xff] }
 0x1ab   :  { %2394 = vmatpush.bf16.msra.mxu1 %v3619_v26  ;;  %2356 = vmatmul.bf16.vlgmr.msrb.gmra.mxu2 %v4727_v61  ;;  %v4342_v26 = vld [vmem:[#allocation11 + $0x38c] sm:$0xf] }
 0x1ac   :  { %2404 = vmatpush.bf16.msra.mxu2 %v3811_v28  ;;  %v3888_v28 = vld [vmem:[#allocation11 + $0x398] sm:$0xf0] }
 0x1ad   :  { %v3891_v29 = vor.u32 %v4342_v26, %v3888_v28  ;;  %v1561_v26 = vperm.slane %v4748_v56, 1 }
 0x1ae   :  { %2363 = vmatpush.bf16.msrb.mxu3 %v3919_v34  ;;  %v3859_v34 = vor.u32 %v4334_v32, %v3856_v33  ;;  %2705 = vmatpush.bf16.msrb.mxu0 %v4363_v39  ;;  %v4386_v33 = vld [vmem:[#allocation13 + $0xe8] sm:$0xff] }
 0x1af   :  { %2395 = vmatpush.bf16.msra.mxu1 %v3603_v35  ;;  %v4330_v35 = vld [vmem:[#allocation11 + $0x32c] sm:$0xf] }
 0x1b0   :  { %2405 = vmatpush.bf16.msra.mxu2 %v3795_v36  ;;  %v3840_v36 = vld [vmem:[#allocation11 + $0x338] sm:$0xf0] }
 0x1b1   :  { %v3843_v57 = vor.u32 %v4330_v35, %v3840_v36 }
 0x1b2   :  { %2364 = vmatpush.bf16.msrb.mxu3 %v3903_v41  ;;  %2706 = vmatpush.bf16.msrb.mxu0 %v4362_v40  ;;  %v4361_v41 = vld [vmem:[#allocation13 + $0x20] sm:$0xff] }
 0x1b3   :  { %2396 = vmatpush.bf16.msra.mxu1 %v3587_v15  ;;  %v4360_v15 = vld [vmem:[#allocation13 + $0x18] sm:$0xff] }
 0x1b4   :  { %2406 = vmatpush.bf16.msra.mxu2 %v3779_v42  ;;  %v4372_v42 = vld [vmem:[#allocation13 + $0x78] sm:$0xff] }
 0x1b6   :  { %2365 = vmatpush.bf16.msrb.mxu3 %v3887_v47  ;;  %2707 = vmatpush.bf16.msrb.mxu0 %v4361_v41  ;;  %v4368_v47 = vld [vmem:[#allocation13 + $0x58] sm:$0xff] }
 0x1b7   :  { %2397 = vmatpush.bf16.msra.mxu1 %v3571_v48  ;;  %v4380_v48 = vld [vmem:[#allocation13 + $0xb8] sm:$0xff] }
 0x1b8   :  { %2407 = vmatpush.bf16.msra.mxu2 %v3763_v49 }
 0x1b9   :  { %2314 = vmatmul.bf16.vlgmr.msra.gmra.mxu3 %v4735_v25 }
 0x1ba   :  { %2366 = vmatpush.bf16.msrb.mxu3 %v3871_v54  ;;  %2398 = vmatmul.bf16.vlgmr.msra.gmra.mxu1 %v4723_v1  ;;  %v3699_v1 = vor.u32 %v4294_v11, %v3696_v12  ;;  %v4378_v54 = vld [vmem:[#allocation13 + $0xa8] sm:$0xff] }
 0x1bb   :  { %2708 = vmatpush.bf16.msrb.mxu0 %v4360_v15  ;;  %2718 = vmatpush.bf16.msrb.mxu1 %v4372_v42 }
 0x1bc   :  { %2408 = vmatpush.bf16.msra.mxu2 %v3747_v55 }
 0x1be   :  { %2367 = vmatpush.bf16.msrb.mxu3 %v3855_v63 }
 0x1bf   :  { %2709 = vmatpush.bf16.msrb.mxu0 %v4359_v43  ;;  %2719 = vmatpush.bf16.msrb.mxu1 %v4371_v44  ;;  %v4384_v44 = vld [vmem:[#allocation13 + $0xd8] sm:$0xff] }
 0x1c0   :  { %2409 = vmatpush.bf16.msra.mxu2 %v3731_v0  ;;  %v1560_v0 = vperm.slane %v4748_v56, 0 }
 0x1c2   :  { %2368 = vmatpush.bf16.msrb.mxu3 %v3839_v7 }
 0x1c3   :  { %2710 = vmatpush.bf16.msrb.mxu0 %v4358_v21  ;;  %2720 = vmatpush.bf16.msrb.mxu1 %v4370_v45  ;;  %v1562_v21 = vperm.slane %v4748_v56, 2 }
 0x1c4   :  { %2410 = vmatpush.bf16.msra.mxu2 %v3715_v8 }
 0x1c6   :  { %2369 = vmatpush.bf16.msrb.mxu3 %v3823_v16 }
 0x1c7   :  { %2721 = vmatpush.bf16.msrb.mxu1 %v4369_v46 }
 0x1c8   :  { %2411 = vmatpush.bf16.msra.mxu2 %v3699_v1  ;;  %v4374_v1 = vld [vmem:[#allocation13 + $0x88] sm:$0xff] }
 0x1c9   :  { %2370 = vmatmul.bf16.vlgmr.msrb.gmra.mxu3 %v4735_v25 }
 0x1ca   :  { %2418 = vmatpush.bf16.msra.mxu3 %v3939_v17 }
 0x1cb   :  { %2412 = vmatmul.bf16.vlgmr.msra.gmra.mxu2 %v4727_v61  ;;  %v3824_v61 = vld [vmem:[#allocation11 + $0x318] sm:$0xf0]  ;;  %2722 = vmatpush.bf16.msrb.mxu1 %v4368_v47 }
 0x1cc   :  { %v3827_v62 = vor.u32 %v4326_v37, %v3824_v61  ;;  %2732 = vmatpush.bf16.msrb.mxu2 %v4380_v48  ;;  %v4385_v37 = vld [vmem:[#allocation13 + $0xe0] sm:$0xff] }
 0x1ce   :  { %2419 = vmatpush.bf16.msra.mxu3 %v3923_v20 }
 0x1cf   :  { %2723 = vmatpush.bf16.msrb.mxu1 %v4367_v51  ;;  %v4382_v51 = vld [vmem:[#allocation13 + $0xc8] sm:$0xff] }
 0x1d0   :  { %2733 = vmatpush.bf16.msrb.mxu2 %v4379_v52 }
 0x1d2   :  { %2420 = vmatpush.bf16.msra.mxu3 %v3907_v24 }
 0x1d3   :  { %2724 = vmatpush.bf16.msrb.mxu1 %v4366_v53 }
 0x1d4   :  { %2734 = vmatpush.bf16.msrb.mxu2 %v4378_v54 }
 0x1d6   :  { %2421 = vmatpush.bf16.msra.mxu3 %v3891_v29 }
 0x1d7   :  { %2725 = vmatpush.bf16.msrb.mxu1 %v4365_v59  ;;  %v4381_v59 = vld [vmem:[#allocation13 + $0xc0] sm:$0xff] }
 0x1d8   :  { %2735 = vmatpush.bf16.msrb.mxu2 %v4377_v60 }
 0x1da   :  { %2422 = vmatpush.bf16.msra.mxu3 %v3875_v31 }
 0x1dc   :  { %2736 = vmatpush.bf16.msrb.mxu2 %v4376_v2 }
 0x1de   :  { %2423 = vmatpush.bf16.msra.mxu3 %v3859_v34 }
 0x1e0   :  { %2737 = vmatpush.bf16.msrb.mxu2 %v4375_v9 }
 0x1e2   :  { %2424 = vmatpush.bf16.msra.mxu3 %v3843_v57 }
 0x1e4   :  { %2738 = vmatpush.bf16.msrb.mxu2 %v4374_v1 }
 0x1e6   :  { %2425 = vmatpush.bf16.msra.mxu3 %v3827_v62  ;;  %v2217_v27 = vpop.f32.mrf.mxu0 }
 0x1e7   :  { %v2218_v5 = vadd.f32 %v2217_v27, %v1560_v0 }
 0x1e8   :  { %2739 = vmatpush.bf16.msrb.mxu2 %v4373_v22 }
 0x1e9   :  { %2426 = vmatmul.bf16.vlgmr.msra.gmra.mxu3 %v4735_v25  ;;  %v4357_v25 = vld [vmem:[#allocation13] sm:$0xff] }
 0x1ea   :  { %2711 = vmatpush.bf16.msrb.mxu0 %v4357_v25  ;;  %2746 = vmatpush.bf16.msrb.mxu3 %v4388_v23  ;;  %v4383_v25 = vld [vmem:[#allocation13 + $0xd0] sm:$0xff] }
 0x1ee   :  { %v2219_v55 = vpop.f32.mrf.mxu0  ;;  %2747 = vmatpush.bf16.msrb.mxu3 %v4387_v30 }
 0x1ef   :  { %v2220_v7 = vadd.f32 %v2219_v55, %v1560_v0 }
 0x1f2   :  { %2748 = vmatpush.bf16.msrb.mxu3 %v4386_v33 }
 0x1f6   :  { %v2231_v49 = vpop.f32.mrf.mxu1  ;;  %v2273_v6 = vpop.f32.mrf.mxu0  ;;  %2749 = vmatpush.bf16.msrb.mxu3 %v4385_v37 }
 0x1f7   :  { %v2232_v8 = vadd.f32 %v2231_v49, %v2218_v5  ;;  %v2274_v32 = vadd.f32 %v2273_v6, %v1561_v26 }
 0x1fa   :  { %2750 = vmatpush.bf16.msrb.mxu3 %v4384_v44 }
 0x1fe   :  { %v2233_v58 = vpop.f32.mrf.mxu1  ;;  %v2275_v24 = vpop.f32.mrf.mxu0  ;;  %2751 = vmatpush.bf16.msrb.mxu3 %v4383_v25 }
 0x1ff   :  { %v2234_v11 = vadd.f32 %v2233_v58, %v2220_v7  ;;  %v2276_v34 = vadd.f32 %v2275_v24, %v1561_v26 }
 0x202   :  { %2752 = vmatpush.bf16.msrb.mxu3 %v4382_v51 }
 0x206   :  { %v2287_v10 = vpop.f32.mrf.mxu1  ;;  %v2329_v61 = vpop.f32.mrf.mxu0  ;;  %2753 = vmatpush.bf16.msrb.mxu3 %v4381_v59 }
 0x207   :  { %v2288_v35 = vadd.f32 %v2287_v10, %v2274_v32  ;;  %v2330_v47 = vadd.f32 %v2329_v61, %v1562_v21 }
 0x20d   :  { %v2245_v50 = vpop.f32.mrf.mxu2 }
 0x20e   :  { %v2246_v12 = vadd.f32 %v2245_v50, %v2232_v8  ;;  %v2289_v29 = vpop.f32.mrf.mxu1  ;;  %v2331_v46 = vpop.f32.mrf.mxu0  ;;  %v1563_v8 = vperm.slane %v4748_v56, 3  ;;  %v4403_v56 = vld [vmem:[%s4768_s8] ss:$0 sm:$0xff]  ;;  %s4618_s8 = smov 128  }
 0x20f   :  { %v2290_v36 = vadd.f32 %v2289_v29, %v2276_v34  ;;  %v2332_v49 = vadd.f32 %v2331_v46, %v1562_v21 }
 0x215   :  { %v2247_v63 = vpop.f32.mrf.mxu2 }
 0x216   :  { %v2248_v14 = vadd.f32 %v2247_v63, %v2234_v11 }
 0x217   :  { %v2343_v39 = vpop.f32.mrf.mxu1 }
 0x218   :  { %v2344_v50 = vadd.f32 %v2343_v39, %v2330_v47 }
 0x21e   :  { %v2301_v13 = vpop.f32.mrf.mxu2 }
 0x21f   :  { %v2302_v57 = vadd.f32 %v2301_v13, %v2288_v35  ;;  %v2345_v48 = vpop.f32.mrf.mxu1 }
 0x220   :  { %v2346_v53 = vadd.f32 %v2345_v48, %v2332_v49 }
 0x226   :  { %v2303_v3 = vpop.f32.mrf.mxu2  ;;  %v2385_v5 = vpop.f32.mrf.mxu0 }
 0x227   :  { %v2304_v62 = vadd.f32 %v2303_v3, %v2290_v36  ;;  %v2386_v11 = vadd.f32 %v2385_v5, %v1563_v8 }
 0x22c   :  { %v2259_v4 = vpop.f32.mrf.mxu3 }
 0x22d   :  { %v2260_v16 = vadd.f32 %v2259_v4, %v2246_v12 }
 0x22e   :  { %v2357_v15 = vpop.f32.mrf.mxu2  ;;  %v2387_v9 = vpop.f32.mrf.mxu0 }
 0x22f   :  { %v2432_v19 = vmax.f32 %v2260_v16, 0.0  ;;  %v2358_v54 = vadd.f32 %v2357_v15, %v2344_v50  ;;  %v2388_v13 = vadd.f32 %v2387_v9, %v1563_v8 }
 0x234   :  { %v2261_v17 = vpop.f32.mrf.mxu3 }
 0x235   :  { %v2262_v18 = vadd.f32 %v2261_v17, %v2248_v14 }
 0x236   :  { %v2359_v52 = vpop.f32.mrf.mxu2 }
 0x237   :  { %v2436_v20 = vmax.f32 %v2262_v18, 0.0  ;;  %v2360_v55 = vadd.f32 %v2359_v52, %v2346_v53  ;;  %v2399_v6 = vpop.f32.mrf.mxu1 }
 0x238   :  { %v2400_v14 = vadd.f32 %v2399_v6, %v2386_v11 }
 0x239   :  { %v2440_v28 = vpack.c.bf16 %v2436_v20, %v2432_v19 }
 0x23b   :  { %2712 = vmatmul.bf16.vlgmr.msrb.gmra.mxu0 %v2440_v28 }
 0x23c   :  { %v2315_v31 = vpop.f32.mrf.mxu3 }
 0x23d   :  { %v2316_v38 = vadd.f32 %v2315_v31, %v2302_v57 }
 0x23f   :  { %v2433_v42 = vmax.f32 %v2316_v38, 0.0  ;;  %v2401_v12 = vpop.f32.mrf.mxu1 }
 0x240   :  { %v2402_v1 = vadd.f32 %v2401_v12, %v2388_v13 }
 0x244   :  { %v2317_v40 = vpop.f32.mrf.mxu3 }
 0x245   :  { %v2318_v41 = vadd.f32 %v2317_v40, %v2304_v62 }
 0x247   :  { %v2437_v43 = vmax.f32 %v2318_v41, 0.0 }
 0x249   :  { %v2441_v45 = vpack.c.bf16 %v2437_v43, %v2433_v42 }
 0x24b   :  { %2726 = vmatmul.bf16.vlgmr.msrb.gmra.mxu1 %v2441_v45 }
 0x24c   :  { %v2371_v27 = vpop.f32.mrf.mxu3 }
 0x24d   :  { %v2372_v58 = vadd.f32 %v2371_v27, %v2358_v54 }
 0x24e   :  { %v2413_v7 = vpop.f32.mrf.mxu2 }
 0x24f   :  { %v2434_v0 = vmax.f32 %v2372_v58, 0.0  ;;  %v2414_v17 = vadd.f32 %v2413_v7, %v2400_v14 }
 0x254   :  { %v2373_v60 = vpop.f32.mrf.mxu3 }
 0x255   :  { %v2374_v63 = vadd.f32 %v2373_v60, %v2360_v55 }
 0x256   :  { %v2415_v16 = vpop.f32.mrf.mxu2 }
 0x257   :  { %v2438_v2 = vmax.f32 %v2374_v63, 0.0  ;;  %v2416_v18 = vadd.f32 %v2415_v16, %v2402_v1 }
 0x259   :  { %v2442_v4 = vpack.c.bf16 %v2438_v2, %v2434_v0 }
 0x25b   :  { %2740 = vmatmul.bf16.vlgmr.msrb.gmra.mxu2 %v2442_v4 }
 0x26c   :  { %v2427_v10 = vpop.f32.mrf.mxu3 }
 0x26d   :  { %v2428_v19 = vadd.f32 %v2427_v10, %v2414_v17 }
 0x26f   :  { %v2435_v23 = vmax.f32 %v2428_v19, 0.0 }
 0x274   :  { %v2429_v20 = vpop.f32.mrf.mxu3 }
 0x275   :  { %v2430_v22 = vadd.f32 %v2429_v20, %v2416_v18 }
 0x277   :  { %v2439_v24 = vmax.f32 %v2430_v22, 0.0 }
 0x279   :  { %v2443_v26 = vpack.c.bf16 %v2439_v24, %v2435_v23 }
 0x27b   :  { %2754 = vmatmul.bf16.vlgmr.msrb.gmra.mxu3 %v2443_v26 }
 0x2b8   :  { %v2713_v28 = vpop.f32.mrf.mxu0 }
 0x2b9   :  { %v2714_v3 = vadd.f32 %v4403_v56, %v2713_v28 }
 0x2c0   :  { %v2715_v33 = vpop.f32.mrf.mxu0 }
 0x2c1   :  { %v2716_v57 = vadd.f32 %v4403_v56, %v2715_v33 }
 0x2c8   :  { %v2727_v29 = vpop.f32.mrf.mxu1 }
 0x2c9   :  { %v2728_v31 = vadd.f32 %v2727_v29, %v2714_v3 }
 0x2d0   :  { %v2729_v36 = vpop.f32.mrf.mxu1 }
 0x2d1   :  { %v2730_v61 = vadd.f32 %v2729_v36, %v2716_v57 }
 0x2de   :  { %v2741_v30 = vpop.f32.mrf.mxu2 }
 0x2df   :  { %v2742_v32 = vadd.f32 %v2741_v30, %v2728_v31 }
 0x2e6   :  { %v2743_v37 = vpop.f32.mrf.mxu2 }
 0x2e7   :  { %v2744_v62 = vadd.f32 %v2743_v37, %v2730_v61 }
 0x2fe   :  { %v2755_v34 = vpop.f32.mrf.mxu3 }
 0x2ff   :  { %v2756_v35 = vadd.f32 %v2755_v34, %v2742_v32 }
 0x301   :  { %2760 = vst [vmem:[#allocation14] sm:$0xff] %v2756_v35 }
 0x306   :  { %v2757_v38 = vpop.f32.mrf.mxu3 }
 0x307   :  { %v2758_v39 = vadd.f32 %v2757_v38, %v2744_v62 }
 0x309   :  { %2761 = vst [vmem:[#allocation14 + $0x8] sm:$0xff] %v2758_v39 }
 0x30a   :  { %2774 = dma.vmem_to_hbm [thread:$0]  %s2767_s1, 256, %s2769_s26, [#allocation4], %s4618_s8, %s4618_s8, %s4619_s27  }
 0x30b   :  { %4604 = dma.done.wait [#allocation4], 256  }
 0x30c   :  { %4605 = vsyncadd [#allocation4], 4294967040 }
 0x30d   :  { %2779 = vsyncpa [#allocation3], 1 }
 0x30e   :  { %2780 = vsyncpa [#allocation6], 1 }
 0x30f   :  { %2781 = vsyncpa [#allocation9], 1 }
 0x310   :  { %2782 = vsyncpa [#allocation12], 1 }
 0x311   :  { %2783 = vsyncpa [#allocation4], 1 }

// kernel: tpu_custom_call.1
= control target key start
LH: loop header
LB: loop body
LE: loop exit
PB: predicated region body
PF: predicated region fallthrough
CT: control target
= control target key end

     0   :  { %14 = vsyncpa [#allocation3], 0  ;;  %s4760_s0 = inlined_call_operand.hbm [shape: bf16[16,128], index: 0, kind: input, shape index: {}]   ;;  %s4761_s1 = inlined_call_operand.hbm [shape: bf16[128,512], index: 1, kind: input, shape index: {}]   ;;  %s4762_s2 = inlined_call_operand.hbm [shape: f32[1,512], index: 2, kind: input, shape index: {}]   ;;  %s4763_s3 = inlined_call_operand.hbm [shape: bf16[512,512], index: 3, kind: input, shape index: {}]   ;;  %s4764_s4 = inlined_call_operand.hbm [shape: f32[1,512], index: 4, kind: input, shape index: {}]   ;;  %s4765_s5 = inlined_call_operand.hbm [shape: bf16[512,512], index: 5, kind: input, shape index: {}]   ;;  %s4766_s6 = inlined_call_operand.vmem [shape: f32[1,512], index: 6, kind: input, shape index: {}]   ;;  %s4767_s7 = inlined_call_operand.hbm [shape: bf16[512,128], index: 7, kind: input, shape index: {}]   ;;  %s4768_s8 = inlined_call_operand.vmem [shape: f32[1,128], index: 8, kind: input, shape index: {}]   ;;  %s4769_s9 = inlined_call_operand.hbm [shape: f32[16,128], index: 9, kind: output, shape index: {}]  }
   0x1   :  { %15 = vsyncpa [#allocation6], 0 }
   0x2   :  { %16 = vsyncpa [#allocation9], 0 }
   0x3   :  { %17 = vsyncpa [#allocation12], 0  ;;  %s36_s11 = sshll.u32 %s4761_s1, 4  ;;  %s37_s11 = int_to_ptr.hbm [resolvable:$true] %s36_s11 }
   0x4   :  { %18 = vsyncpa [#allocation4], 0  ;;  %s4606_s12 = smov [#allocation5]   ;;  %s60_s16 = sshll.u32 %s4763_s3, 4  ;;  %s61_s16 = int_to_ptr.hbm [resolvable:$true] %s60_s16 }
   0x5   :  { %s38_s13 = sshll.u32 %s4606_s12, 4  ;;  %s4607_s17 = smov 256   ;;  %s39_s13 = int_to_ptr.vmem [resolvable:$true] %s38_s13 }
   0x6   :  { %s4608_s18 = smov 16   ;;  %s4609_s19 = smov [#allocation8]  }
   0x7   :  { %44 = dma.hbm_to_vmem [thread:$0]  %s37_s11, 4096, %s39_s13, [#allocation6], %s4607_s17, %s4607_s17, %s4608_s18  }
   0x8   :  { %s62_s20 = sshll.u32 %s4609_s19, 4  ;;  %s84_s23 = sshll.u32 %s4765_s5, 4  ;;  %s63_s20 = int_to_ptr.vmem [resolvable:$true] %s62_s20  ;;  %s85_s23 = int_to_ptr.hbm [resolvable:$true] %s84_s23 }
   0x9   :  { %68 = dma.hbm_to_vmem [thread:$0]  %s61_s16, 16384, %s63_s20, [#allocation9], %s4607_s17, %s4607_s17, %s4608_s18  }
   0xa   :  { %s23_s25 = sshll.u32 %s4760_s0, 4  ;;  %s4610_s26 = smov [#allocation11]   ;;  %s24_s25 = int_to_ptr.hbm [resolvable:$true] %s23_s25 }
   0xb   :  { %s86_s27 = sshll.u32 %s4610_s26, 4  ;;  %s4611_s3 = smov [#allocation2]   ;;  %s87_s27 = int_to_ptr.vmem [resolvable:$true] %s86_s27 }
   0xc   :  { %92 = dma.hbm_to_vmem [thread:$0]  %s85_s23, 16384, %s87_s27, [#allocation12], %s4607_s17, %s4607_s17, %s4608_s18  }
   0xd   :  { %s25_s28 = sshll.u32 %s4611_s3, 4  ;;  %s4612_s29 = smov 64   ;;  %s26_s28 = int_to_ptr.vmem [resolvable:$true] %s25_s28 }
   0xe   :  { %s4613_s30 = smov 4   ;;  %s50_s11 = sshll.u32 %s4762_s2, 4  ;;  %s51_s11 = int_to_ptr.hbm [resolvable:$true] %s50_s11 }
   0xf   :  { %31 = dma.hbm_to_vmem [thread:$0]  %s24_s25, 128, %s26_s28, [#allocation3], %s4612_s29, %s4612_s29, %s4613_s30  }
  0x10   :  { %s4614_s12 = smov [#allocation7]   ;;  %s74_s15 = sshll.u32 %s4764_s4, 4  ;;  %s75_s15 = int_to_ptr.hbm [resolvable:$true] %s74_s15 }
  0x11   :  { %s52_s13 = sshll.u32 %s4614_s12, 4  ;;  %s4615_s16 = smov [#allocation10]   ;;  %s53_s13 = int_to_ptr.vmem [resolvable:$true] %s52_s13 }
  0x12   :  { %55 = dma.hbm_to_vmem [thread:$0]  %s51_s11, 64, %s53_s13, [#allocation6]  }
  0x13   :  { %s76_s17 = sshll.u32 %s4615_s16, 4  ;;  %s99_s20 = sshll.u32 %s4767_s7, 4  ;;  %s77_s17 = int_to_ptr.vmem [resolvable:$true] %s76_s17  ;;  %s100_s20 = int_to_ptr.hbm [resolvable:$true] %s99_s20 }
  0x14   :  { %79 = dma.hbm_to_vmem [thread:$0]  %s75_s15, 64, %s77_s17, [#allocation9]  }
  0x15   :  { %s4616_s2 = smov [#allocation13]  }
  0x16   :  { %s101_s21 = sshll.u32 %s4616_s2, 4  ;;  %s102_s21 = int_to_ptr.vmem [resolvable:$true] %s101_s21 }
  0x17   :  { %107 = dma.hbm_to_vmem [thread:$0]  %s100_s20, 4096, %s102_s21, [#allocation12], %s4612_s29, %s4612_s29, %s4613_s30  }
  0x18   :  { %4596 = dma.done.wait [#allocation3], 128  }
  0x19   :  { %4597 = vsyncadd [#allocation3], 4294967168 }
  0x1a   :  { %4598 = dma.done.wait [#allocation6], 4160  }
  0x1b   :  { %4599 = vsyncadd [#allocation6], 4294963136 }
  0x1c   :  { %4600 = dma.done.wait [#allocation9], 16448  }
  0x1d   :  { %4601 = vsyncadd [#allocation9], 4294950848 }
  0x1e   :  { %4602 = dma.done.wait [#allocation12], 20480  }
  0x1f   :  { %4603 = vsyncadd [#allocation12], 4294946816  ;;  %v2902_v0 = vld [vmem:[#allocation5 + $0xe0] sm:$0xf]  ;;  %v4099_v1 = vld [vmem:[#allocation5 + $0xec] sm:$0xf0] }
  0x20   :  { %v4097_v2 = vld [vmem:[#allocation5 + $0xe4] sm:$0xf]  ;;  %v2903_v3 = vor.u32 %v4099_v1, %v2902_v0  ;;  %v2904_v4 = vld [vmem:[#allocation5 + $0xf0] sm:$0xf0]  ;;  %v2910_v5 = vld [vmem:[#allocation5 + $0xe8] sm:$0xf] }
  0x21   :  { %v4100_v6 = vld [vmem:[#allocation5 + $0xf4] sm:$0xf0]  ;;  %v2907_v7 = vor.u32 %v4097_v2, %v2904_v4  ;;  %v4098_v9 = vld [vmem:[#allocation5 + $0xec] sm:$0xf]  ;;  %v2912_v10 = vld [vmem:[#allocation5 + $0xf8] sm:$0xf0] }
  0x22   :  { %v2911_v8 = vor.u32 %v4100_v6, %v2910_v5  ;;  %v2886_v11 = vld [vmem:[#allocation5 + $0xc0] sm:$0xf]  ;;  %348 = vmatpush.bf16.msra.mxu0 %v2903_v3  ;;  %v2915_v12 = vor.u32 %v4098_v9, %v2912_v10  ;;  %v4095_v13 = vld [vmem:[#allocation5 + $0xcc] sm:$0xf0]  ;;  %v4093_v14 = vld [vmem:[#allocation5 + $0xc4] sm:$0xf] }
  0x23   :  { %v2888_v15 = vld [vmem:[#allocation5 + $0xd0] sm:$0xf0]  ;;  %362 = vmatpush.bf16.msra.mxu1 %v2907_v7  ;;  %v2887_v16 = vor.u32 %v4095_v13, %v2886_v11  ;;  %v2894_v18 = vld [vmem:[#allocation5 + $0xc8] sm:$0xf]  ;;  %v4096_v19 = vld [vmem:[#allocation5 + $0xd4] sm:$0xf0] }
  0x24   :  { %376 = vmatpush.bf16.msra.mxu2 %v2911_v8  ;;  %v2891_v17 = vor.u32 %v4093_v14, %v2888_v15  ;;  %v4094_v20 = vld [vmem:[#allocation5 + $0xcc] sm:$0xf]  ;;  %390 = vmatpush.bf16.msra.mxu3 %v2915_v12  ;;  %v2895_v21 = vor.u32 %v4096_v19, %v2894_v18  ;;  %v2896_v22 = vld [vmem:[#allocation5 + $0xd8] sm:$0xf0]  ;;  %v2870_v23 = vld [vmem:[#allocation5 + $0xa0] sm:$0xf] }
  0x25   :  { %v4091_v24 = vld [vmem:[#allocation5 + $0xac] sm:$0xf0]  ;;  %v2899_v25 = vor.u32 %v4094_v20, %v2896_v22  ;;  %v4089_v26 = vld [vmem:[#allocation5 + $0xa4] sm:$0xf]  ;;  %v2872_v27 = vld [vmem:[#allocation5 + $0xb0] sm:$0xf0] }
  0x26   :  { %v2878_v28 = vld [vmem:[#allocation5 + $0xa8] sm:$0xf]  ;;  %349 = vmatpush.bf16.msra.mxu0 %v2887_v16  ;;  %v2871_v29 = vor.u32 %v4091_v24, %v2870_v23  ;;  %v4092_v30 = vld [vmem:[#allocation5 + $0xb4] sm:$0xf0]  ;;  %v4090_v31 = vld [vmem:[#allocation5 + $0xac] sm:$0xf]  ;;  %v2875_v33 = vor.u32 %v4089_v26, %v2872_v27 }
  0x27   :  { %v2880_v32 = vld [vmem:[#allocation5 + $0xb8] sm:$0xf0]  ;;  %363 = vmatpush.bf16.msra.mxu1 %v2891_v17  ;;  %v2879_v34 = vor.u32 %v4092_v30, %v2878_v28  ;;  %v2854_v35 = vld [vmem:[#allocation5 + $0x80] sm:$0xf]  ;;  %v4087_v36 = vld [vmem:[#allocation5 + $0x8c] sm:$0xf0] }
  0x28   :  { %377 = vmatpush.bf16.msra.mxu2 %v2895_v21  ;;  %v4085_v37 = vld [vmem:[#allocation5 + $0x84] sm:$0xf]  ;;  %391 = vmatpush.bf16.msra.mxu3 %v2899_v25  ;;  %v2883_v38 = vor.u32 %v4090_v31, %v2880_v32  ;;  %v2856_v39 = vld [vmem:[#allocation5 + $0x90] sm:$0xf0]  ;;  %v2862_v40 = vld [vmem:[#allocation5 + $0x88] sm:$0xf]  ;;  %v2855_v44 = vor.u32 %v4087_v36, %v2854_v35 }
  0x29   :  { %v4088_v41 = vld [vmem:[#allocation5 + $0x94] sm:$0xf0]  ;;  %v4086_v42 = vld [vmem:[#allocation5 + $0x8c] sm:$0xf]  ;;  %v2864_v43 = vld [vmem:[#allocation5 + $0x98] sm:$0xf0]  ;;  %v2859_v45 = vor.u32 %v4085_v37, %v2856_v39 }
  0x2a   :  { %350 = vmatpush.bf16.msra.mxu0 %v2871_v29  ;;  %v2863_v46 = vor.u32 %v4088_v41, %v2862_v40  ;;  %v2838_v47 = vld [vmem:[#allocation5 + $0x60] sm:$0xf]  ;;  %v4083_v48 = vld [vmem:[#allocation5 + $0x6c] sm:$0xf0]  ;;  %v4081_v49 = vld [vmem:[#allocation5 + $0x64] sm:$0xf]  ;;  %v2867_v50 = vor.u32 %v4086_v42, %v2864_v43 }
  0x2b   :  { %364 = vmatpush.bf16.msra.mxu1 %v2875_v33  ;;  %v2840_v51 = vld [vmem:[#allocation5 + $0x70] sm:$0xf0]  ;;  %v2846_v52 = vld [vmem:[#allocation5 + $0x68] sm:$0xf]  ;;  %v4084_v53 = vld [vmem:[#allocation5 + $0x74] sm:$0xf0]  ;;  %v2839_v56 = vor.u32 %v4083_v48, %v2838_v47 }
  0x2c   :  { %378 = vmatpush.bf16.msra.mxu2 %v2879_v34  ;;  %392 = vmatpush.bf16.msra.mxu3 %v2883_v38  ;;  %v4082_v54 = vld [vmem:[#allocation5 + $0x6c] sm:$0xf]  ;;  %v2848_v55 = vld [vmem:[#allocation5 + $0x78] sm:$0xf0]  ;;  %v2843_v57 = vor.u32 %v4081_v49, %v2840_v51  ;;  %v2847_v58 = vor.u32 %v4084_v53, %v2846_v52  ;;  %v2822_v59 = vld [vmem:[#allocation5 + $0x40] sm:$0xf] }
  0x2d   :  { %v4079_v60 = vld [vmem:[#allocation5 + $0x4c] sm:$0xf0]  ;;  %v4077_v61 = vld [vmem:[#allocation5 + $0x44] sm:$0xf]  ;;  %v2851_v62 = vor.u32 %v4082_v54, %v2848_v55  ;;  %v2824_v63 = vld [vmem:[#allocation5 + $0x50] sm:$0xf0] }
  0x2e   :  { %351 = vmatpush.bf16.msra.mxu0 %v2855_v44  ;;  %v2830_v0 = vld [vmem:[#allocation5 + $0x48] sm:$0xf]  ;;  %v4080_v1 = vld [vmem:[#allocation5 + $0x54] sm:$0xf0]  ;;  %v4078_v2 = vld [vmem:[#allocation5 + $0x4c] sm:$0xf]  ;;  %v2823_v4 = vor.u32 %v4079_v60, %v2822_v59  ;;  %v2827_v5 = vor.u32 %v4077_v61, %v2824_v63 }
  0x2f   :  { %365 = vmatpush.bf16.msra.mxu1 %v2859_v45  ;;  %v2832_v3 = vld [vmem:[#allocation5 + $0x58] sm:$0xf0]  ;;  %v2831_v6 = vor.u32 %v4080_v1, %v2830_v0  ;;  %v2806_v7 = vld [vmem:[#allocation5 + $0x20] sm:$0xf]  ;;  %v4075_v8 = vld [vmem:[#allocation5 + $0x2c] sm:$0xf0] }
  0x30   :  { %379 = vmatpush.bf16.msra.mxu2 %v2863_v46  ;;  %393 = vmatpush.bf16.msra.mxu3 %v2867_v50  ;;  %v4073_v9 = vld [vmem:[#allocation5 + $0x24] sm:$0xf]  ;;  %v2835_v10 = vor.u32 %v4078_v2, %v2832_v3  ;;  %v2808_v11 = vld [vmem:[#allocation5 + $0x30] sm:$0xf0]  ;;  %v2814_v12 = vld [vmem:[#allocation5 + $0x28] sm:$0xf]  ;;  %v2807_v16 = vor.u32 %v4075_v8, %v2806_v7 }
  0x31   :  { %v4076_v13 = vld [vmem:[#allocation5 + $0x34] sm:$0xf0]  ;;  %v4074_v14 = vld [vmem:[#allocation5 + $0x2c] sm:$0xf]  ;;  %v2816_v15 = vld [vmem:[#allocation5 + $0x38] sm:$0xf0]  ;;  %v2811_v18 = vor.u32 %v4073_v9, %v2808_v11 }
  0x32   :  { %352 = vmatpush.bf16.msra.mxu0 %v2839_v56  ;;  %v2790_v17 = vld [vmem:[#allocation5] sm:$0xf]  ;;  %v2815_v19 = vor.u32 %v4076_v13, %v2814_v12  ;;  %v4071_v20 = vld [vmem:[#allocation5 + $0xc] sm:$0xf0]  ;;  %v4069_v21 = vld [vmem:[#allocation5 + $0x4] sm:$0xf]  ;;  %v2819_v23 = vor.u32 %v4074_v14, %v2816_v15 }
  0x33   :  { %366 = vmatpush.bf16.msra.mxu1 %v2843_v57  ;;  %v2792_v22 = vld [vmem:[#allocation5 + $0x10] sm:$0xf0]  ;;  %v2798_v24 = vld [vmem:[#allocation5 + $0x8] sm:$0xf]  ;;  %v4072_v25 = vld [vmem:[#allocation5 + $0x14] sm:$0xf0]  ;;  %v2791_v30 = vor.u32 %v4071_v20, %v2790_v17 }
  0x34   :  { %380 = vmatpush.bf16.msra.mxu2 %v2847_v58  ;;  %394 = vmatpush.bf16.msra.mxu3 %v2851_v62  ;;  %v4070_v26 = vld [vmem:[#allocation5 + $0xc] sm:$0xf]  ;;  %v2800_v27 = vld [vmem:[#allocation5 + $0x18] sm:$0xf0]  ;;  %v3030_v28 = vld [vmem:[#allocation8 + $0xe0] sm:$0xf]  ;;  %v2795_v33 = vor.u32 %v4069_v21, %v2792_v22  ;;  %v2799_v34 = vor.u32 %v4072_v25, %v2798_v24 }
  0x35   :  { %v4131_v29 = vld [vmem:[#allocation8 + $0xec] sm:$0xf0]  ;;  %v3158_v31 = vld [vmem:[#allocation8 + $0x1e0] sm:$0xf]  ;;  %v4068_v35 = vld [vmem:[#allocation2] sm:$0xff]  ;;  %v2803_v36 = vor.u32 %v4070_v26, %v2800_v27  ;;  %s4617_s23 = smov [#allocation14]  }
  0x36   :  { %353 = vmatpush.bf16.msra.mxu0 %v2823_v4  ;;  %v4163_v32 = vld [vmem:[#allocation8 + $0x1ec] sm:$0xf0]  ;;  %v3031_v37 = vor.u32 %v4131_v29, %v3030_v28  ;;  %v3014_v38 = vld [vmem:[#allocation8 + $0xc0] sm:$0xf]  ;;  %s2766_s1 = sshll.u32 %s4617_s23, 4  ;;  %s2768_s26 = sshll.u32 %s4769_s9, 4  ;;  %s2767_s1 = int_to_ptr.vmem [resolvable:$true] %s2766_s1  ;;  %s2769_s26 = int_to_ptr.hbm [resolvable:$true] %s2768_s26 }
  0x37   :  { %367 = vmatpush.bf16.msra.mxu1 %v2827_v5  ;;  %v3286_v39 = vld [vmem:[#allocation8 + $0x2e0] sm:$0xf]  ;;  %v4195_v40 = vld [vmem:[#allocation8 + $0x2ec] sm:$0xf0]  ;;  %v3159_v41 = vor.u32 %v4163_v32, %v3158_v31  ;;  %s4619_s27 = smov 8  }
  0x38   :  { %381 = vmatpush.bf16.msra.mxu2 %v2831_v6  ;;  %395 = vmatpush.bf16.msra.mxu3 %v2835_v10  ;;  %v4127_v42 = vld [vmem:[#allocation8 + $0xcc] sm:$0xf0]  ;;  %v3414_v43 = vld [vmem:[#allocation8 + $0x3e0] sm:$0xf]  ;;  %v3287_v47 = vor.u32 %v4195_v40, %v3286_v39 }
  0x39   :  { %v4227_v44 = vld [vmem:[#allocation8 + $0x3ec] sm:$0xf0]  ;;  %v3142_v45 = vld [vmem:[#allocation8 + $0x1c0] sm:$0xf]  ;;  %v3015_v48 = vor.u32 %v4127_v42, %v3014_v38 }
  0x3a   :  { %354 = vmatpush.bf16.msra.mxu0 %v2807_v16  ;;  %v4159_v46 = vld [vmem:[#allocation8 + $0x1cc] sm:$0xf0]  ;;  %v3415_v49 = vor.u32 %v4227_v44, %v3414_v43  ;;  %v2998_v50 = vld [vmem:[#allocation8 + $0xa0] sm:$0xf] }
  0x3b   :  { %368 = vmatpush.bf16.msra.mxu1 %v2811_v18  ;;  %v3270_v51 = vld [vmem:[#allocation8 + $0x2c0] sm:$0xf]  ;;  %v4191_v52 = vld [vmem:[#allocation8 + $0x2cc] sm:$0xf0]  ;;  %v3143_v53 = vor.u32 %v4159_v46, %v3142_v45 }
  0x3c   :  { %382 = vmatpush.bf16.msra.mxu2 %v2815_v19  ;;  %396 = vmatpush.bf16.msra.mxu3 %v2819_v23  ;;  %v4123_v54 = vld [vmem:[#allocation8 + $0xac] sm:$0xf0]  ;;  %v3398_v55 = vld [vmem:[#allocation8 + $0x3c0] sm:$0xf]  ;;  %v3271_v59 = vor.u32 %v4191_v52, %v3270_v51 }
  0x3d   :  { %v4223_v56 = vld [vmem:[#allocation8 + $0x3cc] sm:$0xf0]  ;;  %v3126_v57 = vld [vmem:[#allocation8 + $0x1a0] sm:$0xf]  ;;  %v2999_v60 = vor.u32 %v4123_v54, %v2998_v50 }
  0x3e   :  { %355 = vmatpush.bf16.msra.mxu0 %v2791_v30  ;;  %v4155_v58 = vld [vmem:[#allocation8 + $0x1ac] sm:$0xf0]  ;;  %v3399_v61 = vor.u32 %v4223_v56, %v3398_v55  ;;  %v2982_v62 = vld [vmem:[#allocation8 + $0x80] sm:$0xf]  ;;  %v4129_v55 = vld [vmem:[#allocation8 + $0xe4] sm:$0xf] }
  0x3f   :  { %369 = vmatpush.bf16.msra.mxu1 %v2795_v33  ;;  %v3254_v63 = vld [vmem:[#allocation8 + $0x2a0] sm:$0xf]  ;;  %v4187_v0 = vld [vmem:[#allocation8 + $0x2ac] sm:$0xf0]  ;;  %v3127_v1 = vor.u32 %v4155_v58, %v3126_v57  ;;  %v3032_v56 = vld [vmem:[#allocation8 + $0xf0] sm:$0xf0] }
  0x40   :  { %383 = vmatpush.bf16.msra.mxu2 %v2799_v34  ;;  %397 = vmatpush.bf16.msra.mxu3 %v2803_v36  ;;  %v4119_v2 = vld [vmem:[#allocation8 + $0x8c] sm:$0xf0]  ;;  %v3382_v3 = vld [vmem:[#allocation8 + $0x3a0] sm:$0xf]  ;;  %v3255_v7 = vor.u32 %v4187_v0, %v3254_v63  ;;  %v4161_v57 = vld [vmem:[#allocation8 + $0x1e4] sm:$0xf] }
  0x41   :  { %356 = vmatmul.bf16.vlgmr.msra.gmra.mxu0 %v4068_v35  ;;  %v4219_v4 = vld [vmem:[#allocation8 + $0x3ac] sm:$0xf0]  ;;  %v3110_v5 = vld [vmem:[#allocation8 + $0x180] sm:$0xf]  ;;  %v2983_v8 = vor.u32 %v4119_v2, %v2982_v62  ;;  %v3160_v58 = vld [vmem:[#allocation8 + $0x1f0] sm:$0xf0] }
  0x42   :  { %1194 = vmatpush.bf16.msrb.mxu0 %v3031_v37  ;;  %370 = vmatmul.bf16.vlgmr.msra.gmra.mxu1 %v4068_v35  ;;  %v4151_v6 = vld [vmem:[#allocation8 + $0x18c] sm:$0xf0]  ;;  %v3383_v9 = vor.u32 %v4219_v4, %v3382_v3  ;;  %v2966_v10 = vld [vmem:[#allocation8 + $0x60] sm:$0xf]  ;;  %v4125_v62 = vld [vmem:[#allocation8 + $0xc4] sm:$0xf]  ;;  %v3035_v3 = vor.u32 %v4129_v55, %v3032_v56 }
  0x43   :  { %1208 = vmatpush.bf16.msrb.mxu1 %v3159_v41  ;;  %384 = vmatmul.bf16.vlgmr.msra.gmra.mxu2 %v4068_v35  ;;  %v3238_v11 = vld [vmem:[#allocation8 + $0x280] sm:$0xf]  ;;  %v4183_v12 = vld [vmem:[#allocation8 + $0x28c] sm:$0xf0]  ;;  %v3111_v13 = vor.u32 %v4151_v6, %v3110_v5  ;;  %v4193_v5 = vld [vmem:[#allocation8 + $0x2e4] sm:$0xf] }
  0x44   :  { %398 = vmatmul.bf16.vlgmr.msra.gmra.mxu3 %v4068_v35  ;;  %1222 = vmatpush.bf16.msrb.mxu2 %v3287_v47  ;;  %v4115_v14 = vld [vmem:[#allocation8 + $0x6c] sm:$0xf0]  ;;  %v3366_v15 = vld [vmem:[#allocation8 + $0x380] sm:$0xf]  ;;  %v3239_v19 = vor.u32 %v4183_v12, %v3238_v11  ;;  %v3288_v6 = vld [vmem:[#allocation8 + $0x2f0] sm:$0xf0] }
  0x45   :  { %1236 = vmatpush.bf16.msrb.mxu3 %v3415_v49  ;;  %v4215_v16 = vld [vmem:[#allocation8 + $0x38c] sm:$0xf0]  ;;  %v3094_v17 = vld [vmem:[#allocation8 + $0x160] sm:$0xf]  ;;  %v2967_v20 = vor.u32 %v4115_v14, %v2966_v10  ;;  %v3416_v10 = vld [vmem:[#allocation8 + $0x3f0] sm:$0xf0] }
  0x46   :  { %1195 = vmatpush.bf16.msrb.mxu0 %v3015_v48  ;;  %v4147_v18 = vld [vmem:[#allocation8 + $0x16c] sm:$0xf0]  ;;  %v3367_v21 = vor.u32 %v4215_v16, %v3366_v15  ;;  %v2950_v22 = vld [vmem:[#allocation8 + $0x40] sm:$0xf]  ;;  %v4157_v11 = vld [vmem:[#allocation8 + $0x1c4] sm:$0xf]  ;;  %v3291_v15 = vor.u32 %v4193_v5, %v3288_v6 }
  0x47   :  { %1209 = vmatpush.bf16.msrb.mxu1 %v3143_v53  ;;  %v3222_v23 = vld [vmem:[#allocation8 + $0x260] sm:$0xf]  ;;  %v4179_v24 = vld [vmem:[#allocation8 + $0x26c] sm:$0xf0]  ;;  %v3095_v25 = vor.u32 %v4147_v18, %v3094_v17  ;;  %v3144_v12 = vld [vmem:[#allocation8 + $0x1d0] sm:$0xf0] }
  0x48   :  { %1223 = vmatpush.bf16.msrb.mxu2 %v3271_v59  ;;  %v4111_v26 = vld [vmem:[#allocation8 + $0x4c] sm:$0xf0]  ;;  %v3350_v27 = vld [vmem:[#allocation8 + $0x360] sm:$0xf]  ;;  %v3223_v31 = vor.u32 %v4179_v24, %v3222_v23  ;;  %v4121_v18 = vld [vmem:[#allocation8 + $0xa4] sm:$0xf] }
  0x49   :  { %1237 = vmatpush.bf16.msrb.mxu3 %v3399_v61  ;;  %v4211_v28 = vld [vmem:[#allocation8 + $0x36c] sm:$0xf0]  ;;  %v3078_v29 = vld [vmem:[#allocation8 + $0x140] sm:$0xf]  ;;  %v2951_v32 = vor.u32 %v4111_v26, %v2950_v22  ;;  %v3000_v22 = vld [vmem:[#allocation8 + $0xb0] sm:$0xf0] }
  0x4a   :  { %1196 = vmatpush.bf16.msrb.mxu0 %v2999_v60  ;;  %v4143_v30 = vld [vmem:[#allocation8 + $0x14c] sm:$0xf0]  ;;  %v3351_v33 = vor.u32 %v4211_v28, %v3350_v27  ;;  %v2934_v34 = vld [vmem:[#allocation8 + $0x20] sm:$0xf]  ;;  %v4221_v23 = vld [vmem:[#allocation8 + $0x3c4] sm:$0xf]  ;;  %v3003_v28 = vor.u32 %v4121_v18, %v3000_v22 }
  0x4b   :  { %1210 = vmatpush.bf16.msrb.mxu1 %v3127_v1  ;;  %v3206_v35 = vld [vmem:[#allocation8 + $0x240] sm:$0xf]  ;;  %v4175_v36 = vld [vmem:[#allocation8 + $0x24c] sm:$0xf0]  ;;  %v3079_v37 = vor.u32 %v4143_v30, %v3078_v29  ;;  %v3400_v24 = vld [vmem:[#allocation8 + $0x3d0] sm:$0xf0] }
  0x4c   :  { %1224 = vmatpush.bf16.msrb.mxu2 %v3255_v7  ;;  %v4107_v38 = vld [vmem:[#allocation8 + $0x2c] sm:$0xf0]  ;;  %v3334_v39 = vld [vmem:[#allocation8 + $0x340] sm:$0xf]  ;;  %v3207_v43 = vor.u32 %v4175_v36, %v3206_v35  ;;  %v3163_v7 = vor.u32 %v4161_v57, %v3160_v58  ;;  %v3128_v26 = vld [vmem:[#allocation8 + $0x1b0] sm:$0xf0]  ;;  %v3403_v29 = vor.u32 %v4221_v23, %v3400_v24 }
  0x4d   :  { %1238 = vmatpush.bf16.msrb.mxu3 %v3383_v9  ;;  %v4207_v40 = vld [vmem:[#allocation8 + $0x34c] sm:$0xf0]  ;;  %v3062_v41 = vld [vmem:[#allocation8 + $0x120] sm:$0xf]  ;;  %v2935_v45 = vor.u32 %v4107_v38, %v2934_v34  ;;  %v4225_v9 = vld [vmem:[#allocation8 + $0x3e4] sm:$0xf] }
  0x4e   :  { %1197 = vmatpush.bf16.msrb.mxu0 %v2983_v8  ;;  %v4139_v42 = vld [vmem:[#allocation8 + $0x12c] sm:$0xf0]  ;;  %v2918_v44 = vld [vmem:[#allocation8] sm:$0xf]  ;;  %v3335_v46 = vor.u32 %v4207_v40, %v3334_v39  ;;  %v3016_v8 = vld [vmem:[#allocation8 + $0xd0] sm:$0xf0]  ;;  %v3419_v17 = vor.u32 %v4225_v9, %v3416_v10 }
  0x4f   :  { %1211 = vmatpush.bf16.msrb.mxu1 %v3111_v13  ;;  %v4103_v47 = vld [vmem:[#allocation8 + $0xc] sm:$0xf0]  ;;  %v3190_v48 = vld [vmem:[#allocation8 + $0x220] sm:$0xf]  ;;  %v3063_v50 = vor.u32 %v4139_v42, %v3062_v41  ;;  %v3019_v16 = vor.u32 %v4125_v62, %v3016_v8  ;;  %v3112_v34 = vld [vmem:[#allocation8 + $0x190] sm:$0xf0] }
  0x50   :  { %1225 = vmatpush.bf16.msrb.mxu2 %v3239_v19  ;;  %v4171_v49 = vld [vmem:[#allocation8 + $0x22c] sm:$0xf0]  ;;  %v3046_v51 = vld [vmem:[#allocation8 + $0x100] sm:$0xf]  ;;  %v2919_v60 = vor.u32 %v4103_v47, %v2918_v44  ;;  %v4189_v19 = vld [vmem:[#allocation8 + $0x2c4] sm:$0xf] }
  0x51   :  { %1239 = vmatpush.bf16.msrb.mxu3 %v3367_v21  ;;  %v3318_v52 = vld [vmem:[#allocation8 + $0x320] sm:$0xf]  ;;  %v4203_v53 = vld [vmem:[#allocation8 + $0x32c] sm:$0xf0]  ;;  %v3191_v59 = vor.u32 %v4171_v49, %v3190_v48  ;;  %v3147_v21 = vor.u32 %v4157_v11, %v3144_v12  ;;  %v3256_v38 = vld [vmem:[#allocation8 + $0x2b0] sm:$0xf0] }
  0x52   :  { %1198 = vmatpush.bf16.msrb.mxu0 %v2967_v20  ;;  %v4135_v54 = vld [vmem:[#allocation8 + $0x10c] sm:$0xf0]  ;;  %v3319_v61 = vor.u32 %v4203_v53, %v3318_v52  ;;  %v3174_v63 = vld [vmem:[#allocation8 + $0x200] sm:$0xf]  ;;  %v3272_v20 = vld [vmem:[#allocation8 + $0x2d0] sm:$0xf0] }
  0x53   :  { %1212 = vmatpush.bf16.msrb.mxu1 %v3095_v25  ;;  %v4167_v0 = vld [vmem:[#allocation8 + $0x20c] sm:$0xf0]  ;;  %v3302_v1 = vld [vmem:[#allocation8 + $0x300] sm:$0xf]  ;;  %v3047_v2 = vor.u32 %v4135_v54, %v3046_v51  ;;  %v4153_v25 = vld [vmem:[#allocation8 + $0x1a4] sm:$0xf]  ;;  %v3275_v27 = vor.u32 %v4189_v19, %v3272_v20 }
  0x54   :  { %1226 = vmatpush.bf16.msrb.mxu2 %v3223_v31  ;;  %v4199_v4 = vld [vmem:[#allocation8 + $0x30c] sm:$0xf0]  ;;  %v3175_v13 = vor.u32 %v4167_v0, %v3174_v63  ;;  %v3131_v30 = vor.u32 %v4153_v25, %v3128_v26  ;;  %v4117_v31 = vld [vmem:[#allocation8 + $0x84] sm:$0xf]  ;;  %v3384_v41 = vld [vmem:[#allocation8 + $0x3b0] sm:$0xf0] }
  0x55   :  { %1240 = vmatpush.bf16.msrb.mxu3 %v3351_v33  ;;  %v3303_v14 = vor.u32 %v4199_v4, %v3302_v1  ;;  %v4149_v33 = vld [vmem:[#allocation8 + $0x184] sm:$0xf]  ;;  %v2968_v44 = vld [vmem:[#allocation8 + $0x70] sm:$0xf0] }
  0x56   :  { %1199 = vmatpush.bf16.msrb.mxu0 %v2951_v32  ;;  %v2984_v32 = vld [vmem:[#allocation8 + $0x90] sm:$0xf0]  ;;  %v3115_v36 = vor.u32 %v4149_v33, %v3112_v34  ;;  %v4217_v39 = vld [vmem:[#allocation8 + $0x3a4] sm:$0xf]  ;;  %v172_v33 = vld [vmem:[#allocation7] sm:$0xf] }
  0x57   :  { %1213 = vmatpush.bf16.msrb.mxu1 %v3079_v37  ;;  %v2987_v35 = vor.u32 %v4117_v31, %v2984_v32  ;;  %v4185_v37 = vld [vmem:[#allocation8 + $0x2a4] sm:$0xf]  ;;  %v3387_v42 = vor.u32 %v4217_v39, %v3384_v41  ;;  %v3096_v47 = vld [vmem:[#allocation8 + $0x170] sm:$0xf0] }
  0x58   :  { %1227 = vmatpush.bf16.msrb.mxu2 %v3207_v43  ;;  %v3259_v40 = vor.u32 %v4185_v37, %v3256_v38  ;;  %v4113_v43 = vld [vmem:[#allocation8 + $0x64] sm:$0xf]  ;;  %v3368_v53 = vld [vmem:[#allocation8 + $0x390] sm:$0xf0]  ;;  %v175_v37 = vperm.slane %v172_v33, 1 }
  0x59   :  { %1241 = vmatpush.bf16.msrb.mxu3 %v3335_v46  ;;  %v2971_v46 = vor.u32 %v4113_v43, %v2968_v44  ;;  %v4181_v49 = vld [vmem:[#allocation8 + $0x284] sm:$0xf]  ;;  %v2952_v56 = vld [vmem:[#allocation8 + $0x50] sm:$0xf0] }
  0x5a   :  { %1200 = vmatpush.bf16.msrb.mxu0 %v2935_v45  ;;  %v4145_v45 = vld [vmem:[#allocation8 + $0x164] sm:$0xf]  ;;  %v3224_v62 = vld [vmem:[#allocation8 + $0x270] sm:$0xf0] }
  0x5b   :  { %1214 = vmatpush.bf16.msrb.mxu1 %v3063_v50  ;;  %v3099_v48 = vor.u32 %v4145_v45, %v3096_v47  ;;  %v3240_v50 = vld [vmem:[#allocation8 + $0x290] sm:$0xf0]  ;;  %v4213_v52 = vld [vmem:[#allocation8 + $0x384] sm:$0xf]  ;;  %v4132_v47 = vld [vmem:[#allocation8 + $0xf4] sm:$0xf0] }
  0x5c   :  { %1228 = vmatpush.bf16.msrb.mxu2 %v3191_v59  ;;  %v3243_v51 = vor.u32 %v4181_v49, %v3240_v50  ;;  %v3371_v54 = vor.u32 %v4213_v52, %v3368_v53  ;;  %v4109_v55 = vld [vmem:[#allocation8 + $0x44] sm:$0xf]  ;;  %v3080_v59 = vld [vmem:[#allocation8 + $0x150] sm:$0xf0]  ;;  %v176_v49 = vperm.slane %v172_v33, 2  ;;  %v177_v53 = vperm.slane %v172_v33, 3 }
  0x5d   :  { %1242 = vmatpush.bf16.msrb.mxu3 %v3319_v61  ;;  %v4141_v57 = vld [vmem:[#allocation8 + $0x144] sm:$0xf]  ;;  %v2955_v58 = vor.u32 %v4109_v55, %v2952_v56  ;;  %v3352_v1 = vld [vmem:[#allocation8 + $0x370] sm:$0xf0]  ;;  %v4164_v52 = vld [vmem:[#allocation8 + $0x1f4] sm:$0xf0] }
  0x5e   :  { %1201 = vmatpush.bf16.msrb.mxu0 %v2919_v60  ;;  %v3083_v60 = vor.u32 %v4141_v57, %v3080_v59  ;;  %v4177_v61 = vld [vmem:[#allocation8 + $0x264] sm:$0xf]  ;;  %v2936_v4 = vld [vmem:[#allocation8 + $0x30] sm:$0xf0]  ;;  %v3022_v59 = vld [vmem:[#allocation8 + $0xc8] sm:$0xf] }
  0x5f   :  { %1215 = vmatpush.bf16.msrb.mxu1 %v3047_v2  ;;  %v4209_v63 = vld [vmem:[#allocation8 + $0x364] sm:$0xf]  ;;  %v3227_v0 = vor.u32 %v4177_v61, %v3224_v62  ;;  %v3208_v10 = vld [vmem:[#allocation8 + $0x250] sm:$0xf0] }
  0x60   :  { %1229 = vmatpush.bf16.msrb.mxu2 %v3175_v13  ;;  %v3355_v2 = vor.u32 %v4209_v63, %v3352_v1  ;;  %v4137_v6 = vld [vmem:[#allocation8 + $0x124] sm:$0xf]  ;;  %v3336_v13 = vld [vmem:[#allocation8 + $0x350] sm:$0xf0]  ;;  %v3150_v63 = vld [vmem:[#allocation8 + $0x1c8] sm:$0xf] }
  0x61   :  { %1243 = vmatpush.bf16.msrb.mxu3 %v3303_v14  ;;  %v4173_v9 = vld [vmem:[#allocation8 + $0x244] sm:$0xf]  ;;  %v3048_v19 = vld [vmem:[#allocation8 + $0x110] sm:$0xf0] }
  0x62   :  { %1250 = vmatpush.bf16.msra.mxu0 %v3035_v3  ;;  %v4105_v3 = vld [vmem:[#allocation8 + $0x24] sm:$0xf]  ;;  %v3211_v12 = vor.u32 %v4173_v9, %v3208_v10  ;;  %v3192_v22 = vld [vmem:[#allocation8 + $0x230] sm:$0xf0] }
  0x63   :  { %1264 = vmatpush.bf16.msra.mxu1 %v3163_v7  ;;  %v2939_v5 = vor.u32 %v4105_v3, %v2936_v4  ;;  %v3064_v7 = vld [vmem:[#allocation8 + $0x130] sm:$0xf0]  ;;  %v4205_v11 = vld [vmem:[#allocation8 + $0x344] sm:$0xf] }
  0x64   :  { %1278 = vmatpush.bf16.msra.mxu2 %v3291_v15  ;;  %v3067_v8 = vor.u32 %v4137_v6, %v3064_v7  ;;  %v3339_v14 = vor.u32 %v4205_v11, %v3336_v13  ;;  %v4101_v15 = vld [vmem:[#allocation8 + $0x4] sm:$0xf]  ;;  %v3320_v24 = vld [vmem:[#allocation8 + $0x330] sm:$0xf0]  ;;  %v3294_v6 = vld [vmem:[#allocation8 + $0x2e8] sm:$0xf] }
  0x65   :  { %1292 = vmatpush.bf16.msra.mxu3 %v3419_v17  ;;  %v4133_v17 = vld [vmem:[#allocation8 + $0x104] sm:$0xf]  ;;  %v3304_v31 = vld [vmem:[#allocation8 + $0x310] sm:$0xf0]  ;;  %v4196_v7 = vld [vmem:[#allocation8 + $0x2f4] sm:$0xf0] }
  0x66   :  { %1251 = vmatpush.bf16.msra.mxu0 %v3019_v16  ;;  %v2920_v16 = vld [vmem:[#allocation8 + $0x10] sm:$0xf0]  ;;  %v3051_v20 = vor.u32 %v4133_v17, %v3048_v19  ;;  %v4201_v23 = vld [vmem:[#allocation8 + $0x324] sm:$0xf]  ;;  %v4228_v11 = vld [vmem:[#allocation8 + $0x3f4] sm:$0xf0] }
  0x67   :  { %1265 = vmatpush.bf16.msra.mxu1 %v3147_v21  ;;  %v2923_v18 = vor.u32 %v4101_v15, %v2920_v16  ;;  %v4169_v21 = vld [vmem:[#allocation8 + $0x224] sm:$0xf]  ;;  %v3323_v26 = vor.u32 %v4201_v23, %v3320_v24  ;;  %v4124_v13 = vld [vmem:[#allocation8 + $0xb4] sm:$0xf0]  ;;  %v3134_v16 = vld [vmem:[#allocation8 + $0x1a8] sm:$0xf] }
  0x68   :  { %1279 = vmatpush.bf16.msra.mxu2 %v3275_v27  ;;  %v3195_v25 = vor.u32 %v4169_v21, %v3192_v22  ;;  %v4165_v27 = vld [vmem:[#allocation8 + $0x204] sm:$0xf]  ;;  %v4156_v17 = vld [vmem:[#allocation8 + $0x1b4] sm:$0xf0]  ;;  %v3278_v24 = vld [vmem:[#allocation8 + $0x2c8] sm:$0xf] }
  0x69   :  { %1293 = vmatpush.bf16.msra.mxu3 %v3403_v29 }
  0x6a   :  { %1252 = vmatpush.bf16.msra.mxu0 %v3003_v28  ;;  %v3176_v28 = vld [vmem:[#allocation8 + $0x210] sm:$0xf0] }
  0x6b   :  { %1266 = vmatpush.bf16.msra.mxu1 %v3131_v30  ;;  %v3179_v29 = vor.u32 %v4165_v27, %v3176_v28  ;;  %v4197_v30 = vld [vmem:[#allocation8 + $0x304] sm:$0xf]  ;;  %v3135_v28 = vor.u32 %v4156_v17, %v3134_v16  ;;  %v2926_v16 = vld [vmem:[#allocation8 + $0x8] sm:$0xf]  ;;  %v4104_v17 = vld [vmem:[#allocation8 + $0x14] sm:$0xf0] }
  0x6c   :  { %1280 = vmatpush.bf16.msra.mxu2 %v3259_v40  ;;  %v3307_v32 = vor.u32 %v4197_v30, %v3304_v31  ;;  %v2990_v30 = vld [vmem:[#allocation8 + $0x88] sm:$0xf]  ;;  %v4120_v31 = vld [vmem:[#allocation8 + $0x94] sm:$0xf0] }
  0x6d   :  { %1294 = vmatpush.bf16.msra.mxu3 %v3387_v42 }
  0x6e   :  { %1253 = vmatpush.bf16.msra.mxu0 %v2987_v35  ;;  %v174_v35 = vperm.slane %v172_v33, 0  ;;  %v4152_v33 = vld [vmem:[#allocation8 + $0x194] sm:$0xf0] }
  0x6f   :  { %1267 = vmatpush.bf16.msra.mxu1 %v3115_v36 }
  0x70   :  { %1281 = vmatpush.bf16.msra.mxu2 %v3243_v51  ;;  %v3166_v51 = vld [vmem:[#allocation8 + $0x1e8] sm:$0xf] }
  0x71   :  { %1295 = vmatpush.bf16.msra.mxu3 %v3371_v54 }
  0x72   :  { %1254 = vmatpush.bf16.msra.mxu0 %v2971_v46  ;;  %v3038_v46 = vld [vmem:[#allocation8 + $0xe8] sm:$0xf] }
  0x73   :  { %1268 = vmatpush.bf16.msra.mxu1 %v3099_v48  ;;  %v3039_v56 = vor.u32 %v4132_v47, %v3038_v46 }
  0x74   :  { %1282 = vmatpush.bf16.msra.mxu2 %v3227_v0  ;;  %v4160_v0 = vld [vmem:[#allocation8 + $0x1d4] sm:$0xf0] }
  0x75   :  { %1296 = vmatpush.bf16.msra.mxu3 %v3355_v2  ;;  %v3151_v10 = vor.u32 %v4160_v0, %v3150_v63  ;;  %v4180_v63 = vld [vmem:[#allocation8 + $0x274] sm:$0xf0] }
  0x76   :  { %1255 = vmatpush.bf16.msra.mxu0 %v2955_v58  ;;  %v3167_v58 = vor.u32 %v4164_v52, %v3166_v51  ;;  %v3374_v52 = vld [vmem:[#allocation8 + $0x388] sm:$0xf] }
  0x77   :  { %1269 = vmatpush.bf16.msra.mxu1 %v3083_v60  ;;  %v4128_v60 = vld [vmem:[#allocation8 + $0xd4] sm:$0xf0] }
  0x78   :  { %1283 = vmatpush.bf16.msra.mxu2 %v3211_v12  ;;  %v3006_v12 = vld [vmem:[#allocation8 + $0xa8] sm:$0xf] }
  0x79   :  { %1297 = vmatpush.bf16.msra.mxu3 %v3339_v14  ;;  %v3007_v23 = vor.u32 %v4124_v13, %v3006_v12  ;;  %v3342_v12 = vld [vmem:[#allocation8 + $0x348] sm:$0xf] }
  0x7a   :  { %1256 = vmatpush.bf16.msra.mxu0 %v2939_v5  ;;  %v3023_v5 = vor.u32 %v4128_v60, %v3022_v59 }
  0x7b   :  { %1270 = vmatpush.bf16.msra.mxu1 %v3067_v8  ;;  %v3422_v8 = vld [vmem:[#allocation8 + $0x3e8] sm:$0xf] }
  0x7c   :  { %1284 = vmatpush.bf16.msra.mxu2 %v3195_v25  ;;  %v3423_v22 = vor.u32 %v4228_v11, %v3422_v8  ;;  %v4192_v25 = vld [vmem:[#allocation8 + $0x2d4] sm:$0xf0] }
  0x7d   :  { %1298 = vmatpush.bf16.msra.mxu3 %v3323_v26  ;;  %v3406_v26 = vld [vmem:[#allocation8 + $0x3c8] sm:$0xf]  ;;  %v4176_v11 = vld [vmem:[#allocation8 + $0x254] sm:$0xf0] }
  0x7e   :  { %1257 = vmatpush.bf16.msra.mxu0 %v2923_v18 }
  0x7f   :  { %1271 = vmatpush.bf16.msra.mxu1 %v3051_v20  ;;  %v3295_v20 = vor.u32 %v4196_v7, %v3294_v6  ;;  %v3070_v6 = vld [vmem:[#allocation8 + $0x128] sm:$0xf]  ;;  %v4140_v7 = vld [vmem:[#allocation8 + $0x134] sm:$0xf0] }
  0x80   :  { %1285 = vmatpush.bf16.msra.mxu2 %v3179_v29  ;;  %v4224_v29 = vld [vmem:[#allocation8 + $0x3d4] sm:$0xf0] }
  0x81   :  { %1299 = vmatpush.bf16.msra.mxu3 %v3307_v32  ;;  %v3118_v32 = vld [vmem:[#allocation8 + $0x188] sm:$0xf] }
  0xbe   :  { %v357_v34 = vpop.f32.mrf.mxu0 }
  0xbf   :  { %v371_v36 = vpop.f32.mrf.mxu1  ;;  %v358_v38 = vadd.f32 %v357_v34, %v174_v35  ;;  %v3279_v34 = vor.u32 %v4192_v25, %v3278_v24  ;;  %v4162_v24 = vld [vmem:[#allocation8 + $0x1ec] sm:$0xf]  ;;  %v3168_v25 = vld [vmem:[#allocation8 + $0x1f8] sm:$0xf0] }
  0xc0   :  { %v372_v39 = vadd.f32 %v371_v36, %v175_v37  ;;  %v2991_v36 = vor.u32 %v4120_v31, %v2990_v30  ;;  %v2927_v30 = vor.u32 %v4104_v17, %v2926_v16  ;;  %v4114_v16 = vld [vmem:[#allocation8 + $0x6c] sm:$0xf]  ;;  %v2976_v17 = vld [vmem:[#allocation8 + $0x78] sm:$0xf0] }
  0xc1   :  { %v404_v43 = vmax.f32 %v358_v38, 0.0  ;;  %v4188_v38 = vld [vmem:[#allocation8 + $0x2b4] sm:$0xf0] }
  0xc2   :  { %v405_v48 = vmax.f32 %v372_v39, 0.0  ;;  %v3119_v39 = vor.u32 %v4152_v33, %v3118_v32  ;;  %v3326_v32 = vld [vmem:[#allocation8 + $0x328] sm:$0xf]  ;;  %v4204_v33 = vld [vmem:[#allocation8 + $0x334] sm:$0xf0] }
  0xc6   :  { %v385_v40 = vpop.f32.mrf.mxu2  ;;  %v359_v42 = vpop.f32.mrf.mxu0 }
  0xc7   :  { %v399_v41 = vpop.f32.mrf.mxu3  ;;  %v360_v44 = vadd.f32 %v359_v42, %v174_v35  ;;  %v373_v45 = vpop.f32.mrf.mxu1  ;;  %v386_v61 = vadd.f32 %v385_v40, %v176_v49  ;;  %v3407_v35 = vor.u32 %v4224_v29, %v3406_v26  ;;  %v3390_v40 = vld [vmem:[#allocation8 + $0x3a8] sm:$0xf]  ;;  %v4172_v29 = vld [vmem:[#allocation8 + $0x234] sm:$0xf0] }
  0xc8   :  { %v374_v50 = vadd.f32 %v373_v45, %v175_v37  ;;  %v400_v1 = vadd.f32 %v399_v41, %v177_v53  ;;  %v3262_v37 = vld [vmem:[#allocation8 + $0x2a8] sm:$0xf]  ;;  %v4220_v41 = vld [vmem:[#allocation8 + $0x3b4] sm:$0xf0] }
  0xc9   :  { %v408_v54 = vmax.f32 %v360_v44, 0.0  ;;  %v406_v14 = vmax.f32 %v386_v61, 0.0  ;;  %v2974_v42 = vld [vmem:[#allocation8 + $0x68] sm:$0xf]  ;;  %v4148_v45 = vld [vmem:[#allocation8 + $0x174] sm:$0xf0]  ;;  %v3263_v46 = vor.u32 %v4188_v38, %v3262_v37  ;;  %v3391_v47 = vor.u32 %v4220_v41, %v3390_v40 }
  0xca   :  { %v409_v55 = vmax.f32 %v374_v50, 0.0  ;;  %v407_v18 = vmax.f32 %v400_v1, 0.0  ;;  %v3102_v44 = vld [vmem:[#allocation8 + $0x168] sm:$0xf]  ;;  %v3024_v38 = vld [vmem:[#allocation8 + $0xd8] sm:$0xf0]  ;;  %v3327_v41 = vor.u32 %v4204_v33, %v3326_v32 }
  0xcb   :  { %v4691_v57 = vpack.c.bf16 %v408_v54, %v404_v43  ;;  %v4116_v43 = vld [vmem:[#allocation8 + $0x74] sm:$0xf0]  ;;  %v3103_v51 = vor.u32 %v4148_v45, %v3102_v44  ;;  %v2958_v54 = vld [vmem:[#allocation8 + $0x48] sm:$0xf]  ;;  %v3152_v40 = vld [vmem:[#allocation8 + $0x1d8] sm:$0xf0] }
  0xcc   :  { %v4693_v62 = vpack.c.bf16 %v409_v55, %v405_v48  ;;  %v3246_v48 = vld [vmem:[#allocation8 + $0x288] sm:$0xf]  ;;  %v2975_v50 = vor.u32 %v4116_v43, %v2974_v42  ;;  %v4112_v55 = vld [vmem:[#allocation8 + $0x54] sm:$0xf0]  ;;  %v4142_v32 = vld [vmem:[#allocation8 + $0x14c] sm:$0xf] }
  0xcd   :  { %1202 = vmatmul.bf16.vlgmr.msrb.gmra.mxu0 %v4691_v57  ;;  %v3230_v61 = vld [vmem:[#allocation8 + $0x268] sm:$0xf]  ;;  %v2959_v0 = vor.u32 %v4112_v55, %v2958_v54  ;;  %v4168_v43 = vld [vmem:[#allocation8 + $0x214] sm:$0xf0]  ;;  %v3008_v54 = vld [vmem:[#allocation8 + $0xb8] sm:$0xf0] }
  0xce   :  { %v387_v2 = vpop.f32.mrf.mxu2  ;;  %1216 = vmatmul.bf16.vlgmr.msrb.gmra.mxu1 %v4693_v62  ;;  %1306 = vmatpush.bf16.msrb.mxu0 %v3039_v56  ;;  %v3086_v56 = vld [vmem:[#allocation8 + $0x148] sm:$0xf]  ;;  %v3231_v8 = vor.u32 %v4180_v63, %v3230_v61  ;;  %v4200_v45 = vld [vmem:[#allocation8 + $0x314] sm:$0xf0]  ;;  %v4154_v55 = vld [vmem:[#allocation8 + $0x1ac] sm:$0xf] }
  0xcf   :  { %v388_v3 = vadd.f32 %v387_v2, %v176_v49  ;;  %v401_v4 = vpop.f32.mrf.mxu3  ;;  %1320 = vmatpush.bf16.msrb.mxu1 %v3167_v58  ;;  %v4184_v49 = vld [vmem:[#allocation8 + $0x294] sm:$0xf0]  ;;  %v3358_v2 = vld [vmem:[#allocation8 + $0x368] sm:$0xf]  ;;  %v4190_v61 = vld [vmem:[#allocation8 + $0x2cc] sm:$0xf] }
  0xd0   :  { %v402_v9 = vadd.f32 %v401_v4, %v177_v53  ;;  %v4216_v53 = vld [vmem:[#allocation8 + $0x394] sm:$0xf0]  ;;  %v3247_v59 = vor.u32 %v4184_v49, %v3246_v48  ;;  %v2942_v4 = vld [vmem:[#allocation8 + $0x28] sm:$0xf]  ;;  %v3280_v63 = vld [vmem:[#allocation8 + $0x2d8] sm:$0xf0] }
  0xd1   :  { %v410_v15 = vmax.f32 %v388_v3, 0.0  ;;  %v4144_v58 = vld [vmem:[#allocation8 + $0x154] sm:$0xf0]  ;;  %v3375_v60 = vor.u32 %v4216_v53, %v3374_v52  ;;  %v3182_v42 = vld [vmem:[#allocation8 + $0x208] sm:$0xf] }
  0xd2   :  { %v411_v19 = vmax.f32 %v402_v9, 0.0  ;;  %1307 = vmatpush.bf16.msrb.mxu0 %v3023_v5  ;;  %v3087_v1 = vor.u32 %v4144_v58, %v3086_v56  ;;  %v4212_v3 = vld [vmem:[#allocation8 + $0x374] sm:$0xf0]  ;;  %v3310_v44 = vld [vmem:[#allocation8 + $0x308] sm:$0xf]  ;;  %v3183_v53 = vor.u32 %v4168_v43, %v3182_v42 }
  0xd3   :  { %v4697_v21 = vpack.c.bf16 %v410_v15, %v406_v14  ;;  %1321 = vmatpush.bf16.msrb.mxu1 %v3151_v10  ;;  %v4108_v5 = vld [vmem:[#allocation8 + $0x34] sm:$0xf0]  ;;  %v3359_v9 = vor.u32 %v4212_v3, %v3358_v2  ;;  %v3214_v10 = vld [vmem:[#allocation8 + $0x248] sm:$0xf]  ;;  %v3071_v14 = vor.u32 %v4140_v7, %v3070_v6  ;;  %v4122_v52 = vld [vmem:[#allocation8 + $0xac] sm:$0xf]  ;;  %v3311_v58 = vor.u32 %v4200_v45, %v3310_v44 }
  0xd4   :  { %v4699_v27 = vpack.c.bf16 %v411_v19, %v407_v18  ;;  %v2943_v13 = vor.u32 %v4108_v5, %v2942_v4  ;;  %v4208_v15 = vld [vmem:[#allocation8 + $0x354] sm:$0xf0]  ;;  %v3054_v18 = vld [vmem:[#allocation8 + $0x108] sm:$0xf]  ;;  %v3136_v56 = vld [vmem:[#allocation8 + $0x1b8] sm:$0xf0] }
  0xd5   :  { %1230 = vmatmul.bf16.vlgmr.msrb.gmra.mxu2 %v4697_v21  ;;  %v4136_v19 = vld [vmem:[#allocation8 + $0x114] sm:$0xf0]  ;;  %v3343_v26 = vor.u32 %v4208_v15, %v3342_v12  ;;  %v4222_v2 = vld [vmem:[#allocation8 + $0x3cc] sm:$0xf]  ;;  %v3408_v3 = vld [vmem:[#allocation8 + $0x3d8] sm:$0xf0] }
  0xd6   :  { %1244 = vmatmul.bf16.vlgmr.msrb.gmra.mxu3 %v4699_v27  ;;  %1334 = vmatpush.bf16.msrb.mxu2 %v3295_v20  ;;  %v4130_v20 = vld [vmem:[#allocation8 + $0xec] sm:$0xf]  ;;  %v3055_v31 = vor.u32 %v4136_v19, %v3054_v18  ;;  %v2992_v5 = vld [vmem:[#allocation8 + $0x98] sm:$0xf0] }
  0xd7   :  { %1348 = vmatpush.bf16.msrb.mxu3 %v3423_v22  ;;  %1308 = vmatpush.bf16.msrb.mxu0 %v3007_v23  ;;  %v3215_v22 = vor.u32 %v4176_v11, %v3214_v10  ;;  %v3040_v23 = vld [vmem:[#allocation8 + $0xf8] sm:$0xf0]  ;;  %v4118_v4 = vld [vmem:[#allocation8 + $0x8c] sm:$0xf] }
  0xd8   :  { %1322 = vmatpush.bf16.msrb.mxu1 %v3135_v28  ;;  %v3198_v28 = vld [vmem:[#allocation8 + $0x228] sm:$0xf]  ;;  %v4150_v6 = vld [vmem:[#allocation8 + $0x18c] sm:$0xf]  ;;  %v3120_v7 = vld [vmem:[#allocation8 + $0x198] sm:$0xf0]  ;;  %v2995_v12 = vor.u32 %v4118_v4, %v2992_v5 }
  0xd9   :  { %v3199_v37 = vor.u32 %v4172_v29, %v3198_v28  ;;  %v4186_v10 = vld [vmem:[#allocation8 + $0x2ac] sm:$0xf]  ;;  %v3264_v11 = vld [vmem:[#allocation8 + $0x2b8] sm:$0xf0] }
  0xda   :  { %1335 = vmatpush.bf16.msrb.mxu2 %v3279_v34  ;;  %v3043_v34 = vor.u32 %v4130_v20, %v3040_v23  ;;  %v3392_v15 = vld [vmem:[#allocation8 + $0x3b8] sm:$0xf0]  ;;  %v4146_v18 = vld [vmem:[#allocation8 + $0x16c] sm:$0xf]  ;;  %v3267_v20 = vor.u32 %v4186_v10, %v3264_v11 }
  0xdb   :  { %1349 = vmatpush.bf16.msrb.mxu3 %v3407_v35  ;;  %1309 = vmatpush.bf16.msrb.mxu0 %v2991_v36  ;;  %v3171_v35 = vor.u32 %v4162_v24, %v3168_v25  ;;  %v4126_v36 = vld [vmem:[#allocation8 + $0xcc] sm:$0xf]  ;;  %v3104_v19 = vld [vmem:[#allocation8 + $0x178] sm:$0xf0]  ;;  %v2979_v25 = vor.u32 %v4114_v16, %v2976_v17 }
  0xdc   :  { %1323 = vmatpush.bf16.msrb.mxu1 %v3119_v39  ;;  %v4158_v39 = vld [vmem:[#allocation8 + $0x1cc] sm:$0xf]  ;;  %v3027_v48 = vor.u32 %v4126_v36, %v3024_v38  ;;  %v3248_v24 = vld [vmem:[#allocation8 + $0x298] sm:$0xf0] }
  0xdd   :  { %1258 = vmatmul.bf16.vlgmr.msra.gmra.mxu0 %v4691_v57  ;;  %v3155_v49 = vor.u32 %v4158_v39, %v3152_v40  ;;  %v4182_v23 = vld [vmem:[#allocation8 + $0x28c] sm:$0xf]  ;;  %v3376_v29 = vld [vmem:[#allocation8 + $0x398] sm:$0xf0] }
  0xde   :  { %1336 = vmatpush.bf16.msrb.mxu2 %v3263_v46  ;;  %1272 = vmatmul.bf16.vlgmr.msra.gmra.mxu1 %v4693_v62  ;;  %v4194_v46 = vld [vmem:[#allocation8 + $0x2ec] sm:$0xf]  ;;  %v3088_v33 = vld [vmem:[#allocation8 + $0x158] sm:$0xf0] }
  0xdf   :  { %1350 = vmatpush.bf16.msrb.mxu3 %v3391_v47  ;;  %1310 = vmatpush.bf16.msrb.mxu0 %v2975_v50  ;;  %v3296_v47 = vld [vmem:[#allocation8 + $0x2f8] sm:$0xf0]  ;;  %v4226_v50 = vld [vmem:[#allocation8 + $0x3ec] sm:$0xf]  ;;  %v3091_v39 = vor.u32 %v4142_v32, %v3088_v33  ;;  %v4247_v32 = vld [vmem:[#allocation11 + $0x8c] sm:$0xf0] }
  0xe0   :  { %1324 = vmatpush.bf16.msrb.mxu1 %v3103_v51  ;;  %v3424_v51 = vld [vmem:[#allocation8 + $0x3f8] sm:$0xf0]  ;;  %v4214_v28 = vld [vmem:[#allocation8 + $0x38c] sm:$0xf] }
  0xe1   :  { %v4178_v36 = vld [vmem:[#allocation8 + $0x26c] sm:$0xf]  ;;  %v2944_v43 = vld [vmem:[#allocation8 + $0x38] sm:$0xf0] }
  0xe2   :  { %1337 = vmatpush.bf16.msrb.mxu2 %v3247_v59  ;;  %v3299_v59 = vor.u32 %v4194_v46, %v3296_v47  ;;  %v4210_v40 = vld [vmem:[#allocation8 + $0x36c] sm:$0xf]  ;;  %v3072_v45 = vld [vmem:[#allocation8 + $0x138] sm:$0xf0] }
  0xe3   :  { %1351 = vmatpush.bf16.msrb.mxu3 %v3375_v60  ;;  %1311 = vmatpush.bf16.msrb.mxu0 %v2959_v0  ;;  %v3427_v60 = vor.u32 %v4226_v50, %v3424_v51  ;;  %v3011_v0 = vor.u32 %v4122_v52, %v3008_v54  ;;  %v4106_v42 = vld [vmem:[#allocation8 + $0x2c] sm:$0xf]  ;;  %v3184_v17 = vld [vmem:[#allocation8 + $0x218] sm:$0xf0] }
  0xe4   :  { %1325 = vmatpush.bf16.msrb.mxu1 %v3087_v1  ;;  %v3139_v1 = vor.u32 %v4154_v55, %v3136_v56  ;;  %v4138_v44 = vld [vmem:[#allocation8 + $0x12c] sm:$0xf]  ;;  %v2947_v51 = vor.u32 %v4106_v42, %v2944_v43  ;;  %v2928_v55 = vld [vmem:[#allocation8 + $0x18] sm:$0xf0]  ;;  %v3446_v42 = vld [vmem:[#allocation11 + $0x20] sm:$0xf] }
  0xe5   :  { %1286 = vmatmul.bf16.vlgmr.msra.gmra.mxu2 %v4697_v21  ;;  %v4206_v50 = vld [vmem:[#allocation8 + $0x34c] sm:$0xf]  ;;  %v3075_v52 = vor.u32 %v4138_v44, %v3072_v45  ;;  %v4235_v43 = vld [vmem:[#allocation11 + $0x2c] sm:$0xf0] }
  0xe6   :  { %1300 = vmatmul.bf16.vlgmr.msra.gmra.mxu3 %v4699_v27  ;;  %1338 = vmatpush.bf16.msrb.mxu2 %v3231_v8  ;;  %v3283_v8 = vor.u32 %v4190_v61, %v3280_v63  ;;  %v4102_v54 = vld [vmem:[#allocation8 + $0xc] sm:$0xf]  ;;  %v4259_v61 = vld [vmem:[#allocation11 + $0xec] sm:$0xf0]  ;;  %v3670_v63 = vld [vmem:[#allocation11 + $0x1e0] sm:$0xf]  ;;  %v3447_v44 = vor.u32 %v4235_v43, %v3446_v42 }
  0xe7   :  { %1352 = vmatpush.bf16.msrb.mxu3 %v3359_v9  ;;  %1312 = vmatpush.bf16.msrb.mxu0 %v2943_v13  ;;  %v3411_v9 = vor.u32 %v4222_v2, %v3408_v3  ;;  %v3123_v13 = vor.u32 %v4150_v6, %v3120_v7  ;;  %v4134_v56 = vld [vmem:[#allocation8 + $0x10c] sm:$0xf]  ;;  %v3200_v3 = vld [vmem:[#allocation8 + $0x238] sm:$0xf0]  ;;  %v2931_v4 = vor.u32 %v4102_v54, %v2928_v55  ;;  %v4231_v45 = vld [vmem:[#allocation11 + $0xc] sm:$0xf0] }
  0xe8   :  { %1326 = vmatpush.bf16.msrb.mxu1 %v3071_v14  ;;  %v4218_v14 = vld [vmem:[#allocation8 + $0x3ac] sm:$0xf]  ;;  %v3328_v7 = vld [vmem:[#allocation8 + $0x338] sm:$0xf0]  ;;  %v4253_v54 = vld [vmem:[#allocation11 + $0xc4] sm:$0xf] }
  0xe9   :  { %v4170_v2 = vld [vmem:[#allocation8 + $0x22c] sm:$0xf]  ;;  %v3528_v55 = vld [vmem:[#allocation11 + $0xd0] sm:$0xf0] }
  0xea   :  { %1339 = vmatpush.bf16.msrb.mxu2 %v3215_v22  ;;  %v3395_v22 = vor.u32 %v4218_v14, %v3392_v15  ;;  %v4202_v6 = vld [vmem:[#allocation8 + $0x32c] sm:$0xf]  ;;  %v3203_v11 = vor.u32 %v4170_v2, %v3200_v3  ;;  %v4287_v14 = vld [vmem:[#allocation11 + $0x1cc] sm:$0xf0]  ;;  %v4249_v2 = vld [vmem:[#allocation11 + $0xa4] sm:$0xf] }
  0xeb   :  { %1353 = vmatpush.bf16.msrb.mxu3 %v3343_v26  ;;  %1313 = vmatpush.bf16.msrb.mxu0 %v2927_v30  ;;  %v3107_v26 = vor.u32 %v4146_v18, %v3104_v19  ;;  %v4110_v30 = vld [vmem:[#allocation8 + $0x4c] sm:$0xf]  ;;  %v3331_v15 = vor.u32 %v4202_v6, %v3328_v7  ;;  %v3312_v19 = vld [vmem:[#allocation8 + $0x318] sm:$0xf0]  ;;  %v3512_v3 = vld [vmem:[#allocation11 + $0xb0] sm:$0xf0] }
  0xec   :  { %1327 = vmatpush.bf16.msrb.mxu1 %v3055_v31  ;;  %v2960_v31 = vld [vmem:[#allocation8 + $0x58] sm:$0xf0]  ;;  %v4166_v16 = vld [vmem:[#allocation8 + $0x20c] sm:$0xf]  ;;  %v4267_v6 = vld [vmem:[#allocation11 + $0x12c] sm:$0xf0] }
  0xed   :  { %v2963_v38 = vor.u32 %v4110_v30, %v2960_v31  ;;  %v4198_v18 = vld [vmem:[#allocation8 + $0x30c] sm:$0xf]  ;;  %v3494_v31 = vld [vmem:[#allocation11 + $0x80] sm:$0xf]  ;;  %v3640_v42 = vld [vmem:[#allocation11 + $0x1b0] sm:$0xf0] }
  0xee   :  { %1340 = vmatpush.bf16.msrb.mxu2 %v3199_v37  ;;  %1314 = vmatmul.bf16.vlgmr.msrb.gmra.mxu0 %v4691_v57  ;;  %v3232_v37 = vld [vmem:[#allocation8 + $0x278] sm:$0xf0]  ;;  %v3766_v7 = vld [vmem:[#allocation11 + $0x2a0] sm:$0xf] }
  0xef   :  { %1362 = vmatpush.bf16.msra.mxu0 %v3043_v34  ;;  %1354 = vmatpush.bf16.msrb.mxu3 %v3327_v41  ;;  %v3251_v34 = vor.u32 %v4182_v23, %v3248_v24  ;;  %v3360_v41 = vld [vmem:[#allocation8 + $0x378] sm:$0xf0]  ;;  %v3235_v46 = vor.u32 %v4178_v36, %v3232_v37  ;;  %v3187_v23 = vor.u32 %v4166_v16, %v3184_v17  ;;  %v3510_v24 = vld [vmem:[#allocation11 + $0xa0] sm:$0xf]  ;;  %v4243_v37 = vld [vmem:[#allocation11 + $0x6c] sm:$0xf0] }
  0xf0   :  { %1376 = vmatpush.bf16.msra.mxu1 %v3171_v35  ;;  %v3379_v35 = vor.u32 %v4214_v28, %v3376_v29  ;;  %v3363_v47 = vor.u32 %v4210_v40, %v3360_v41  ;;  %v3638_v28 = vld [vmem:[#allocation11 + $0x1a0] sm:$0xf]  ;;  %v4283_v29 = vld [vmem:[#allocation11 + $0x1ac] sm:$0xf0]  ;;  %v3495_v36 = vor.u32 %v4247_v32, %v3494_v31  ;;  %v4237_v31 = vld [vmem:[#allocation11 + $0x44] sm:$0xf] }
  0xf1   :  { %1328 = vmatmul.bf16.vlgmr.msrb.gmra.mxu1 %v4693_v62  ;;  %v3639_v33 = vor.u32 %v4283_v29, %v3638_v28  ;;  %v4239_v40 = vld [vmem:[#allocation11 + $0x4c] sm:$0xf0]  ;;  %v3750_v16 = vld [vmem:[#allocation11 + $0x280] sm:$0xf]  ;;  %v3464_v32 = vld [vmem:[#allocation11 + $0x50] sm:$0xf0] }
  0xf2   :  { %1341 = vmatpush.bf16.msrb.mxu2 %v3183_v53  ;;  %v3344_v53 = vld [vmem:[#allocation8 + $0x358] sm:$0xf0]  ;;  %v3734_v28 = vld [vmem:[#allocation11 + $0x260] sm:$0xf]  ;;  %v4307_v29 = vld [vmem:[#allocation11 + $0x26c] sm:$0xf0] }
  0xf3   :  { %1363 = vmatpush.bf16.msra.mxu0 %v3027_v48  ;;  %1355 = vmatpush.bf16.msrb.mxu3 %v3311_v58  ;;  %v4174_v48 = vld [vmem:[#allocation8 + $0x24c] sm:$0xf]  ;;  %v3056_v58 = vld [vmem:[#allocation8 + $0x118] sm:$0xf0] }
  0xf4   :  { %1377 = vmatpush.bf16.msra.mxu1 %v3155_v49  ;;  %v3216_v49 = vld [vmem:[#allocation8 + $0x258] sm:$0xf0]  ;;  %v3059_v5 = vor.u32 %v4134_v56, %v3056_v58  ;;  %v3531_v58 = vor.u32 %v4253_v54, %v3528_v55 }
  0xf5   :  { %1342 = vmatmul.bf16.vlgmr.msrb.gmra.mxu2 %v4697_v21 }
  0xf6   :  { %1390 = vmatpush.bf16.msra.mxu2 %v3299_v59  ;;  %1356 = vmatmul.bf16.vlgmr.msrb.gmra.mxu3 %v4699_v27  ;;  %v3542_v59 = vld [vmem:[#allocation11 + $0xe0] sm:$0xf] }
  0xf7   :  { %1404 = vmatpush.bf16.msra.mxu3 %v3427_v60  ;;  %1364 = vmatpush.bf16.msra.mxu0 %v3011_v0  ;;  %v3219_v60 = vor.u32 %v4174_v48, %v3216_v49  ;;  %v4291_v0 = vld [vmem:[#allocation11 + $0x1ec] sm:$0xf0]  ;;  %v3606_v49 = vld [vmem:[#allocation11 + $0x160] sm:$0xf] }
  0xf8   :  { %1378 = vmatpush.bf16.msra.mxu1 %v3139_v1  ;;  %v3347_v1 = vor.u32 %v4206_v50, %v3344_v53  ;;  %v3671_v10 = vor.u32 %v4291_v0, %v3670_v63  ;;  %v4275_v50 = vld [vmem:[#allocation11 + $0x16c] sm:$0xf0] }
  0xf9   :  { %v4323_v53 = vld [vmem:[#allocation11 + $0x2ec] sm:$0xf0] }
  0xfa   :  { %1391 = vmatpush.bf16.msra.mxu2 %v3283_v8  ;;  %v3543_v8 = vor.u32 %v4259_v61, %v3542_v59  ;;  %v3590_v59 = vld [vmem:[#allocation11 + $0x140] sm:$0xf]  ;;  %v4319_v0 = vld [vmem:[#allocation11 + $0x2cc] sm:$0xf0] }
  0xfb   :  { %1405 = vmatpush.bf16.msra.mxu3 %v3411_v9  ;;  %1365 = vmatpush.bf16.msra.mxu0 %v2995_v12  ;;  %v3526_v9 = vld [vmem:[#allocation11 + $0xc0] sm:$0xf]  ;;  %v4255_v12 = vld [vmem:[#allocation11 + $0xcc] sm:$0xf0] }
  0xfc   :  { %1379 = vmatpush.bf16.msra.mxu1 %v3123_v13  ;;  %v3654_v13 = vld [vmem:[#allocation11 + $0x1c0] sm:$0xf] }
  0xfd   :  { %v3782_v61 = vld [vmem:[#allocation11 + $0x2c0] sm:$0xf] }
  0xfe   :  { %1392 = vmatpush.bf16.msra.mxu2 %v3267_v20  ;;  %v3527_v20 = vor.u32 %v4255_v12, %v3526_v9  ;;  %v4315_v9 = vld [vmem:[#allocation11 + $0x2ac] sm:$0xf0] }
  0xff   :  { %1406 = vmatpush.bf16.msra.mxu3 %v3395_v22  ;;  %1366 = vmatpush.bf16.msra.mxu0 %v2979_v25  ;;  %v3655_v22 = vor.u32 %v4287_v14, %v3654_v13  ;;  %v4251_v25 = vld [vmem:[#allocation11 + $0xac] sm:$0xf0]  ;;  %v3767_v12 = vor.u32 %v4315_v9, %v3766_v7  ;;  %v3558_v14 = vld [vmem:[#allocation11 + $0x100] sm:$0xf]  ;;  %v4269_v7 = vld [vmem:[#allocation11 + $0x144] sm:$0xf] }
 0x100   :  { %1380 = vmatpush.bf16.msra.mxu1 %v3107_v26  ;;  %v3315_v26 = vor.u32 %v4198_v18, %v3312_v19  ;;  %v3511_v30 = vor.u32 %v4251_v25, %v3510_v24  ;;  %v4311_v18 = vld [vmem:[#allocation11 + $0x28c] sm:$0xf0]  ;;  %v4241_v19 = vld [vmem:[#allocation11 + $0x64] sm:$0xf]  ;;  %v3672_v25 = vld [vmem:[#allocation11 + $0x1f0] sm:$0xf0] }
 0x101   :  { %v4289_v24 = vld [vmem:[#allocation11 + $0x1e4] sm:$0xf] }
 0x102   :  { %1393 = vmatpush.bf16.msra.mxu2 %v3251_v34  ;;  %v3622_v34 = vld [vmem:[#allocation11 + $0x180] sm:$0xf]  ;;  %v4317_v9 = vld [vmem:[#allocation11 + $0x2c4] sm:$0xf] }
 0x103   :  { %1407 = vmatpush.bf16.msra.mxu3 %v3379_v35  ;;  %1367 = vmatpush.bf16.msra.mxu0 %v2963_v38  ;;  %v4279_v35 = vld [vmem:[#allocation11 + $0x18c] sm:$0xf0] }
 0x104   :  { %1381 = vmatpush.bf16.msra.mxu1 %v3091_v39  ;;  %v3462_v39 = vld [vmem:[#allocation11 + $0x40] sm:$0xf] }
 0x105   :  { %v3463_v41 = vor.u32 %v4239_v40, %v3462_v39  ;;  %v3448_v39 = vld [vmem:[#allocation11 + $0x30] sm:$0xf0]  ;;  %v4281_v40 = vld [vmem:[#allocation11 + $0x1a4] sm:$0xf] }
 0x106   :  { %1394 = vmatpush.bf16.msra.mxu2 %v3235_v46  ;;  %v3643_v43 = vor.u32 %v4281_v40, %v3640_v42 }
 0x107   :  { %1408 = vmatpush.bf16.msra.mxu3 %v3363_v47  ;;  %1368 = vmatpush.bf16.msra.mxu0 %v2947_v51  ;;  %v3544_v47 = vld [vmem:[#allocation11 + $0xf0] sm:$0xf0]  ;;  %v3798_v51 = vld [vmem:[#allocation11 + $0x2e0] sm:$0xf] }
 0x108   :  { %1382 = vmatpush.bf16.msra.mxu1 %v3075_v52  ;;  %v3607_v52 = vor.u32 %v4275_v50, %v3606_v49  ;;  %v3799_v56 = vor.u32 %v4323_v53, %v3798_v51  ;;  %v3624_v49 = vld [vmem:[#allocation11 + $0x190] sm:$0xf0]  ;;  %v3686_v51 = vld [vmem:[#allocation11 + $0x200] sm:$0xf] }
 0x109   :  { %v3926_v53 = vld [vmem:[#allocation11 + $0x3e0] sm:$0xf] }
 0x10a   :  { %1395 = vmatpush.bf16.msra.mxu2 %v3219_v60  ;;  %v4271_v60 = vld [vmem:[#allocation11 + $0x14c] sm:$0xf0] }
 0x10b   :  { %1409 = vmatpush.bf16.msra.mxu3 %v3347_v1  ;;  %1369 = vmatpush.bf16.msra.mxu0 %v2931_v4  ;;  %v3591_v63 = vor.u32 %v4271_v60, %v3590_v59  ;;  %v3783_v1 = vor.u32 %v4319_v0, %v3782_v61  ;;  %v3515_v4 = vor.u32 %v4249_v2, %v3512_v3  ;;  %v3608_v59 = vld [vmem:[#allocation11 + $0x170] sm:$0xf0]  ;;  %v4715_v3 = vld [vmem:[#allocation10] sm:$0xf] }
 0x10c   :  { %1383 = vmatpush.bf16.msra.mxu1 %v3059_v5  ;;  %v3574_v5 = vld [vmem:[#allocation11 + $0x120] sm:$0xf]  ;;  %v3800_v0 = vld [vmem:[#allocation11 + $0x2f0] sm:$0xf0] }
 0x10e   :  { %1396 = vmatpush.bf16.msra.mxu2 %v3203_v11  ;;  %1370 = vmatmul.bf16.vlgmr.msra.gmra.mxu0 %v4691_v57  ;;  %v3478_v57 = vld [vmem:[#allocation11 + $0x60] sm:$0xf]  ;;  %v3496_v11 = vld [vmem:[#allocation11 + $0x90] sm:$0xf0] }
 0x10f   :  { %2208 = vmatpush.bf16.msrb.mxu0 %v3543_v8  ;;  %1410 = vmatpush.bf16.msra.mxu3 %v3331_v15  ;;  %v3479_v38 = vor.u32 %v4243_v37, %v3478_v57  ;;  %v3575_v8 = vor.u32 %v4267_v6, %v3574_v5  ;;  %v4263_v15 = vld [vmem:[#allocation11 + $0x10c] sm:$0xf0]  ;;  %v3718_v57 = vld [vmem:[#allocation11 + $0x240] sm:$0xf] }
 0x110   :  { %2222 = vmatpush.bf16.msrb.mxu1 %v3671_v10  ;;  %v4245_v10 = vld [vmem:[#allocation11 + $0x84] sm:$0xf]  ;;  %v3559_v17 = vor.u32 %v4263_v15, %v3558_v14  ;;  %v4303_v37 = vld [vmem:[#allocation11 + $0x24c] sm:$0xf0]  ;;  %v3894_v14 = vld [vmem:[#allocation11 + $0x3a0] sm:$0xf] }
 0x111   :  { %1384 = vmatmul.bf16.vlgmr.msra.gmra.mxu1 %v4693_v62  ;;  %v3623_v62 = vor.u32 %v4279_v35, %v3622_v34  ;;  %v3499_v13 = vor.u32 %v4245_v10, %v3496_v11  ;;  %v3467_v34 = vor.u32 %v4237_v31, %v3464_v32  ;;  %v3656_v35 = vld [vmem:[#allocation11 + $0x1d0] sm:$0xf0]  ;;  %v4351_v5 = vld [vmem:[#allocation11 + $0x3cc] sm:$0xf0]  ;;  %v4261_v31 = vld [vmem:[#allocation11 + $0x104] sm:$0xf] }
 0x112   :  { %1397 = vmatpush.bf16.msra.mxu2 %v3187_v23  ;;  %v3784_v11 = vld [vmem:[#allocation11 + $0x2d0] sm:$0xf0]  ;;  %v4347_v15 = vld [vmem:[#allocation11 + $0x3ac] sm:$0xf0] }
 0x113   :  { %2209 = vmatpush.bf16.msrb.mxu0 %v3527_v20  ;;  %1411 = vmatpush.bf16.msra.mxu3 %v3315_v26  ;;  %v3480_v20 = vld [vmem:[#allocation11 + $0x70] sm:$0xf0]  ;;  %v3675_v26 = vor.u32 %v4289_v24, %v3672_v25  ;;  %v3878_v25 = vld [vmem:[#allocation11 + $0x380] sm:$0xf] }
 0x114   :  { %2223 = vmatpush.bf16.msrb.mxu1 %v3655_v22  ;;  %v3751_v22 = vor.u32 %v4311_v18, %v3750_v16  ;;  %v3483_v23 = vor.u32 %v4241_v19, %v3480_v20  ;;  %v4265_v18 = vld [vmem:[#allocation11 + $0x124] sm:$0xf]  ;;  %v3576_v19 = vld [vmem:[#allocation11 + $0x130] sm:$0xf0] }
 0x115   :  { %1398 = vmatmul.bf16.vlgmr.msra.gmra.mxu2 %v4697_v21  ;;  %v3430_v21 = vld [vmem:[#allocation11] sm:$0xf]  ;;  %v4313_v20 = vld [vmem:[#allocation11 + $0x2a4] sm:$0xf]  ;;  %v3560_v32 = vld [vmem:[#allocation11 + $0x110] sm:$0xf0] }
 0x116   :  { %1412 = vmatmul.bf16.vlgmr.msra.gmra.mxu3 %v4699_v27  ;;  %v3431_v46 = vor.u32 %v4231_v45, %v3430_v21  ;;  %v4257_v27 = vld [vmem:[#allocation11 + $0xe4] sm:$0xf]  ;;  %2236 = vmatpush.bf16.msrb.mxu2 %v3799_v56  ;;  %v4299_v21 = vld [vmem:[#allocation11 + $0x22c] sm:$0xf0] }
 0x117   :  { %2210 = vmatpush.bf16.msrb.mxu0 %v3511_v30  ;;  %v3547_v48 = vor.u32 %v4257_v27, %v3544_v47  ;;  %v3735_v30 = vor.u32 %v4307_v29, %v3734_v28  ;;  %v3432_v27 = vld [vmem:[#allocation11 + $0x10] sm:$0xf0]  ;;  %v4277_v47 = vld [vmem:[#allocation11 + $0x184] sm:$0xf]  ;;  %v4355_v56 = vld [vmem:[#allocation11 + $0x3ec] sm:$0xf0] }
 0x118   :  { %2224 = vmatpush.bf16.msrb.mxu1 %v3639_v33  ;;  %v4285_v33 = vld [vmem:[#allocation11 + $0x1c4] sm:$0xf]  ;;  %v3627_v50 = vor.u32 %v4277_v47, %v3624_v49  ;;  %v3927_v60 = vor.u32 %v4355_v56, %v3926_v53 }
 0x119   :  { %v4301_v49 = vld [vmem:[#allocation11 + $0x244] sm:$0xf] }
 0x11a   :  { %2237 = vmatpush.bf16.msrb.mxu2 %v3783_v1  ;;  %2250 = vmatpush.bf16.msrb.mxu3 %v3927_v60  ;;  %v3830_v60 = vld [vmem:[#allocation11 + $0x320] sm:$0xf] }
 0x11b   :  { %2211 = vmatpush.bf16.msrb.mxu0 %v3495_v36  ;;  %v3659_v36 = vor.u32 %v4285_v33, %v3656_v35  ;;  %v4309_v33 = vld [vmem:[#allocation11 + $0x284] sm:$0xf]  ;;  %v3563_v35 = vor.u32 %v4261_v31, %v3560_v32  ;;  %v4252_v32 = vld [vmem:[#allocation11 + $0xb4] sm:$0xf0] }
 0x11c   :  { %2225 = vmatpush.bf16.msrb.mxu1 %v3623_v62  ;;  %v3719_v62 = vor.u32 %v4303_v37, %v3718_v57 }
 0x11e   :  { %2238 = vmatpush.bf16.msrb.mxu2 %v3767_v12  ;;  %v3787_v12 = vor.u32 %v4317_v9, %v3784_v11  ;;  %v3534_v9 = vld [vmem:[#allocation11 + $0xc8] sm:$0xf]  ;;  %v4256_v11 = vld [vmem:[#allocation11 + $0xd4] sm:$0xf0] }
 0x11f   :  { %2212 = vmatpush.bf16.msrb.mxu0 %v3479_v38  ;;  %v4233_v38 = vld [vmem:[#allocation11 + $0x24] sm:$0xf] }
 0x120   :  { %2226 = vmatpush.bf16.msrb.mxu1 %v3607_v52  ;;  %v4295_v52 = vld [vmem:[#allocation11 + $0x20c] sm:$0xf0] }
 0x121   :  { %v3687_v55 = vor.u32 %v4295_v52, %v3686_v51 }
 0x122   :  { %2239 = vmatpush.bf16.msrb.mxu2 %v3751_v22  ;;  %v3579_v22 = vor.u32 %v4265_v18, %v3576_v19  ;;  %v3688_v18 = vld [vmem:[#allocation11 + $0x210] sm:$0xf0]  ;;  %v4353_v19 = vld [vmem:[#allocation11 + $0x3e4] sm:$0xf] }
 0x123   :  { %2213 = vmatpush.bf16.msrb.mxu0 %v3463_v41  ;;  %v3451_v41 = vor.u32 %v4233_v38, %v3448_v39  ;;  %v4339_v38 = vld [vmem:[#allocation11 + $0x36c] sm:$0xf0] }
 0x124   :  { %2227 = vmatpush.bf16.msrb.mxu1 %v3591_v63  ;;  %v4321_v63 = vld [vmem:[#allocation11 + $0x2e4] sm:$0xf] }
 0x125   :  { %v3803_v2 = vor.u32 %v4321_v63, %v3800_v0  ;;  %v4260_v0 = vld [vmem:[#allocation11 + $0xf4] sm:$0xf0] }
 0x126   :  { %2240 = vmatpush.bf16.msrb.mxu2 %v3735_v30 }
 0x127   :  { %2214 = vmatpush.bf16.msrb.mxu0 %v3447_v44  ;;  %v3702_v44 = vld [vmem:[#allocation11 + $0x220] sm:$0xf] }
 0x128   :  { %2228 = vmatpush.bf16.msrb.mxu1 %v3575_v8  ;;  %v3703_v45 = vor.u32 %v4299_v21, %v3702_v44  ;;  %v3592_v8 = vld [vmem:[#allocation11 + $0x150] sm:$0xf0] }
 0x129   :  { %v3595_v10 = vor.u32 %v4269_v7, %v3592_v8  ;;  %v3736_v44 = vld [vmem:[#allocation11 + $0x270] sm:$0xf0] }
 0x12a   :  { %2241 = vmatpush.bf16.msrb.mxu2 %v3719_v62  ;;  %v3862_v62 = vld [vmem:[#allocation11 + $0x360] sm:$0xf] }
 0x12b   :  { %2215 = vmatpush.bf16.msrb.mxu0 %v3431_v46  ;;  %v4229_v46 = vld [vmem:[#allocation11 + $0x4] sm:$0xf]  ;;  %v3863_v42 = vor.u32 %v4339_v38, %v3862_v62  ;;  %v3502_v62 = vld [vmem:[#allocation11 + $0x88] sm:$0xf] }
 0x12c   :  { %2229 = vmatpush.bf16.msrb.mxu1 %v3559_v17  ;;  %v3895_v17 = vor.u32 %v4347_v15, %v3894_v14 }
 0x12e   :  { %2242 = vmatpush.bf16.msrb.mxu2 %v3703_v45 }
 0x12f   :  { %2264 = vmatpush.bf16.msra.mxu0 %v3547_v48  ;;  %v3435_v48 = vor.u32 %v4229_v46, %v3432_v27  ;;  %v3846_v46 = vld [vmem:[#allocation11 + $0x340] sm:$0xf]  ;;  %v4335_v27 = vld [vmem:[#allocation11 + $0x34c] sm:$0xf0] }
 0x130   :  { %2278 = vmatpush.bf16.msra.mxu1 %v3675_v26  ;;  %v4343_v26 = vld [vmem:[#allocation11 + $0x38c] sm:$0xf0] }
 0x131   :  { %v3879_v30 = vor.u32 %v4343_v26, %v3878_v25  ;;  %v3535_v26 = vor.u32 %v4256_v11, %v3534_v9 }
 0x132   :  { %2243 = vmatpush.bf16.msrb.mxu2 %v3687_v55 }
 0x133   :  { %2265 = vmatpush.bf16.msra.mxu0 %v3531_v58  ;;  %v4273_v58 = vld [vmem:[#allocation11 + $0x164] sm:$0xf] }
 0x134   :  { %2279 = vmatpush.bf16.msra.mxu1 %v3659_v36  ;;  %v3611_v61 = vor.u32 %v4273_v58, %v3608_v59  ;;  %v3752_v36 = vld [vmem:[#allocation11 + $0x290] sm:$0xf0]  ;;  %v3550_v59 = vld [vmem:[#allocation11 + $0xe8] sm:$0xf] }
 0x135   :  { %v3755_v37 = vor.u32 %v4309_v33, %v3752_v36  ;;  %v4349_v33 = vld [vmem:[#allocation11 + $0x3c4] sm:$0xf] }
 0x136   :  { %2292 = vmatpush.bf16.msra.mxu2 %v3803_v2  ;;  %v4297_v2 = vld [vmem:[#allocation11 + $0x224] sm:$0xf] }
 0x137   :  { %2266 = vmatpush.bf16.msra.mxu0 %v3515_v4  ;;  %v3910_v4 = vld [vmem:[#allocation11 + $0x3c0] sm:$0xf] }
 0x138   :  { %2280 = vmatpush.bf16.msra.mxu1 %v3643_v43  ;;  %v3911_v6 = vor.u32 %v4351_v5, %v3910_v4  ;;  %v4305_v43 = vld [vmem:[#allocation11 + $0x264] sm:$0xf]  ;;  %v3704_v4 = vld [vmem:[#allocation11 + $0x230] sm:$0xf0] }
 0x139   :  { %v3739_v21 = vor.u32 %v4305_v43, %v3736_v44 }
 0x13a   :  { %2251 = vmatpush.bf16.msrb.mxu3 %v3911_v6  ;;  %2293 = vmatpush.bf16.msra.mxu2 %v3787_v12  ;;  %v3707_v6 = vor.u32 %v4297_v2, %v3704_v4  ;;  %v3814_v12 = vld [vmem:[#allocation11 + $0x300] sm:$0xf]  ;;  %v4288_v2 = vld [vmem:[#allocation11 + $0x1d4] sm:$0xf0]  ;;  %v4337_v4 = vld [vmem:[#allocation11 + $0x364] sm:$0xf] }
 0x13b   :  { %2267 = vmatpush.bf16.msra.mxu0 %v3499_v13  ;;  %v546_v13 = vperm.slane %v4715_v3, 0 }
 0x13c   :  { %2281 = vmatpush.bf16.msra.mxu1 %v3627_v50  ;;  %v3720_v50 = vld [vmem:[#allocation11 + $0x250] sm:$0xf0] }
 0x13d   :  { %v3723_v52 = vor.u32 %v4301_v49, %v3720_v50  ;;  %v4292_v50 = vld [vmem:[#allocation11 + $0x1f4] sm:$0xf0] }
 0x13e   :  { %2252 = vmatpush.bf16.msrb.mxu3 %v3895_v17  ;;  %v4293_v17 = vld [vmem:[#allocation11 + $0x204] sm:$0xf] }
 0x13f   :  { %2268 = vmatpush.bf16.msra.mxu0 %v3483_v23  ;;  %v3768_v23 = vld [vmem:[#allocation11 + $0x2b0] sm:$0xf0] }
 0x140   :  { %2282 = vmatpush.bf16.msra.mxu1 %v3611_v61  ;;  %v3771_v24 = vor.u32 %v4313_v20, %v3768_v23  ;;  %v4331_v61 = vld [vmem:[#allocation11 + $0x32c] sm:$0xf0]  ;;  %v3928_v23 = vld [vmem:[#allocation11 + $0x3f0] sm:$0xf0] }
 0x141   :  { %v3931_v25 = vor.u32 %v4353_v19, %v3928_v23  ;;  %v3848_v19 = vld [vmem:[#allocation11 + $0x350] sm:$0xf0] }
 0x142   :  { %2294 = vmatpush.bf16.msra.mxu2 %v3771_v24  ;;  %2253 = vmatpush.bf16.msrb.mxu3 %v3879_v30 }
 0x143   :  { %2269 = vmatpush.bf16.msra.mxu0 %v3467_v34 }
 0x144   :  { %2283 = vmatpush.bf16.msra.mxu1 %v3595_v10  ;;  %v3551_v10 = vor.u32 %v4260_v0, %v3550_v59  ;;  %v3662_v0 = vld [vmem:[#allocation11 + $0x1c8] sm:$0xf] }
 0x146   :  { %2295 = vmatpush.bf16.msra.mxu2 %v3755_v37  ;;  %2254 = vmatpush.bf16.msrb.mxu3 %v3863_v42 }
 0x147   :  { %2270 = vmatpush.bf16.msra.mxu0 %v3451_v41 }
 0x148   :  { %2284 = vmatpush.bf16.msra.mxu1 %v3579_v22  ;;  %v3691_v22 = vor.u32 %v4293_v17, %v3688_v18  ;;  %v4284_v17 = vld [vmem:[#allocation11 + $0x1b4] sm:$0xf0]  ;;  %v4333_v18 = vld [vmem:[#allocation11 + $0x344] sm:$0xf] }
 0x149   :  { %v3851_v23 = vor.u32 %v4333_v18, %v3848_v19  ;;  %v3566_v19 = vld [vmem:[#allocation11 + $0x108] sm:$0xf] }
 0x14a   :  { %v1203_v54 = vpop.f32.mrf.mxu0  ;;  %2296 = vmatpush.bf16.msra.mxu2 %v3739_v21 }
 0x14b   :  { %2271 = vmatpush.bf16.msra.mxu0 %v3435_v48  ;;  %v1217_v1 = vpop.f32.mrf.mxu1  ;;  %v1204_v28 = vadd.f32 %v1203_v54, %v546_v13  ;;  %v3847_v48 = vor.u32 %v4335_v27, %v3846_v46  ;;  %v547_v54 = vperm.slane %v4715_v3, 1  ;;  %v3486_v27 = vld [vmem:[#allocation11 + $0x68] sm:$0xf] }
 0x14c   :  { %2285 = vmatpush.bf16.msra.mxu1 %v3563_v35 }
 0x14d   :  { %v1218_v39 = vadd.f32 %v1217_v1, %v1204_v28  ;;  %2255 = vmatpush.bf16.msrb.mxu3 %v3847_v48  ;;  %v3831_v1 = vor.u32 %v4331_v61, %v3830_v60  ;;  %v3518_v28 = vld [vmem:[#allocation11 + $0xa8] sm:$0xf] }
 0x14e   :  { %2297 = vmatpush.bf16.msra.mxu2 %v3723_v52  ;;  %v3519_v37 = vor.u32 %v4252_v32, %v3518_v28  ;;  %v3678_v48 = vld [vmem:[#allocation11 + $0x1e8] sm:$0xf]  ;;  %v3880_v52 = vld [vmem:[#allocation11 + $0x390] sm:$0xf0]  ;;  %v4280_v32 = vld [vmem:[#allocation11 + $0x194] sm:$0xf0] }
 0x14f   :  { %v3679_v60 = vor.u32 %v4292_v50, %v3678_v48  ;;  %v3470_v61 = vld [vmem:[#allocation11 + $0x48] sm:$0xf]  ;;  %v4324_v48 = vld [vmem:[#allocation11 + $0x2f4] sm:$0xf0]  ;;  %v3536_v50 = vld [vmem:[#allocation11 + $0xd8] sm:$0xf0] }
 0x150   :  { %v3438_v28 = vld [vmem:[#allocation11 + $0x8] sm:$0xf] }
 0x151   :  { %2256 = vmatpush.bf16.msrb.mxu3 %v3831_v1 }
 0x152   :  { %v1205_v16 = vpop.f32.mrf.mxu0  ;;  %2298 = vmatpush.bf16.msra.mxu2 %v3707_v6 }
 0x153   :  { %v1219_v29 = vpop.f32.mrf.mxu1  ;;  %v1206_v40 = vadd.f32 %v1205_v16, %v546_v13  ;;  %v4327_v13 = vld [vmem:[#allocation11 + $0x30c] sm:$0xf0] }
 0x154   :  { %v3815_v16 = vor.u32 %v4327_v13, %v3814_v12  ;;  %v3663_v12 = vor.u32 %v4288_v2, %v3662_v0  ;;  %v3454_v13 = vld [vmem:[#allocation11 + $0x28] sm:$0xf]  ;;  %v4250_v0 = vld [vmem:[#allocation11 + $0xac] sm:$0xf]  ;;  %v3520_v2 = vld [vmem:[#allocation11 + $0xb8] sm:$0xf0] }
 0x155   :  { %v1220_v47 = vadd.f32 %v1219_v29, %v1206_v40  ;;  %v4345_v40 = vld [vmem:[#allocation11 + $0x3a4] sm:$0xf] }
 0x156   :  { %2257 = vmatpush.bf16.msrb.mxu3 %v3815_v16  ;;  %2299 = vmatpush.bf16.msra.mxu2 %v3691_v22  ;;  %v3646_v16 = vld [vmem:[#allocation11 + $0x1a8] sm:$0xf] }
 0x158   :  { %v1231_v34 = vpop.f32.mrf.mxu2 }
 0x159   :  { %v1245_v57 = vpop.f32.mrf.mxu3  ;;  %v1232_v45 = vadd.f32 %v1231_v34, %v1218_v39  ;;  %v3912_v34 = vld [vmem:[#allocation11 + $0x3d0] sm:$0xf0]  ;;  %v4248_v39 = vld [vmem:[#allocation11 + $0x94] sm:$0xf0] }
 0x15a   :  { %v1259_v41 = vpop.f32.mrf.mxu0  ;;  %2306 = vmatpush.bf16.msra.mxu3 %v3931_v25  ;;  %v3915_v35 = vor.u32 %v4349_v33, %v3912_v34  ;;  %v3503_v46 = vor.u32 %v4248_v39, %v3502_v62  ;;  %v4329_v33 = vld [vmem:[#allocation11 + $0x324] sm:$0xf]  ;;  %v3832_v34 = vld [vmem:[#allocation11 + $0x330] sm:$0xf0] }
 0x15b   :  { %v1246_v53 = vadd.f32 %v1245_v57, %v1232_v45  ;;  %v1273_v55 = vpop.f32.mrf.mxu1  ;;  %v1260_v14 = vadd.f32 %v1259_v41, %v547_v54  ;;  %v3896_v41 = vld [vmem:[#allocation11 + $0x3b0] sm:$0xf0] }
 0x15c   :  { %v3899_v43 = vor.u32 %v4345_v40, %v3896_v41 }
 0x15d   :  { %v1418_v7 = vmax.f32 %v1246_v53, 0.0  ;;  %v1274_v29 = vadd.f32 %v1273_v55, %v1260_v14  ;;  %v548_v53 = vperm.slane %v4715_v3, 2  ;;  %v4236_v14 = vld [vmem:[#allocation11 + $0x34] sm:$0xf0] }
 0x15e   :  { %2307 = vmatpush.bf16.msra.mxu3 %v3915_v35  ;;  %v3455_v25 = vor.u32 %v4236_v14, %v3454_v13  ;;  %v3504_v13 = vld [vmem:[#allocation11 + $0x98] sm:$0xf0]  ;;  %v549_v14 = vperm.slane %v4715_v3, 3 }
 0x160   :  { %v1233_v51 = vpop.f32.mrf.mxu2 }
 0x161   :  { %v1234_v56 = vadd.f32 %v1233_v51, %v1220_v47  ;;  %v1247_v58 = vpop.f32.mrf.mxu3  ;;  %v4244_v47 = vld [vmem:[#allocation11 + $0x74] sm:$0xf0]  ;;  %v4341_v51 = vld [vmem:[#allocation11 + $0x384] sm:$0xf] }
 0x162   :  { %v1261_v5 = vpop.f32.mrf.mxu0  ;;  %2308 = vmatpush.bf16.msra.mxu3 %v3899_v43  ;;  %v3487_v59 = vor.u32 %v4244_v47, %v3486_v27  ;;  %v4276_v43 = vld [vmem:[#allocation11 + $0x174] sm:$0xf0]  ;;  %v3816_v27 = vld [vmem:[#allocation11 + $0x310] sm:$0xf0] }
 0x163   :  { %v1248_v63 = vadd.f32 %v1247_v58, %v1234_v56  ;;  %v1262_v30 = vadd.f32 %v1261_v5, %v547_v54  ;;  %v1275_v31 = vpop.f32.mrf.mxu1  ;;  %v3883_v54 = vor.u32 %v4341_v51, %v3880_v52  ;;  %v3864_v5 = vld [vmem:[#allocation11 + $0x370] sm:$0xf0] }
 0x165   :  { %v1422_v8 = vmax.f32 %v1248_v63, 0.0  ;;  %v1276_v38 = vadd.f32 %v1275_v31, %v1262_v30  ;;  %v4240_v63 = vld [vmem:[#allocation11 + $0x54] sm:$0xf0]  ;;  %v3630_v30 = vld [vmem:[#allocation11 + $0x188] sm:$0xf] }
 0x166   :  { %2309 = vmatpush.bf16.msra.mxu3 %v3883_v54  ;;  %v3471_v11 = vor.u32 %v4240_v63, %v3470_v61  ;;  %v3631_v41 = vor.u32 %v4280_v32, %v3630_v30  ;;  %v4320_v63 = vld [vmem:[#allocation11 + $0x2d4] sm:$0xf0]  ;;  %v3742_v32 = vld [vmem:[#allocation11 + $0x268] sm:$0xf] }
 0x167   :  { %v4719_v15 = vpack.c.bf16 %v1422_v8, %v1418_v7  ;;  %v3867_v8 = vor.u32 %v4337_v4, %v3864_v5 }
 0x168   :  { %v1287_v20 = vpop.f32.mrf.mxu2 }
 0x169   :  { %v1301_v24 = vpop.f32.mrf.mxu3  ;;  %2216 = vmatmul.bf16.vlgmr.msrb.gmra.mxu0 %v4719_v15  ;;  %v1288_v36 = vadd.f32 %v1287_v20, %v1274_v29  ;;  %v4232_v29 = vld [vmem:[#allocation11 + $0x14] sm:$0xf0] }
 0x16a   :  { %2320 = vmatpush.bf16.msrb.mxu0 %v3551_v10  ;;  %2310 = vmatpush.bf16.msra.mxu3 %v3867_v8  ;;  %v3582_v8 = vld [vmem:[#allocation11 + $0x128] sm:$0xf] }
 0x16b   :  { %v1315_v57 = vpop.f32.mrf.mxu0  ;;  %v1302_v44 = vadd.f32 %v1301_v24, %v1288_v36  ;;  %v4258_v36 = vld [vmem:[#allocation11 + $0xec] sm:$0xf] }
 0x16c   :  { %v1316_v6 = vadd.f32 %v1315_v57, %v548_v53  ;;  %v3552_v57 = vld [vmem:[#allocation11 + $0xf8] sm:$0xf0] }
 0x16d   :  { %v1419_v55 = vmax.f32 %v1302_v44, 0.0 }
 0x16e   :  { %2321 = vmatpush.bf16.msrb.mxu0 %v3535_v26  ;;  %v1329_v56 = vpop.f32.mrf.mxu1  ;;  %v3647_v26 = vor.u32 %v4284_v17, %v3646_v16  ;;  %2311 = vmatpush.bf16.msra.mxu3 %v3851_v23  ;;  %v4312_v23 = vld [vmem:[#allocation11 + $0x294] sm:$0xf0] }
 0x16f   :  { %v1330_v20 = vadd.f32 %v1329_v56, %v1316_v6 }
 0x170   :  { %v1289_v42 = vpop.f32.mrf.mxu2 }
 0x171   :  { %v1290_v21 = vadd.f32 %v1289_v42, %v1276_v38  ;;  %v1303_v45 = vpop.f32.mrf.mxu3  ;;  %v3439_v38 = vor.u32 %v4232_v29, %v3438_v28  ;;  %v3614_v42 = vld [vmem:[#allocation11 + $0x168] sm:$0xf]  ;;  %v4290_v28 = vld [vmem:[#allocation11 + $0x1ec] sm:$0xf]  ;;  %v3680_v29 = vld [vmem:[#allocation11 + $0x1f8] sm:$0xf0] }
 0x172   :  { %2322 = vmatpush.bf16.msrb.mxu0 %v3519_v37  ;;  %v3835_v37 = vor.u32 %v4329_v33, %v3832_v34  ;;  %v3615_v54 = vor.u32 %v4276_v43, %v3614_v42  ;;  %v3683_v34 = vor.u32 %v4290_v28, %v3680_v29  ;;  %v3726_v43 = vld [vmem:[#allocation11 + $0x248] sm:$0xf] }
 0x173   :  { %v1304_v49 = vadd.f32 %v1303_v45, %v1290_v21  ;;  %v1317_v7 = vpop.f32.mrf.mxu0  ;;  %v3555_v21 = vor.u32 %v4258_v36, %v3552_v57  ;;  %v3806_v45 = vld [vmem:[#allocation11 + $0x2e8] sm:$0xf]  ;;  %v4238_v36 = vld [vmem:[#allocation11 + $0x4c] sm:$0xf]  ;;  %v3472_v57 = vld [vmem:[#allocation11 + $0x58] sm:$0xf0] }
 0x174   :  { %v1318_v22 = vadd.f32 %v1317_v7, %v548_v53  ;;  %2312 = vmatpush.bf16.msra.mxu3 %v3835_v37  ;;  %v3523_v7 = vor.u32 %v4250_v0, %v3520_v2  ;;  %v3475_v42 = vor.u32 %v4238_v36, %v3472_v57  ;;  %v4278_v0 = vld [vmem:[#allocation11 + $0x18c] sm:$0xf]  ;;  %v3632_v2 = vld [vmem:[#allocation11 + $0x198] sm:$0xf0]  ;;  %v3918_v29 = vld [vmem:[#allocation11 + $0x3c8] sm:$0xf] }
 0x175   :  { %v1423_v58 = vmax.f32 %v1304_v49, 0.0  ;;  %v4254_v49 = vld [vmem:[#allocation11 + $0xcc] sm:$0xf]  ;;  %v3902_v57 = vld [vmem:[#allocation11 + $0x3a8] sm:$0xf] }
 0x176   :  { %2323 = vmatpush.bf16.msrb.mxu0 %v3503_v46  ;;  %v1331_v31 = vpop.f32.mrf.mxu1  ;;  %v4325_v46 = vld [vmem:[#allocation11 + $0x304] sm:$0xf]  ;;  %v3539_v56 = vor.u32 %v4254_v49, %v3536_v50  ;;  %v3648_v49 = vld [vmem:[#allocation11 + $0x1b8] sm:$0xf0] }
 0x177   :  { %v4723_v1 = vpack.c.bf16 %v1423_v58, %v1419_v55  ;;  %v1332_v35 = vadd.f32 %v1331_v31, %v1318_v22  ;;  %v3819_v51 = vor.u32 %v4325_v46, %v3816_v27  ;;  %v3807_v55 = vor.u32 %v4324_v48, %v3806_v45  ;;  %v3598_v58 = vld [vmem:[#allocation11 + $0x148] sm:$0xf]  ;;  %v4304_v46 = vld [vmem:[#allocation11 + $0x254] sm:$0xf0]  ;;  %v4234_v27 = vld [vmem:[#allocation11 + $0x2c] sm:$0xf] }
 0x178   :  { %v1343_v9 = vpop.f32.mrf.mxu2  ;;  %v3758_v22 = vld [vmem:[#allocation11 + $0x288] sm:$0xf]  ;;  %v4282_v48 = vld [vmem:[#allocation11 + $0x1ac] sm:$0xf] }
 0x179   :  { %v1357_v10 = vpop.f32.mrf.mxu3  ;;  %2230 = vmatmul.bf16.vlgmr.msrb.gmra.mxu1 %v4723_v1  ;;  %2272 = vmatmul.bf16.vlgmr.msra.gmra.mxu0 %v4719_v15  ;;  %v1344_v24 = vadd.f32 %v1343_v9, %v1330_v20  ;;  %v4268_v9 = vld [vmem:[#allocation11 + $0x134] sm:$0xf0]  ;;  %v3759_v3 = vor.u32 %v4312_v23, %v3758_v22 }
 0x17a   :  { %2324 = vmatpush.bf16.msrb.mxu0 %v3487_v59  ;;  %2334 = vmatpush.bf16.msrb.mxu1 %v3679_v60  ;;  %v4272_v59 = vld [vmem:[#allocation11 + $0x154] sm:$0xf0]  ;;  %v3790_v60 = vld [vmem:[#allocation11 + $0x2c8] sm:$0xf]  ;;  %v3583_v16 = vor.u32 %v4268_v9, %v3582_v8 }
 0x17b   :  { %v1358_v39 = vadd.f32 %v1357_v10, %v1344_v24  ;;  %2313 = vmatpush.bf16.msra.mxu3 %v3819_v51  ;;  %v3599_v4 = vor.u32 %v4272_v59, %v3598_v58  ;;  %v3791_v6 = vor.u32 %v4320_v63, %v3790_v60  ;;  %v3774_v10 = vld [vmem:[#allocation11 + $0x2a8] sm:$0xf]  ;;  %v4264_v20 = vld [vmem:[#allocation11 + $0x114] sm:$0xf0]  ;;  %v4242_v24 = vld [vmem:[#allocation11 + $0x6c] sm:$0xf] }
 0x17c   :  { %v3567_v30 = vor.u32 %v4264_v20, %v3566_v19  ;;  %v4300_v58 = vld [vmem:[#allocation11 + $0x234] sm:$0xf0]  ;;  %v4230_v59 = vld [vmem:[#allocation11 + $0xc] sm:$0xf]  ;;  %v3440_v60 = vld [vmem:[#allocation11 + $0x18] sm:$0xf0] }
 0x17d   :  { %v1420_v52 = vmax.f32 %v1358_v39, 0.0  ;;  %v3664_v39 = vld [vmem:[#allocation11 + $0x1d8] sm:$0xf0]  ;;  %v3443_v8 = vor.u32 %v4230_v59, %v3440_v60  ;;  %v3694_v9 = vld [vmem:[#allocation11 + $0x208] sm:$0xf] }
 0x17e   :  { %2325 = vmatpush.bf16.msrb.mxu0 %v3471_v11  ;;  %2335 = vmatpush.bf16.msrb.mxu1 %v3663_v12  ;;  %v4316_v11 = vld [vmem:[#allocation11 + $0x2b4] sm:$0xf0]  ;;  %v4246_v12 = vld [vmem:[#allocation11 + $0x8c] sm:$0xf]  ;;  %v3808_v19 = vld [vmem:[#allocation11 + $0x2f8] sm:$0xf0] }
 0x17f   :  { %v3775_v17 = vor.u32 %v4316_v11, %v3774_v10  ;;  %v3507_v18 = vor.u32 %v4246_v12, %v3504_v13  ;;  %v4296_v10 = vld [vmem:[#allocation11 + $0x214] sm:$0xf0]  ;;  %v3635_v12 = vor.u32 %v4278_v0, %v3632_v2  ;;  %v3934_v13 = vld [vmem:[#allocation11 + $0x3e8] sm:$0xf]  ;;  %v4302_v59 = vld [vmem:[#allocation11 + $0x24c] sm:$0xf] }
 0x180   :  { %v1345_v62 = vpop.f32.mrf.mxu2  ;;  %v3695_v23 = vor.u32 %v4296_v10, %v3694_v9  ;;  %v3728_v60 = vld [vmem:[#allocation11 + $0x258] sm:$0xf0]  ;;  %v3838_v2 = vld [vmem:[#allocation11 + $0x328] sm:$0xf]  ;;  %v4328_v10 = vld [vmem:[#allocation11 + $0x314] sm:$0xf0] }
 0x181   :  { %v1346_v40 = vadd.f32 %v1345_v62, %v1332_v35  ;;  %v1359_v44 = vpop.f32.mrf.mxu3  ;;  %v4308_v35 = vld [vmem:[#allocation11 + $0x274] sm:$0xf0]  ;;  %v3731_v0 = vor.u32 %v4302_v59, %v3728_v60  ;;  %v3822_v9 = vld [vmem:[#allocation11 + $0x308] sm:$0xf]  ;;  %v4365_v59 = vld [vmem:[#allocation13 + $0x40] sm:$0xff] }
 0x182   :  { %2326 = vmatpush.bf16.msrb.mxu0 %v3455_v25  ;;  %2336 = vmatpush.bf16.msrb.mxu1 %v3647_v26  ;;  %v3488_v25 = vld [vmem:[#allocation11 + $0x78] sm:$0xf0]  ;;  %v4377_v60 = vld [vmem:[#allocation13 + $0xa0] sm:$0xff] }
 0x183   :  { %v1360_v47 = vadd.f32 %v1359_v44, %v1346_v40  ;;  %v3491_v31 = vor.u32 %v4242_v24, %v3488_v25 }
 0x185   :  { %v1424_v53 = vmax.f32 %v1360_v47, 0.0  ;;  %v3456_v47 = vld [vmem:[#allocation11 + $0x38] sm:$0xf0] }
 0x186   :  { %2327 = vmatpush.bf16.msrb.mxu0 %v3439_v38  ;;  %2337 = vmatpush.bf16.msrb.mxu1 %v3631_v41  ;;  %v4286_v38 = vld [vmem:[#allocation11 + $0x1cc] sm:$0xf]  ;;  %v3743_v41 = vor.u32 %v4308_v35, %v3742_v32 }
 0x187   :  { %v4727_v61 = vpack.c.bf16 %v1424_v53, %v1420_v52  ;;  %v3667_v45 = vor.u32 %v4286_v38, %v3664_v39  ;;  %v3727_v52 = vor.u32 %v4304_v46, %v3726_v43  ;;  %v3459_v53 = vor.u32 %v4234_v27, %v3456_v47  ;;  %v4318_v32 = vld [vmem:[#allocation11 + $0x2cc] sm:$0xf]  ;;  %v3584_v38 = vld [vmem:[#allocation11 + $0x138] sm:$0xf0]  ;;  %v3886_v43 = vld [vmem:[#allocation11 + $0x388] sm:$0xf] }
 0x188   :  { %v4314_v39 = vld [vmem:[#allocation11 + $0x2ac] sm:$0xf]  ;;  %v3760_v27 = vld [vmem:[#allocation11 + $0x298] sm:$0xf0] }
 0x189   :  { %2286 = vmatmul.bf16.vlgmr.msra.gmra.mxu1 %v4723_v1  ;;  %2328 = vmatmul.bf16.vlgmr.msrb.gmra.mxu0 %v4719_v15  ;;  %v4310_v46 = vld [vmem:[#allocation11 + $0x28c] sm:$0xf] }
 0x18a   :  { %2376 = vmatpush.bf16.msra.mxu0 %v3555_v21  ;;  %2244 = vmatmul.bf16.vlgmr.msrb.gmra.mxu2 %v4727_v61 }
 0x18b   :  { %2338 = vmatpush.bf16.msrb.mxu1 %v3615_v54  ;;  %v1371_v5 = vpop.f32.mrf.mxu0  ;;  %2348 = vmatpush.bf16.msrb.mxu2 %v3807_v55  ;;  %v3710_v54 = vld [vmem:[#allocation11 + $0x228] sm:$0xf] }
 0x18c   :  { %v1372_v33 = vadd.f32 %v1371_v5, %v549_v14 }
 0x18e   :  { %2377 = vmatpush.bf16.msra.mxu0 %v3539_v56  ;;  %v1385_v26 = vpop.f32.mrf.mxu1  ;;  %v3651_v56 = vor.u32 %v4282_v48, %v3648_v49  ;;  %v3763_v49 = vor.u32 %v4310_v46, %v3760_v27  ;;  %v4369_v46 = vld [vmem:[#allocation13 + $0x60] sm:$0xff] }
 0x18f   :  { %2339 = vmatpush.bf16.msrb.mxu1 %v3599_v4  ;;  %2349 = vmatpush.bf16.msrb.mxu2 %v3791_v6  ;;  %v1386_v44 = vadd.f32 %v1385_v26, %v1372_v33  ;;  %v3792_v33 = vld [vmem:[#allocation11 + $0x2d8] sm:$0xf0] }
 0x190   :  { %v3795_v36 = vor.u32 %v4318_v32, %v3792_v33  ;;  %v4334_v32 = vld [vmem:[#allocation11 + $0x34c] sm:$0xf]  ;;  %v3856_v33 = vld [vmem:[#allocation11 + $0x358] sm:$0xf0] }
 0x192   :  { %2378 = vmatpush.bf16.msra.mxu0 %v3523_v7  ;;  %v3711_v7 = vor.u32 %v4300_v58, %v3710_v54  ;;  %v4336_v58 = vld [vmem:[#allocation11 + $0x354] sm:$0xf0] }
 0x193   :  { %2340 = vmatpush.bf16.msrb.mxu1 %v3583_v16  ;;  %2350 = vmatpush.bf16.msrb.mxu2 %v3775_v17  ;;  %v1373_v37 = vpop.f32.mrf.mxu0  ;;  %v4274_v16 = vld [vmem:[#allocation11 + $0x16c] sm:$0xf]  ;;  %v3616_v17 = vld [vmem:[#allocation11 + $0x178] sm:$0xf0] }
 0x194   :  { %v1374_v21 = vadd.f32 %v1373_v37, %v549_v14  ;;  %v4356_v14 = vld [vmem:[#allocation11 + $0x3f4] sm:$0xf0]  ;;  %v3619_v26 = vor.u32 %v4274_v16, %v3616_v17  ;;  %v3823_v16 = vor.u32 %v4328_v10, %v3822_v9  ;;  %v4375_v9 = vld [vmem:[#allocation13 + $0x90] sm:$0xff] }
 0x195   :  { %v3935_v24 = vor.u32 %v4356_v14, %v3934_v13  ;;  %v4348_v37 = vld [vmem:[#allocation11 + $0x3b4] sm:$0xf0]  ;;  %v4354_v13 = vld [vmem:[#allocation11 + $0x3ec] sm:$0xf]  ;;  %v3936_v14 = vld [vmem:[#allocation11 + $0x3f8] sm:$0xf0] }
 0x196   :  { %2379 = vmatpush.bf16.msra.mxu0 %v3507_v18  ;;  %v1387_v51 = vpop.f32.mrf.mxu1  ;;  %v4322_v18 = vld [vmem:[#allocation11 + $0x2ec] sm:$0xf]  ;;  %v3939_v17 = vor.u32 %v4354_v13, %v3936_v14 }
 0x197   :  { %2341 = vmatpush.bf16.msrb.mxu1 %v3567_v30  ;;  %2351 = vmatpush.bf16.msrb.mxu2 %v3759_v3  ;;  %v1388_v55 = vadd.f32 %v1387_v51, %v1374_v21  ;;  %v3811_v28 = vor.u32 %v4322_v18, %v3808_v19  ;;  %v4352_v30 = vld [vmem:[#allocation11 + $0x3d4] sm:$0xf0]  ;;  %v4270_v3 = vld [vmem:[#allocation11 + $0x14c] sm:$0xf]  ;;  %v3920_v19 = vld [vmem:[#allocation11 + $0x3d8] sm:$0xf0] }
 0x198   :  { %v1399_v62 = vpop.f32.mrf.mxu2  ;;  %v4262_v21 = vld [vmem:[#allocation11 + $0x10c] sm:$0xf]  ;;  %v4340_v51 = vld [vmem:[#allocation11 + $0x374] sm:$0xf0] }
 0x199   :  { %v1413_v40 = vpop.f32.mrf.mxu3  ;;  %v1400_v50 = vadd.f32 %v1399_v62, %v1386_v44  ;;  %v4266_v62 = vld [vmem:[#allocation11 + $0x12c] sm:$0xf]  ;;  %v4344_v44 = vld [vmem:[#allocation11 + $0x394] sm:$0xf0] }
 0x19a   :  { %2380 = vmatpush.bf16.msra.mxu0 %v3491_v31  ;;  %2342 = vmatmul.bf16.vlgmr.msrb.gmra.mxu1 %v4723_v1  ;;  %v3600_v31 = vld [vmem:[#allocation11 + $0x158] sm:$0xf0]  ;;  %v3887_v47 = vor.u32 %v4344_v44, %v3886_v43  ;;  %v4350_v18 = vld [vmem:[#allocation11 + $0x3cc] sm:$0xf]  ;;  %v4359_v43 = vld [vmem:[#allocation13 + $0x10] sm:$0xff] }
 0x19b   :  { %2390 = vmatpush.bf16.msra.mxu1 %v3683_v34  ;;  %2300 = vmatmul.bf16.vlgmr.msra.gmra.mxu2 %v4727_v61  ;;  %v1414_v4 = vadd.f32 %v1413_v40, %v1400_v50  ;;  %v3919_v34 = vor.u32 %v4352_v30, %v3918_v29  ;;  %v3603_v35 = vor.u32 %v4270_v3, %v3600_v31  ;;  %v3776_v40 = vld [vmem:[#allocation11 + $0x2b8] sm:$0xf0]  ;;  %v3870_v50 = vld [vmem:[#allocation11 + $0x368] sm:$0xf]  ;;  %v4338_v30 = vld [vmem:[#allocation11 + $0x36c] sm:$0xf] }
 0x19c   :  { %2352 = vmatpush.bf16.msrb.mxu2 %v3743_v41  ;;  %v3903_v41 = vor.u32 %v4348_v37, %v3902_v57  ;;  %v3871_v54 = vor.u32 %v4340_v51, %v3870_v50  ;;  %v3872_v3 = vld [vmem:[#allocation11 + $0x378] sm:$0xf0]  ;;  %v4326_v37 = vld [vmem:[#allocation11 + $0x30c] sm:$0xf]  ;;  %v4371_v44 = vld [vmem:[#allocation13 + $0x70] sm:$0xff] }
 0x19d   :  { %v1421_v20 = vmax.f32 %v1414_v4, 0.0  ;;  %v4332_v4 = vld [vmem:[#allocation11 + $0x334] sm:$0xf0]  ;;  %v3875_v31 = vor.u32 %v4338_v30, %v3872_v3  ;;  %v4367_v51 = vld [vmem:[#allocation13 + $0x50] sm:$0xff] }
 0x19e   :  { %2381 = vmatpush.bf16.msra.mxu0 %v3475_v42  ;;  %v3779_v42 = vor.u32 %v4314_v39, %v3776_v40  ;;  %v4363_v39 = vld [vmem:[#allocation13 + $0x30] sm:$0xff]  ;;  %v4362_v40 = vld [vmem:[#allocation13 + $0x28] sm:$0xff] }
 0x19f   :  { %2391 = vmatpush.bf16.msra.mxu1 %v3667_v45  ;;  %v3568_v45 = vld [vmem:[#allocation11 + $0x118] sm:$0xf0]  ;;  %v4387_v30 = vld [vmem:[#allocation13 + $0xf0] sm:$0xff] }
 0x1a0   :  { %v1401_v63 = vpop.f32.mrf.mxu2  ;;  %2353 = vmatpush.bf16.msrb.mxu2 %v3727_v52  ;;  %v3571_v48 = vor.u32 %v4262_v21, %v3568_v45  ;;  %v4306_v52 = vld [vmem:[#allocation11 + $0x26c] sm:$0xf] }
 0x1a1   :  { %v1402_v5 = vadd.f32 %v1401_v63, %v1388_v55  ;;  %v1415_v6 = vpop.f32.mrf.mxu3  ;;  %v4358_v21 = vld [vmem:[#allocation13 + $0x8] sm:$0xff] }
 0x1a2   :  { %2382 = vmatpush.bf16.msra.mxu0 %v3459_v53  ;;  %v3744_v53 = vld [vmem:[#allocation11 + $0x278] sm:$0xf0]  ;;  %v4370_v45 = vld [vmem:[#allocation13 + $0x68] sm:$0xff] }
 0x1a3   :  { %v1416_v11 = vadd.f32 %v1415_v6, %v1402_v5  ;;  %2392 = vmatpush.bf16.msra.mxu1 %v3651_v56  ;;  %v3747_v55 = vor.u32 %v4306_v52, %v3744_v53  ;;  %v3854_v56 = vld [vmem:[#allocation11 + $0x348] sm:$0xf]  ;;  %v4298_v5 = vld [vmem:[#allocation11 + $0x22c] sm:$0xf]  ;;  %v3712_v6 = vld [vmem:[#allocation11 + $0x238] sm:$0xf0] }
 0x1a4   :  { %2354 = vmatpush.bf16.msrb.mxu2 %v3711_v7  ;;  %v3855_v63 = vor.u32 %v4336_v58, %v3854_v56  ;;  %v3839_v7 = vor.u32 %v4332_v4, %v3838_v2  ;;  %v4379_v52 = vld [vmem:[#allocation13 + $0xb0] sm:$0xff]  ;;  %v4366_v53 = vld [vmem:[#allocation13 + $0x48] sm:$0xff]  ;;  %v4376_v2 = vld [vmem:[#allocation13 + $0x98] sm:$0xff] }
 0x1a5   :  { %v1425_v22 = vmax.f32 %v1416_v11, 0.0  ;;  %v4294_v11 = vld [vmem:[#allocation11 + $0x20c] sm:$0xf]  ;;  %v4748_v56 = vld [vmem:[%s4766_s6] sm:$0xf] }
 0x1a6   :  { %2383 = vmatpush.bf16.msra.mxu0 %v3443_v8  ;;  %v3715_v8 = vor.u32 %v4298_v5, %v3712_v6 }
 0x1a7   :  { %v4735_v25 = vpack.c.bf16 %v1425_v22, %v1421_v20  ;;  %2393 = vmatpush.bf16.msra.mxu1 %v3635_v12  ;;  %v3696_v12 = vld [vmem:[#allocation11 + $0x218] sm:$0xf0]  ;;  %v3923_v20 = vor.u32 %v4350_v18, %v3920_v19  ;;  %v4346_v22 = vld [vmem:[#allocation11 + $0x3ac] sm:$0xf] }
 0x1a8   :  { %2355 = vmatpush.bf16.msrb.mxu2 %v3695_v23  ;;  %v3904_v23 = vld [vmem:[#allocation11 + $0x3b8] sm:$0xf0] }
 0x1a9   :  { %2258 = vmatmul.bf16.vlgmr.msrb.gmra.mxu3 %v4735_v25  ;;  %2384 = vmatmul.bf16.vlgmr.msra.gmra.mxu0 %v4719_v15  ;;  %v3587_v15 = vor.u32 %v4266_v62, %v3584_v38  ;;  %v4364_v38 = vld [vmem:[#allocation13 + $0x38] sm:$0xff] }
 0x1aa   :  { %2362 = vmatpush.bf16.msrb.mxu3 %v3935_v24  ;;  %v3907_v24 = vor.u32 %v4346_v22, %v3904_v23  ;;  %2704 = vmatpush.bf16.msrb.mxu0 %v4364_v38  ;;  %v4373_v22 = vld [vmem:[#allocation13 + $0x80] sm:$0xff]  ;;  %v4388_v23 = vld [vmem:[#allocation13 + $0xf8] sm:$0xff] }
 0x1ab   :  { %2394 = vmatpush.bf16.msra.mxu1 %v3619_v26  ;;  %2356 = vmatmul.bf16.vlgmr.msrb.gmra.mxu2 %v4727_v61  ;;  %v4342_v26 = vld [vmem:[#allocation11 + $0x38c] sm:$0xf] }
 0x1ac   :  { %2404 = vmatpush.bf16.msra.mxu2 %v3811_v28  ;;  %v3888_v28 = vld [vmem:[#allocation11 + $0x398] sm:$0xf0] }
 0x1ad   :  { %v3891_v29 = vor.u32 %v4342_v26, %v3888_v28  ;;  %v1561_v26 = vperm.slane %v4748_v56, 1 }
 0x1ae   :  { %2363 = vmatpush.bf16.msrb.mxu3 %v3919_v34  ;;  %v3859_v34 = vor.u32 %v4334_v32, %v3856_v33  ;;  %2705 = vmatpush.bf16.msrb.mxu0 %v4363_v39  ;;  %v4386_v33 = vld [vmem:[#allocation13 + $0xe8] sm:$0xff] }
 0x1af   :  { %2395 = vmatpush.bf16.msra.mxu1 %v3603_v35  ;;  %v4330_v35 = vld [vmem:[#allocation11 + $0x32c] sm:$0xf] }
 0x1b0   :  { %2405 = vmatpush.bf16.msra.mxu2 %v3795_v36  ;;  %v3840_v36 = vld [vmem:[#allocation11 + $0x338] sm:$0xf0] }
 0x1b1   :  { %v3843_v57 = vor.u32 %v4330_v35, %v3840_v36 }
 0x1b2   :  { %2364 = vmatpush.bf16.msrb.mxu3 %v3903_v41  ;;  %2706 = vmatpush.bf16.msrb.mxu0 %v4362_v40  ;;  %v4361_v41 = vld [vmem:[#allocation13 + $0x20] sm:$0xff] }
 0x1b3   :  { %2396 = vmatpush.bf16.msra.mxu1 %v3587_v15  ;;  %v4360_v15 = vld [vmem:[#allocation13 + $0x18] sm:$0xff] }
 0x1b4   :  { %2406 = vmatpush.bf16.msra.mxu2 %v3779_v42  ;;  %v4372_v42 = vld [vmem:[#allocation13 + $0x78] sm:$0xff] }
 0x1b6   :  { %2365 = vmatpush.bf16.msrb.mxu3 %v3887_v47  ;;  %2707 = vmatpush.bf16.msrb.mxu0 %v4361_v41  ;;  %v4368_v47 = vld [vmem:[#allocation13 + $0x58] sm:$0xff] }
 0x1b7   :  { %2397 = vmatpush.bf16.msra.mxu1 %v3571_v48  ;;  %v4380_v48 = vld [vmem:[#allocation13 + $0xb8] sm:$0xff] }
 0x1b8   :  { %2407 = vmatpush.bf16.msra.mxu2 %v3763_v49 }
 0x1b9   :  { %2314 = vmatmul.bf16.vlgmr.msra.gmra.mxu3 %v4735_v25 }
 0x1ba   :  { %2366 = vmatpush.bf16.msrb.mxu3 %v3871_v54  ;;  %2398 = vmatmul.bf16.vlgmr.msra.gmra.mxu1 %v4723_v1  ;;  %v3699_v1 = vor.u32 %v4294_v11, %v3696_v12  ;;  %v4378_v54 = vld [vmem:[#allocation13 + $0xa8] sm:$0xff] }
 0x1bb   :  { %2708 = vmatpush.bf16.msrb.mxu0 %v4360_v15  ;;  %2718 = vmatpush.bf16.msrb.mxu1 %v4372_v42 }
 0x1bc   :  { %2408 = vmatpush.bf16.msra.mxu2 %v3747_v55 }
 0x1be   :  { %2367 = vmatpush.bf16.msrb.mxu3 %v3855_v63 }
 0x1bf   :  { %2709 = vmatpush.bf16.msrb.mxu0 %v4359_v43  ;;  %2719 = vmatpush.bf16.msrb.mxu1 %v4371_v44  ;;  %v4384_v44 = vld [vmem:[#allocation13 + $0xd8] sm:$0xff] }
 0x1c0   :  { %2409 = vmatpush.bf16.msra.mxu2 %v3731_v0  ;;  %v1560_v0 = vperm.slane %v4748_v56, 0 }
 0x1c2   :  { %2368 = vmatpush.bf16.msrb.mxu3 %v3839_v7 }
 0x1c3   :  { %2710 = vmatpush.bf16.msrb.mxu0 %v4358_v21  ;;  %2720 = vmatpush.bf16.msrb.mxu1 %v4370_v45  ;;  %v1562_v21 = vperm.slane %v4748_v56, 2 }
 0x1c4   :  { %2410 = vmatpush.bf16.msra.mxu2 %v3715_v8 }
 0x1c6   :  { %2369 = vmatpush.bf16.msrb.mxu3 %v3823_v16 }
 0x1c7   :  { %2721 = vmatpush.bf16.msrb.mxu1 %v4369_v46 }
 0x1c8   :  { %2411 = vmatpush.bf16.msra.mxu2 %v3699_v1  ;;  %v4374_v1 = vld [vmem:[#allocation13 + $0x88] sm:$0xff] }
 0x1c9   :  { %2370 = vmatmul.bf16.vlgmr.msrb.gmra.mxu3 %v4735_v25 }
 0x1ca   :  { %2418 = vmatpush.bf16.msra.mxu3 %v3939_v17 }
 0x1cb   :  { %2412 = vmatmul.bf16.vlgmr.msra.gmra.mxu2 %v4727_v61  ;;  %v3824_v61 = vld [vmem:[#allocation11 + $0x318] sm:$0xf0]  ;;  %2722 = vmatpush.bf16.msrb.mxu1 %v4368_v47 }
 0x1cc   :  { %v3827_v62 = vor.u32 %v4326_v37, %v3824_v61  ;;  %2732 = vmatpush.bf16.msrb.mxu2 %v4380_v48  ;;  %v4385_v37 = vld [vmem:[#allocation13 + $0xe0] sm:$0xff] }
 0x1ce   :  { %2419 = vmatpush.bf16.msra.mxu3 %v3923_v20 }
 0x1cf   :  { %2723 = vmatpush.bf16.msrb.mxu1 %v4367_v51  ;;  %v4382_v51 = vld [vmem:[#allocation13 + $0xc8] sm:$0xff] }
 0x1d0   :  { %2733 = vmatpush.bf16.msrb.mxu2 %v4379_v52 }
 0x1d2   :  { %2420 = vmatpush.bf16.msra.mxu3 %v3907_v24 }
 0x1d3   :  { %2724 = vmatpush.bf16.msrb.mxu1 %v4366_v53 }
 0x1d4   :  { %2734 = vmatpush.bf16.msrb.mxu2 %v4378_v54 }
 0x1d6   :  { %2421 = vmatpush.bf16.msra.mxu3 %v3891_v29 }
 0x1d7   :  { %2725 = vmatpush.bf16.msrb.mxu1 %v4365_v59  ;;  %v4381_v59 = vld [vmem:[#allocation13 + $0xc0] sm:$0xff] }
 0x1d8   :  { %2735 = vmatpush.bf16.msrb.mxu2 %v4377_v60 }
 0x1da   :  { %2422 = vmatpush.bf16.msra.mxu3 %v3875_v31 }
 0x1dc   :  { %2736 = vmatpush.bf16.msrb.mxu2 %v4376_v2 }
 0x1de   :  { %2423 = vmatpush.bf16.msra.mxu3 %v3859_v34 }
 0x1e0   :  { %2737 = vmatpush.bf16.msrb.mxu2 %v4375_v9 }
 0x1e2   :  { %2424 = vmatpush.bf16.msra.mxu3 %v3843_v57 }
 0x1e4   :  { %2738 = vmatpush.bf16.msrb.mxu2 %v4374_v1 }
 0x1e6   :  { %2425 = vmatpush.bf16.msra.mxu3 %v3827_v62  ;;  %v2217_v27 = vpop.f32.mrf.mxu0 }
 0x1e7   :  { %v2218_v5 = vadd.f32 %v2217_v27, %v1560_v0 }
 0x1e8   :  { %2739 = vmatpush.bf16.msrb.mxu2 %v4373_v22 }
 0x1e9   :  { %2426 = vmatmul.bf16.vlgmr.msra.gmra.mxu3 %v4735_v25  ;;  %v4357_v25 = vld [vmem:[#allocation13] sm:$0xff] }
 0x1ea   :  { %2711 = vmatpush.bf16.msrb.mxu0 %v4357_v25  ;;  %2746 = vmatpush.bf16.msrb.mxu3 %v4388_v23  ;;  %v4383_v25 = vld [vmem:[#allocation13 + $0xd0] sm:$0xff] }
 0x1ee   :  { %v2219_v55 = vpop.f32.mrf.mxu0  ;;  %2747 = vmatpush.bf16.msrb.mxu3 %v4387_v30 }
 0x1ef   :  { %v2220_v7 = vadd.f32 %v2219_v55, %v1560_v0 }
 0x1f2   :  { %2748 = vmatpush.bf16.msrb.mxu3 %v4386_v33 }
 0x1f6   :  { %v2231_v49 = vpop.f32.mrf.mxu1  ;;  %v2273_v6 = vpop.f32.mrf.mxu0  ;;  %2749 = vmatpush.bf16.msrb.mxu3 %v4385_v37 }
 0x1f7   :  { %v2232_v8 = vadd.f32 %v2231_v49, %v2218_v5  ;;  %v2274_v32 = vadd.f32 %v2273_v6, %v1561_v26 }
 0x1fa   :  { %2750 = vmatpush.bf16.msrb.mxu3 %v4384_v44 }
 0x1fe   :  { %v2233_v58 = vpop.f32.mrf.mxu1  ;;  %v2275_v24 = vpop.f32.mrf.mxu0  ;;  %2751 = vmatpush.bf16.msrb.mxu3 %v4383_v25 }
 0x1ff   :  { %v2234_v11 = vadd.f32 %v2233_v58, %v2220_v7  ;;  %v2276_v34 = vadd.f32 %v2275_v24, %v1561_v26 }
 0x202   :  { %2752 = vmatpush.bf16.msrb.mxu3 %v4382_v51 }
 0x206   :  { %v2287_v10 = vpop.f32.mrf.mxu1  ;;  %v2329_v61 = vpop.f32.mrf.mxu0  ;;  %2753 = vmatpush.bf16.msrb.mxu3 %v4381_v59 }
 0x207   :  { %v2288_v35 = vadd.f32 %v2287_v10, %v2274_v32  ;;  %v2330_v47 = vadd.f32 %v2329_v61, %v1562_v21 }
 0x20d   :  { %v2245_v50 = vpop.f32.mrf.mxu2 }
 0x20e   :  { %v2246_v12 = vadd.f32 %v2245_v50, %v2232_v8  ;;  %v2289_v29 = vpop.f32.mrf.mxu1  ;;  %v2331_v46 = vpop.f32.mrf.mxu0  ;;  %v1563_v8 = vperm.slane %v4748_v56, 3  ;;  %v4403_v56 = vld [vmem:[%s4768_s8] ss:$0 sm:$0xff]  ;;  %s4618_s8 = smov 128  }
 0x20f   :  { %v2290_v36 = vadd.f32 %v2289_v29, %v2276_v34  ;;  %v2332_v49 = vadd.f32 %v2331_v46, %v1562_v21 }
 0x215   :  { %v2247_v63 = vpop.f32.mrf.mxu2 }
 0x216   :  { %v2248_v14 = vadd.f32 %v2247_v63, %v2234_v11 }
 0x217   :  { %v2343_v39 = vpop.f32.mrf.mxu1 }
 0x218   :  { %v2344_v50 = vadd.f32 %v2343_v39, %v2330_v47 }
 0x21e   :  { %v2301_v13 = vpop.f32.mrf.mxu2 }
 0x21f   :  { %v2302_v57 = vadd.f32 %v2301_v13, %v2288_v35  ;;  %v2345_v48 = vpop.f32.mrf.mxu1 }
 0x220   :  { %v2346_v53 = vadd.f32 %v2345_v48, %v2332_v49 }
 0x226   :  { %v2303_v3 = vpop.f32.mrf.mxu2  ;;  %v2385_v5 = vpop.f32.mrf.mxu0 }
 0x227   :  { %v2304_v62 = vadd.f32 %v2303_v3, %v2290_v36  ;;  %v2386_v11 = vadd.f32 %v2385_v5, %v1563_v8 }
 0x22c   :  { %v2259_v4 = vpop.f32.mrf.mxu3 }
 0x22d   :  { %v2260_v16 = vadd.f32 %v2259_v4, %v2246_v12 }
 0x22e   :  { %v2357_v15 = vpop.f32.mrf.mxu2  ;;  %v2387_v9 = vpop.f32.mrf.mxu0 }
 0x22f   :  { %v2432_v19 = vmax.f32 %v2260_v16, 0.0  ;;  %v2358_v54 = vadd.f32 %v2357_v15, %v2344_v50  ;;  %v2388_v13 = vadd.f32 %v2387_v9, %v1563_v8 }
 0x234   :  { %v2261_v17 = vpop.f32.mrf.mxu3 }
 0x235   :  { %v2262_v18 = vadd.f32 %v2261_v17, %v2248_v14 }
 0x236   :  { %v2359_v52 = vpop.f32.mrf.mxu2 }
 0x237   :  { %v2436_v20 = vmax.f32 %v2262_v18, 0.0  ;;  %v2360_v55 = vadd.f32 %v2359_v52, %v2346_v53  ;;  %v2399_v6 = vpop.f32.mrf.mxu1 }
 0x238   :  { %v2400_v14 = vadd.f32 %v2399_v6, %v2386_v11 }
 0x239   :  { %v2440_v28 = vpack.c.bf16 %v2436_v20, %v2432_v19 }
 0x23b   :  { %2712 = vmatmul.bf16.vlgmr.msrb.gmra.mxu0 %v2440_v28 }
 0x23c   :  { %v2315_v31 = vpop.f32.mrf.mxu3 }
 0x23d   :  { %v2316_v38 = vadd.f32 %v2315_v31, %v2302_v57 }
 0x23f   :  { %v2433_v42 = vmax.f32 %v2316_v38, 0.0  ;;  %v2401_v12 = vpop.f32.mrf.mxu1 }
 0x240   :  { %v2402_v1 = vadd.f32 %v2401_v12, %v2388_v13 }
 0x244   :  { %v2317_v40 = vpop.f32.mrf.mxu3 }
 0x245   :  { %v2318_v41 = vadd.f32 %v2317_v40, %v2304_v62 }
 0x247   :  { %v2437_v43 = vmax.f32 %v2318_v41, 0.0 }
 0x249   :  { %v2441_v45 = vpack.c.bf16 %v2437_v43, %v2433_v42 }
 0x24b   :  { %2726 = vmatmul.bf16.vlgmr.msrb.gmra.mxu1 %v2441_v45 }
 0x24c   :  { %v2371_v27 = vpop.f32.mrf.mxu3 }
 0x24d   :  { %v2372_v58 = vadd.f32 %v2371_v27, %v2358_v54 }
 0x24e   :  { %v2413_v7 = vpop.f32.mrf.mxu2 }
 0x24f   :  { %v2434_v0 = vmax.f32 %v2372_v58, 0.0  ;;  %v2414_v17 = vadd.f32 %v2413_v7, %v2400_v14 }
 0x254   :  { %v2373_v60 = vpop.f32.mrf.mxu3 }
 0x255   :  { %v2374_v63 = vadd.f32 %v2373_v60, %v2360_v55 }
 0x256   :  { %v2415_v16 = vpop.f32.mrf.mxu2 }
 0x257   :  { %v2438_v2 = vmax.f32 %v2374_v63, 0.0  ;;  %v2416_v18 = vadd.f32 %v2415_v16, %v2402_v1 }
 0x259   :  { %v2442_v4 = vpack.c.bf16 %v2438_v2, %v2434_v0 }
 0x25b   :  { %2740 = vmatmul.bf16.vlgmr.msrb.gmra.mxu2 %v2442_v4 }
 0x26c   :  { %v2427_v10 = vpop.f32.mrf.mxu3 }
 0x26d   :  { %v2428_v19 = vadd.f32 %v2427_v10, %v2414_v17 }
 0x26f   :  { %v2435_v23 = vmax.f32 %v2428_v19, 0.0 }
 0x274   :  { %v2429_v20 = vpop.f32.mrf.mxu3 }
 0x275   :  { %v2430_v22 = vadd.f32 %v2429_v20, %v2416_v18 }
 0x277   :  { %v2439_v24 = vmax.f32 %v2430_v22, 0.0 }
 0x279   :  { %v2443_v26 = vpack.c.bf16 %v2439_v24, %v2435_v23 }
 0x27b   :  { %2754 = vmatmul.bf16.vlgmr.msrb.gmra.mxu3 %v2443_v26 }
 0x2b8   :  { %v2713_v28 = vpop.f32.mrf.mxu0 }
 0x2b9   :  { %v2714_v3 = vadd.f32 %v4403_v56, %v2713_v28 }
 0x2c0   :  { %v2715_v33 = vpop.f32.mrf.mxu0 }
 0x2c1   :  { %v2716_v57 = vadd.f32 %v4403_v56, %v2715_v33 }
 0x2c8   :  { %v2727_v29 = vpop.f32.mrf.mxu1 }
 0x2c9   :  { %v2728_v31 = vadd.f32 %v2727_v29, %v2714_v3 }
 0x2d0   :  { %v2729_v36 = vpop.f32.mrf.mxu1 }
 0x2d1   :  { %v2730_v61 = vadd.f32 %v2729_v36, %v2716_v57 }
 0x2de   :  { %v2741_v30 = vpop.f32.mrf.mxu2 }
 0x2df   :  { %v2742_v32 = vadd.f32 %v2741_v30, %v2728_v31 }
 0x2e6   :  { %v2743_v37 = vpop.f32.mrf.mxu2 }
 0x2e7   :  { %v2744_v62 = vadd.f32 %v2743_v37, %v2730_v61 }
 0x2fe   :  { %v2755_v34 = vpop.f32.mrf.mxu3 }
 0x2ff   :  { %v2756_v35 = vadd.f32 %v2755_v34, %v2742_v32 }
 0x301   :  { %2760 = vst [vmem:[#allocation14] sm:$0xff] %v2756_v35 }
 0x306   :  { %v2757_v38 = vpop.f32.mrf.mxu3 }
 0x307   :  { %v2758_v39 = vadd.f32 %v2757_v38, %v2744_v62 }
 0x309   :  { %2761 = vst [vmem:[#allocation14 + $0x8] sm:$0xff] %v2758_v39 }
 0x30a   :  { %2774 = dma.vmem_to_hbm [thread:$0]  %s2767_s1, 256, %s2769_s26, [#allocation4], %s4618_s8, %s4618_s8, %s4619_s27  }
 0x30b   :  { %4604 = dma.done.wait [#allocation4], 256  }
 0x30c   :  { %4605 = vsyncadd [#allocation4], 4294967040 }
 0x30d   :  { %2779 = vsyncpa [#allocation3], 1 }
 0x30e   :  { %2780 = vsyncpa [#allocation6], 1 }
 0x30f   :  { %2781 = vsyncpa [#allocation9], 1 }
 0x310   :  { %2782 = vsyncpa [#allocation12], 1 }
 0x311   :  { %2783 = vsyncpa [#allocation4], 1 }

</bundles_post_ra>
